<compile_context>
chip_gen: v5e
topology: v5e:2x2
jax: 0.10.0
libtpu: 0.0.40
codegen_flags: <defaults>
</compile_context>

<pallas_src>
import functools

import jax
import jax.numpy as jnp
from jax.experimental import pallas as pl
from jax.experimental.pallas import tpu as pltpu

LANE = 128


def _round_up(x, m):
    return ((x + m - 1) // m) * m


def _pad2d(a, rows, cols, dtype):
    a = jnp.asarray(a)
    if a.ndim == 1:
        a = a.reshape(1, -1)
    a = jnp.pad(a, ((0, rows - a.shape[0]), (0, cols - a.shape[1])))
    return a.astype(dtype)


def prepare_adjacency(adj, *, block=256):
    """Pad the (static) normalized adjacency to a tile multiple and cast to bf16.

    Call once and reuse across forward calls; re-padding/casting the N^2 matrix
    on every call is an extra full HBM pass in front of an HBM-bound kernel.
    """
    n = adj.shape[0]
    n_p = _round_up(max(n, block), block)
    return _pad2d(adj, n_p, n_p, jnp.bfloat16)


# ------------------------- fused path (adj VMEM-resident) -------------------
def _fused_gcn_kernel(adj_hbm, x_ref, w1_ref, b1_ref, w2_ref, b2_ref,
                      wfc_ref, bfc_ref, out_ref,
                      adj_vmem, ft_ref, h1_ref, adj_sem, *, block):
    phase = pl.program_id(0)   # 0: layer-1 rows, 1: layer-2 + FC rows
    i = pl.program_id(1)       # node row tile

    @pl.when((phase == 0) & (i == 0))
    def _():
        # One-time DMA of the whole adjacency into a single-buffered VMEM
        # scratch, overlapped with the (adjacency-independent) hoisted
        # layer-1 feature matmul XW = x @ W1.
        cp = pltpu.make_async_copy(adj_hbm, adj_vmem, adj_sem)
        cp.start()
        ft_ref[...] = jnp.dot(x_ref[...], w1_ref[...],
                              preferred_element_type=jnp.float32
                              ).astype(ft_ref.dtype)
        cp.wait()

    rows = pl.ds(pl.multiple_of(i * block, block), block)

    @pl.when(phase == 0)
    def _():
        agg = jnp.dot(adj_vmem[rows, :], ft_ref[...],
                      preferred_element_type=jnp.float32)
        h1_ref[rows, :] = jnp.maximum(agg + b1_ref[...],
                                      0.0).astype(h1_ref.dtype)

    @pl.when((phase == 1) & (i == 0))
    def _():
        # Hoisted layer-2 feature matmul HW = h1 @ W2 (reuses the ft scratch).
        ft_ref[...] = jnp.dot(h1_ref[...], w2_ref[...],
                              preferred_element_type=jnp.float32
                              ).astype(ft_ref.dtype)

    @pl.when(phase == 1)
    def _():
        h2 = jnp.dot(adj_vmem[rows, :], ft_ref[...],
                     preferred_element_type=jnp.float32) + b2_ref[...]
        out_ref[...] = (jnp.dot(h2.astype(wfc_ref.dtype), wfc_ref[...],
                                preferred_element_type=jnp.float32)
                        + bfc_ref[...])            # lane-dense f32 store


# ------------------------- streamed path kernels ----------------------------
def _feat_kernel(x_ref, w_ref, o_ref):
    # Hoisted feature transform: one pass over the node rows, weight resident.
    o_ref[...] = jnp.dot(x_ref[...], w_ref[...],
                         preferred_element_type=jnp.float32).astype(o_ref.dtype)


def _agg_relu_kernel(adj_ref, ft_ref, b_ref, o_ref, acc_ref):
    k = pl.program_id(1)

    @pl.when(k == 0)
    def _():
        acc_ref[...] = jnp.zeros_like(acc_ref)

    acc_ref[...] += jnp.dot(adj_ref[...], ft_ref[...],
                            preferred_element_type=jnp.float32)

    @pl.when(k == pl.num_programs(1) - 1)
    def _():
        o_ref[...] = jnp.maximum(acc_ref[...] + b_ref[...],
                                 0.0).astype(o_ref.dtype)


def _agg_fc_kernel(adj_ref, ft_ref, b_ref, wfc_ref, bfc_ref, o_ref, acc_ref):
    k = pl.program_id(1)

    @pl.when(k == 0)
    def _():
        acc_ref[...] = jnp.zeros_like(acc_ref)

    acc_ref[...] += jnp.dot(adj_ref[...], ft_ref[...],
                            preferred_element_type=jnp.float32)

    @pl.when(k == pl.num_programs(1) - 1)
    def _():
        h2 = acc_ref[...] + b_ref[...]
        o_ref[...] = (jnp.dot(h2.astype(wfc_ref.dtype), wfc_ref[...],
                              preferred_element_type=jnp.float32)
                      + bfc_ref[...])


# ----------------------------- forward wrapper ------------------------------
def gcn_forward(adj, x, w1, b1, w2, b2, wfc, bfc, *,
                block=256, fuse_vmem_budget=40 * 1024 * 1024,
                force_streamed=False):
    """bf16-compute / f32-accumulate GCN forward.

    adj may be the raw f32 normalized adjacency or the output of
    prepare_adjacency() (already padded + bf16, reused across calls).
    """
    n, f = x.shape
    h = w1.shape[1]
    c = wfc.shape[1]

    bf16, f32 = jnp.bfloat16, jnp.float32

    n_p = _round_up(max(n, block), block)
    f_p = _round_up(f, LANE)
    h_p = _round_up(h, LANE)
    c_p = _round_up(c, LANE)
    n_tiles = n_p // block

    # Zero padding is exact: padded feature columns contribute nothing, and
    # padded node rows/cols only affect padded output rows (sliced off below).
    if adj.dtype == bf16 and adj.shape == (n_p, n_p):
        adj_p = adj                                   # pre-prepared, cached
    else:
        adj_p = _pad2d(adj, n_p, n_p, bf16)
    x_p = _pad2d(x, n_p, f_p, bf16)
    w1_p = _pad2d(w1, f_p, h_p, bf16)
    w2_p = _pad2d(w2, h_p, h_p, bf16)
    wfc_p = _pad2d(wfc, h_p, c_p, bf16)
    b1_p = _pad2d(b1, 1, h_p, f32)
    b2_p = _pad2d(b2, 1, h_p, f32)
    bfc_p = _pad2d(bfc, 1, c_p, f32)

    adj_bytes = n_p * n_p * 2
    # Fused-path VMEM need: adj scratch + ft/h1 scratches + double-buffered x.
    fused_bytes = (adj_bytes + 2 * n_p * h_p * 2 + 2 * n_p * f_p * 2
                   + 4 * (f_p * h_p + h_p * h_p + h_p * c_p))
    use_fused = (not force_streamed) and fused_bytes <= fuse_vmem_budget

    if use_fused:
        # Single call: adjacency read from HBM exactly once, both layers fused.
        resident = lambda p, i: (0, 0)
        flops = (2 * n_p * f_p * h_p + 2 * n_p * h_p * h_p
                 + 2 * 2 * n_p * n_p * h_p + 2 * n_p * h_p * c_p)
        bytes_accessed = (adj_bytes + n_p * f_p * 2 + n_p * c_p * 4
                          + 2 * (f_p * h_p + h_p * h_p + h_p * c_p))
        out_p = pl.pallas_call(
            functools.partial(_fused_gcn_kernel, block=block),
            out_shape=jax.ShapeDtypeStruct((n_p, c_p), f32),
            grid_spec=pltpu.PrefetchScalarGridSpec(
                num_scalar_prefetch=0,
                grid=(2, n_tiles),                 # (layer phase, row tile)
                in_specs=[
                    pl.BlockSpec(memory_space=pl.ANY),   # adj stays in HBM
                    pl.BlockSpec((n_p, f_p), resident),  # x
                    pl.BlockSpec((f_p, h_p), resident),  # W1
                    pl.BlockSpec((1, h_p), resident),    # b1
                    pl.BlockSpec((h_p, h_p), resident),  # W2
                    pl.BlockSpec((1, h_p), resident),    # b2
                    pl.BlockSpec((h_p, c_p), resident),  # Wfc
                    pl.BlockSpec((1, c_p), resident),    # bfc
                ],
                # Phase 0 parks the (unwritten) output buffer on block 0;
                # phase 1 writes row tile i.  Monotonic, no revisits.
                out_specs=pl.BlockSpec((block, c_p), lambda p, i: (p * i, 0)),
                scratch_shapes=[
                    pltpu.VMEM((n_p, n_p), bf16),   # adjacency (single copy)
                    pltpu.VMEM((n_p, h_p), bf16),   # XW / HW feature transform
                    pltpu.VMEM((n_p, h_p), bf16),   # h1
                    pltpu.SemaphoreType.DMA,        # adjacency copy semaphore
                ]),
            compiler_params=pltpu.CompilerParams(
                dimension_semantics=("arbitrary", "arbitrary"),
                vmem_limit_bytes=max(32 * 1024 * 1024,
                                     fused_bytes + 8 * 1024 * 1024)),
            cost_estimate=pl.CostEstimate(flops=flops, transcendentals=0,
                                          bytes_accessed=bytes_accessed),
        )(adj_p, x_p, w1_p, b1_p, w2_p, b2_p, wfc_p, bfc_p)
        return out_p[:n, :c]

    # ---- streamed fallback (large N): adj tiles streamed, one pass/layer ----
    compiler_params = pltpu.CompilerParams(
        dimension_semantics=("parallel", "arbitrary"),
        vmem_limit_bytes=32 * 1024 * 1024)
    grid = (n_tiles, n_tiles)
    resident2 = lambda i, k: (0, 0)

    def feature_transform(feats, w):
        fin = feats.shape[1]
        return pl.pallas_call(
            _feat_kernel,
            out_shape=jax.ShapeDtypeStruct((n_p, h_p), bf16),
            grid_spec=pltpu.PrefetchScalarGridSpec(
                num_scalar_prefetch=0,
                grid=(n_tiles,),
                in_specs=[pl.BlockSpec((block, fin), lambda i: (i, 0)),
                          pl.BlockSpec((fin, h_p), lambda i: (0, 0))],
                out_specs=pl.BlockSpec((block, h_p), lambda i: (i, 0))),
            compiler_params=pltpu.CompilerParams(
                dimension_semantics=("parallel",),
                vmem_limit_bytes=32 * 1024 * 1024),
            cost_estimate=pl.CostEstimate(
                flops=2 * n_p * fin * h_p, transcendentals=0,
                bytes_accessed=2 * (n_p * fin + fin * h_p + n_p * h_p)),
        )(feats, w)

    def aggregate(kernel, ft, extra_in, extra_specs, out_cols, out_dtype,
                  flops, nbytes):
        return pl.pallas_call(
            kernel,
            out_shape=jax.ShapeDtypeStruct((n_p, out_cols), out_dtype),
            grid_spec=pltpu.PrefetchScalarGridSpec(
                num_scalar_prefetch=0,
                grid=grid,
                in_specs=[pl.BlockSpec((block, block), lambda i, k: (i, k)),
                          pl.BlockSpec((block, h_p), lambda i, k: (k, 0)),
                          *extra_specs],
                out_specs=pl.BlockSpec((block, out_cols), lambda i, k: (i, 0)),
                scratch_shapes=[pltpu.VMEM((block, h_p), f32)]),
            compiler_params=compiler_params,
            cost_estimate=pl.CostEstimate(flops=flops, transcendentals=0,
                                          bytes_accessed=nbytes),
        )(adj_p, ft, *extra_in)

    xw = feature_transform(x_p, w1_p)                       # (n_p, h_p) bf16
    h1 = aggregate(_agg_relu_kernel, xw,
                   (b1_p,), [pl.BlockSpec((1, h_p), resident2)],
                   h_p, bf16,
                   flops=2 * n_p * n_p * h_p,
                   nbytes=adj_bytes + n_tiles * n_p * h_p * 2 + n_p * h_p * 2)
    hw = feature_transform(h1, w2_p)                        # (n_p, h_p) bf16
    out_p = aggregate(_agg_fc_kernel, hw,
                      (b2_p, wfc_p, bfc_p),
                      [pl.BlockSpec((1, h_p), resident2),
                       pl.BlockSpec((h_p, c_p), resident2),
                       pl.BlockSpec((1, c_p), resident2)],
                      c_p, f32,
                      flops=2 * n_p * n_p * h_p + 2 * n_p * h_p * c_p,
                      nbytes=adj_bytes + n_tiles * n_p * h_p * 2
                             + n_p * c_p * 4 + 2 * h_p * c_p)
    return out_p[:n, :c]


# --------------------------------- helpers ----------------------------------
def build_normalized_adjacency(key, n_nodes, edge_prob=0.3):
    """Random undirected graph + self loops, symmetric normalization (A_hat)."""
    bern = jax.random.bernoulli(key, p=edge_prob, shape=(n_nodes, n_nodes))
    a = jnp.triu(bern.astype(jnp.float32), k=1)
    a = a + a.T + jnp.eye(n_nodes, dtype=jnp.float32)
    deg = jnp.sum(a, axis=1)
    d_inv_sqrt = 1.0 / jnp.sqrt(jnp.maximum(deg, 1.0))
    return a * d_inv_sqrt[:, None] * d_inv_sqrt[None, :]


def glorot(key, shape):
    fan_in, fan_out = shape
    limit = jnp.sqrt(6.0 / (fan_in + fan_out))
    return jax.random.uniform(key, shape, jnp.float32, -limit, limit)


if __name__ == "__main__":
    # Small, module-consistent shapes; F_in/H/C deliberately not multiples of
    # 128 (exercises lane padding), N not a multiple of the row tile.
    n_nodes, in_feats, n_hidden, n_classes = 384, 96, 64, 8

    root = jax.random.PRNGKey(0)
    k_adj, k_x, k_w1, k_w2, k_wfc, k_bfc = jax.random.split(root, 6)

    adj = build_normalized_adjacency(k_adj, n_nodes)
    x = jax.random.normal(k_x, (n_nodes, in_feats), jnp.float32)

    # GraphConv: glorot weights, zero bias; Linear: glorot weight, uniform bias.
    w1 = glorot(k_w1, (in_feats, n_hidden))
    b1 = jnp.zeros((1, n_hidden), jnp.float32)
    w2 = glorot(k_w2, (n_hidden, n_hidden))
    b2 = jnp.zeros((1, n_hidden), jnp.float32)
    wfc = glorot(k_wfc, (n_hidden, n_classes))
    bfc = jax.random.uniform(k_bfc, (1, n_classes), jnp.float32, -0.1, 0.1)

    # Fused path: adjacency padded/cast ONCE (cached) and streamed to VMEM once.
    adj_prep = prepare_adjacency(adj, block=256)
    out_fused = gcn_forward(adj_prep, x, w1, b1, w2, b2, wfc, bfc, block=256)
    out_fused = jax.block_until_ready(out_fused)

    # Streamed path (what large graphs use): tiled adjacency, hoisted XW/HW.
    out_streamed = gcn_forward(adj, x, w1, b1, w2, b2, wfc, bfc,
                               block=128, force_streamed=True)
    out_streamed = jax.block_until_ready(out_streamed)

    # Reference mirroring the kernel dtype path (bf16 operands, f32 accumulate).
    bf, f32 = jnp.bfloat16, jnp.float32

    def mm(a, b):
        return jnp.dot(a.astype(bf), b.astype(bf), preferred_element_type=f32)

    xw_r = mm(x, w1).astype(bf)
    h1_r = jnp.maximum(mm(adj, xw_r) + b1, 0.0).astype(bf)
    hw_r = mm(h1_r, w2).astype(bf)
    h2_r = mm(adj, hw_r) + b2
    ref = mm(h2_r, wfc) + bfc

    assert out_fused.shape == (n_nodes, n_classes)
    assert out_streamed.shape == (n_nodes, n_classes)
    err_f = float(jnp.max(jnp.abs(out_fused - ref)))
    err_s = float(jnp.max(jnp.abs(out_streamed - ref)))
    assert jnp.allclose(out_fused, ref, atol=2e-2, rtol=2e-2), err_f
    assert jnp.allclose(out_streamed, ref, atol=2e-2, rtol=2e-2), err_s

    print("KERNEL_OK")
</pallas_src>

<mosaic_0001>
module attributes {stable_mosaic.version = 11 : i64} {
  func.func @_fused_gcn_kernel(%arg0: i32, %arg1: i32, %arg2: memref<512x512xbf16, #tpu.memory_space<any>>, %arg3: memref<512x128xbf16, #tpu.memory_space<vmem>>, %arg4: memref<128x128xbf16, #tpu.memory_space<vmem>>, %arg5: memref<1x128xf32, #tpu.memory_space<vmem>>, %arg6: memref<128x128xbf16, #tpu.memory_space<vmem>>, %arg7: memref<1x128xf32, #tpu.memory_space<vmem>>, %arg8: memref<128x128xbf16, #tpu.memory_space<vmem>>, %arg9: memref<1x128xf32, #tpu.memory_space<vmem>>, %arg10: memref<256x128xf32, #tpu.memory_space<vmem>>, %arg11: memref<512x512xbf16, #tpu.memory_space<vmem>>, %arg12: memref<512x128xbf16, #tpu.memory_space<vmem>>, %arg13: memref<512x128xbf16, #tpu.memory_space<vmem>>, %arg14: memref<!tpu.dma_semaphore, #tpu.memory_space<semaphore_mem>>) attributes {dimension_semantics = [#tpu.dimension_semantics<arbitrary>, #tpu.dimension_semantics<arbitrary>], iteration_bounds = array<i64: 2, 2>, scalar_prefetch = 0 : i64, scratch_operands = 4 : i64, tpu.core_type = #tpu.core_type<tc>, window_params = [{}, {pipeline_mode = #tpu.pipeline_mode<synchronous>, transform_indices = @transform_1, window_bounds = array<i64: 512, 128>}, {pipeline_mode = #tpu.pipeline_mode<synchronous>, transform_indices = @transform_2, window_bounds = array<i64: 128, 128>}, {pipeline_mode = #tpu.pipeline_mode<synchronous>, transform_indices = @transform_3, window_bounds = array<i64: 1, 128>}, {pipeline_mode = #tpu.pipeline_mode<synchronous>, transform_indices = @transform_4, window_bounds = array<i64: 128, 128>}, {pipeline_mode = #tpu.pipeline_mode<synchronous>, transform_indices = @transform_5, window_bounds = array<i64: 1, 128>}, {pipeline_mode = #tpu.pipeline_mode<synchronous>, transform_indices = @transform_6, window_bounds = array<i64: 128, 128>}, {pipeline_mode = #tpu.pipeline_mode<synchronous>, transform_indices = @transform_7, window_bounds = array<i64: 1, 128>}, {transform_indices = @transform_8, window_bounds = array<i64: 256, 128>}]} {
    %c0_i32 = arith.constant 0 : i32
    %0 = arith.cmpi eq, %arg0, %c0_i32 : i32
    %c0_i32_0 = arith.constant 0 : i32
    %1 = arith.cmpi eq, %arg1, %c0_i32_0 : i32
    %2 = arith.andi %0, %1 : i1
    %3 = arith.extui %2 : i1 to i32
    %c0_i32_1 = arith.constant 0 : i32
    %4 = arith.cmpi ne, %3, %c0_i32_1 : i32
    scf.if %4 {
      tpu.enqueue_dma source(%arg2 : memref<512x512xbf16, #tpu.memory_space<any>>) target(%arg11 : memref<512x512xbf16, #tpu.memory_space<vmem>>) target_semaphore(%arg14 : memref<!tpu.dma_semaphore, #tpu.memory_space<semaphore_mem>>)
      %c0 = arith.constant 0 : index
      %c0_8 = arith.constant 0 : index
      %18 = vector.load %arg3[%c0, %c0_8] : memref<512x128xbf16, #tpu.memory_space<vmem>>, vector<512x128xbf16>
      %c0_9 = arith.constant 0 : index
      %c0_10 = arith.constant 0 : index
      %19 = vector.load %arg4[%c0_9, %c0_10] : memref<128x128xbf16, #tpu.memory_space<vmem>>, vector<128x128xbf16>
      %cst = arith.constant dense<0.000000e+00> : vector<512x128xf32>
      %20 = tpu.matmul %18, %19, %cst {dimension_numbers = #tpu.dot_dimension_numbers<[1], [0], [0], [1], [0, 0, 1, 1], [], []>} : vector<512x128xbf16>, vector<128x128xbf16>, vector<512x128xf32> -> vector<512x128xf32>
      %21 = arith.truncf %20 : vector<512x128xf32> to vector<512x128xbf16>
      %c0_11 = arith.constant 0 : index
      %c0_12 = arith.constant 0 : index
      %22 = vector.load %arg12[%c0_11, %c0_12] : memref<512x128xbf16, #tpu.memory_space<vmem>>, vector<512x128xbf16>
      tpu.vector_store %arg12[%c0_11, %c0_12], %21 {strides = array<i32>} : memref<512x128xbf16, #tpu.memory_space<vmem>>, vector<512x128xbf16>,
      tpu.wait_dma2 semaphore(%arg14 : memref<!tpu.dma_semaphore, #tpu.memory_space<semaphore_mem>>) src(%arg2 : memref<512x512xbf16, #tpu.memory_space<any>>) dst(%arg11 : memref<512x512xbf16, #tpu.memory_space<vmem>>)
    } else {
    }
    %c256_i32 = arith.constant 256 : i32
    %5 = arith.muli %arg1, %c256_i32 : i32
    %6 = tpu.assume_multiple %5, 256 : i32
    %c0_i32_2 = arith.constant 0 : i32
    %7 = arith.cmpi eq, %arg0, %c0_i32_2 : i32
    %8 = arith.extui %7 : i1 to i32
    %c0_i32_3 = arith.constant 0 : i32
    %9 = arith.cmpi ne, %8, %c0_i32_3 : i32
    scf.if %9 {
      %18 = arith.index_cast %6 : i32 to index
      %c0 = arith.constant 0 : index
      %19 = vector.load %arg11[%18, %c0] : memref<512x512xbf16, #tpu.memory_space<vmem>>, vector<256x512xbf16>
      %c0_8 = arith.constant 0 : index
      %c0_9 = arith.constant 0 : index
      %20 = vector.load %arg12[%c0_8, %c0_9] : memref<512x128xbf16, #tpu.memory_space<vmem>>, vector<512x128xbf16>
      %cst = arith.constant dense<0.000000e+00> : vector<256x128xf32>
      %21 = tpu.matmul %19, %20, %cst {dimension_numbers = #tpu.dot_dimension_numbers<[1], [0], [0], [1], [0, 0, 1, 1], [], []>} : vector<256x512xbf16>, vector<512x128xbf16>, vector<256x128xf32> -> vector<256x128xf32>
      %c0_10 = arith.constant 0 : index
      %c0_11 = arith.constant 0 : index
      %22 = vector.load %arg5[%c0_10, %c0_11] : memref<1x128xf32, #tpu.memory_space<vmem>>, vector<1x128xf32>
      %23 = vector.broadcast %22 : vector<1x128xf32> to vector<256x128xf32>
      %24 = arith.addf %21, %23 : vector<256x128xf32>
      %cst_12 = arith.constant 0.000000e+00 : f32
      %25 = vector.broadcast %cst_12 : f32 to vector<256x128xf32>
      %26 = arith.maximumf %24, %25 : vector<256x128xf32>
      %27 = arith.truncf %26 : vector<256x128xf32> to vector<256x128xbf16>
      %28 = arith.index_cast %6 : i32 to index
      %c0_13 = arith.constant 0 : index
      %29 = vector.load %arg13[%28, %c0_13] : memref<512x128xbf16, #tpu.memory_space<vmem>>, vector<256x128xbf16>
      tpu.vector_store %arg13[%28, %c0_13], %27 {strides = array<i32>} : memref<512x128xbf16, #tpu.memory_space<vmem>>, vector<256x128xbf16>,
    } else {
    }
    %c1_i32 = arith.constant 1 : i32
    %10 = arith.cmpi eq, %arg0, %c1_i32 : i32
    %c0_i32_4 = arith.constant 0 : i32
    %11 = arith.cmpi eq, %arg1, %c0_i32_4 : i32
    %12 = arith.andi %10, %11 : i1
    %13 = arith.extui %12 : i1 to i32
    %c0_i32_5 = arith.constant 0 : i32
    %14 = arith.cmpi ne, %13, %c0_i32_5 : i32
    scf.if %14 {
      %c0 = arith.constant 0 : index
      %c0_8 = arith.constant 0 : index
      %18 = vector.load %arg13[%c0, %c0_8] : memref<512x128xbf16, #tpu.memory_space<vmem>>, vector<512x128xbf16>
      %c0_9 = arith.constant 0 : index
      %c0_10 = arith.constant 0 : index
      %19 = vector.load %arg6[%c0_9, %c0_10] : memref<128x128xbf16, #tpu.memory_space<vmem>>, vector<128x128xbf16>
      %cst = arith.constant dense<0.000000e+00> : vector<512x128xf32>
      %20 = tpu.matmul %18, %19, %cst {dimension_numbers = #tpu.dot_dimension_numbers<[1], [0], [0], [1], [0, 0, 1, 1], [], []>} : vector<512x128xbf16>, vector<128x128xbf16>, vector<512x128xf32> -> vector<512x128xf32>
      %21 = arith.truncf %20 : vector<512x128xf32> to vector<512x128xbf16>
      %c0_11 = arith.constant 0 : index
      %c0_12 = arith.constant 0 : index
      %22 = vector.load %arg12[%c0_11, %c0_12] : memref<512x128xbf16, #tpu.memory_space<vmem>>, vector<512x128xbf16>
      tpu.vector_store %arg12[%c0_11, %c0_12], %21 {strides = array<i32>} : memref<512x128xbf16, #tpu.memory_space<vmem>>, vector<512x128xbf16>,
    } else {
    }
    %c1_i32_6 = arith.constant 1 : i32
    %15 = arith.cmpi eq, %arg0, %c1_i32_6 : i32
    %16 = arith.extui %15 : i1 to i32
    %c0_i32_7 = arith.constant 0 : i32
    %17 = arith.cmpi ne, %16, %c0_i32_7 : i32
    scf.if %17 {
      %18 = arith.index_cast %6 : i32 to index
      %c0 = arith.constant 0 : index
      %19 = vector.load %arg11[%18, %c0] : memref<512x512xbf16, #tpu.memory_space<vmem>>, vector<256x512xbf16>
      %c0_8 = arith.constant 0 : index
      %c0_9 = arith.constant 0 : index
      %20 = vector.load %arg12[%c0_8, %c0_9] : memref<512x128xbf16, #tpu.memory_space<vmem>>, vector<512x128xbf16>
      %cst = arith.constant dense<0.000000e+00> : vector<256x128xf32>
      %21 = tpu.matmul %19, %20, %cst {dimension_numbers = #tpu.dot_dimension_numbers<[1], [0], [0], [1], [0, 0, 1, 1], [], []>} : vector<256x512xbf16>, vector<512x128xbf16>, vector<256x128xf32> -> vector<256x128xf32>
      %c0_10 = arith.constant 0 : index
      %c0_11 = arith.constant 0 : index
      %22 = vector.load %arg7[%c0_10, %c0_11] : memref<1x128xf32, #tpu.memory_space<vmem>>, vector<1x128xf32>
      %23 = vector.broadcast %22 : vector<1x128xf32> to vector<256x128xf32>
      %24 = arith.addf %21, %23 : vector<256x128xf32>
      %25 = arith.truncf %24 : vector<256x128xf32> to vector<256x128xbf16>
      %c0_12 = arith.constant 0 : index
      %c0_13 = arith.constant 0 : index
      %26 = vector.load %arg8[%c0_12, %c0_13] : memref<128x128xbf16, #tpu.memory_space<vmem>>, vector<128x128xbf16>
      %cst_14 = arith.constant dense<0.000000e+00> : vector<256x128xf32>
      %27 = tpu.matmul %25, %26, %cst_14 {dimension_numbers = #tpu.dot_dimension_numbers<[1], [0], [0], [1], [0, 0, 1, 1], [], []>} : vector<256x128xbf16>, vector<128x128xbf16>, vector<256x128xf32> -> vector<256x128xf32>
      %c0_15 = arith.constant 0 : index
      %c0_16 = arith.constant 0 : index
      %28 = vector.load %arg9[%c0_15, %c0_16] : memref<1x128xf32, #tpu.memory_space<vmem>>, vector<1x128xf32>
      %29 = vector.broadcast %28 : vector<1x128xf32> to vector<256x128xf32>
      %30 = arith.addf %27, %29 : vector<256x128xf32>
      %c0_17 = arith.constant 0 : index
      %c0_18 = arith.constant 0 : index
      %31 = vector.load %arg10[%c0_17, %c0_18] : memref<256x128xf32, #tpu.memory_space<vmem>>, vector<256x128xf32>
      tpu.vector_store %arg10[%c0_17, %c0_18], %30 {strides = array<i32>} : memref<256x128xf32, #tpu.memory_space<vmem>>, vector<256x128xf32>,
    } else {
    }
    return
  }
  func.func @transform_1(%arg0: i32, %arg1: i32) -> (i32, i32) {
    %c0_i32 = arith.constant 0 : i32
    %c0_i32_0 = arith.constant 0 : i32
    %c0_i32_1 = arith.constant 0 : i32
    return %c0_i32, %c0_i32_0 : i32, i32
  }
  func.func @transform_2(%arg0: i32, %arg1: i32) -> (i32, i32) {
    %c0_i32 = arith.constant 0 : i32
    %c0_i32_0 = arith.constant 0 : i32
    %c0_i32_1 = arith.constant 0 : i32
    return %c0_i32, %c0_i32_0 : i32, i32
  }
  func.func @transform_3(%arg0: i32, %arg1: i32) -> (i32, i32) {
    %c0_i32 = arith.constant 0 : i32
    %c0_i32_0 = arith.constant 0 : i32
    %c0_i32_1 = arith.constant 0 : i32
    return %c0_i32, %c0_i32_0 : i32, i32
  }
  func.func @transform_4(%arg0: i32, %arg1: i32) -> (i32, i32) {
    %c0_i32 = arith.constant 0 : i32
    %c0_i32_0 = arith.constant 0 : i32
    %c0_i32_1 = arith.constant 0 : i32
    return %c0_i32, %c0_i32_0 : i32, i32
  }
  func.func @transform_5(%arg0: i32, %arg1: i32) -> (i32, i32) {
    %c0_i32 = arith.constant 0 : i32
    %c0_i32_0 = arith.constant 0 : i32
    %c0_i32_1 = arith.constant 0 : i32
    return %c0_i32, %c0_i32_0 : i32, i32
  }
  func.func @transform_6(%arg0: i32, %arg1: i32) -> (i32, i32) {
    %c0_i32 = arith.constant 0 : i32
    %c0_i32_0 = arith.constant 0 : i32
    %c0_i32_1 = arith.constant 0 : i32
    return %c0_i32, %c0_i32_0 : i32, i32
  }
  func.func @transform_7(%arg0: i32, %arg1: i32) -> (i32, i32) {
    %c0_i32 = arith.constant 0 : i32
    %c0_i32_0 = arith.constant 0 : i32
    %c0_i32_1 = arith.constant 0 : i32
    return %c0_i32, %c0_i32_0 : i32, i32
  }
  func.func @transform_8(%arg0: i32, %arg1: i32) -> (i32, i32) {
    %0 = arith.muli %arg0, %arg1 : i32
    %c0_i32 = arith.constant 0 : i32
    %c0_i32_0 = arith.constant 0 : i32
    return %0, %c0_i32 : i32, i32
  }
}

</mosaic_0001>

<bundles_post_ra>
// kernel: tpu_custom_call.1
= control target key start
LH: loop header
LB: loop body
LE: loop exit
PB: predicated region body
PF: predicated region fallthrough
CT: control target
= control target key end

     0   :  { %s7147_s0 = inlined_call_operand.hbm [shape: bf16[512,512], index: 0, kind: input, shape index: {}]   ;;  %s7148_s1 = inlined_call_operand.hbm [shape: bf16[512,128], index: 1, kind: input, shape index: {}]   ;;  %s7149_s2 = inlined_call_operand.hbm [shape: bf16[128,128], index: 2, kind: input, shape index: {}]   ;;  %s7150_s3 = inlined_call_operand.vmem [shape: f32[1,128], index: 3, kind: input, shape index: {}]   ;;  %s7151_s4 = inlined_call_operand.hbm [shape: bf16[128,128], index: 4, kind: input, shape index: {}]   ;;  %s7152_s5 = inlined_call_operand.vmem [shape: f32[1,128], index: 5, kind: input, shape index: {}]   ;;  %s7153_s6 = inlined_call_operand.hbm [shape: bf16[128,128], index: 6, kind: input, shape index: {}]   ;;  %s7154_s7 = inlined_call_operand.vmem [shape: f32[1,128], index: 7, kind: input, shape index: {}]   ;;  %s7155_s8 = inlined_call_operand.hbm [shape: f32[512,128], index: 8, kind: output, shape index: {}]  }
   0x1   :  { %7163 = sst [smem:[#allocation32_spill]] %s7149_s2 }
   0x2   :  { %13 = vsyncpa [#allocation7], 0 }
   0x3   :  { %14 = vsyncpa [#allocation10], 0 }
   0x4   :  { %15 = vsyncpa [#allocation13], 0 }
   0x5   :  { %16 = vsyncpa [#allocation8], 0 }
   0x6   :  { %18 = vsyncpa [#allocation8 + $0x1], 0  ;;  %s6461_s27 = smov 0   ;;  %s6463_s28 = smov 0  }
   0x7   :  { %s6465_s29 = smov 0   ;;  %s6467_s30 = smov 0  }
   0x8   :  { %s6469_s9 = smov 0   ;;  %s6471_s10 = smov 0  }
   0x9   :  { %s6473_s11 = smov 0   ;;  %s6475_s12 = smov 0  }
   0xa LB: > { %7164 = sst [smem:[#allocation24_spill]] %s6377_s27  ;;  %s4054_s13 = sadd.s32 4294967295, %s6405_s12   ;;  %s6405_s12 = sphi %s6475_s12, %s24_s12   ;;  %s6401_s11 = sphi %s6473_s11, %s7185_s11   ;;  %s6397_s10 = sphi %s6471_s10, %s7184_s10   ;;  %s6393_s9 = sphi %s6469_s9, %s7183_s9   ;;  %s6389_s30 = sphi %s6467_s30, %s7182_s30   ;;  %s6385_s29 = sphi %s6465_s29, %s7181_s29   ;;  %s6381_s28 = sphi %s6463_s28, %s7187_s28   ;;  %s6377_s27 = sphi %s6461_s27, %s7186_s27  }
   0xb   : > { %7165 = sst [smem:[#allocation25_spill]] %s6385_s29  ;;  %s4055_s14 = sadd.s32 4294967294, %s6405_s12  }
   0xc   : > { %7166 = sst [smem:[#allocation26_spill]] %s6397_s10  ;;  %s33_s15 = sadd.s32 1, %s6397_s10 }
   0xd   : > { %7167 = sst [smem:[#allocation27_spill]] %s6401_s11  ;;  %s36_s16 = sadd.s32 1, %s6401_s11 }
   0xe   : > { %p34_p0 = scmp.ge.s32.totalorder %s33_s15, 2  ;;  %s187_s17 = smul.u32 %s6397_s10, %s6401_s11 }
   0xf   : > { %s192_s18 = sadd.s32 1, %s6385_s29  ;;  %p202_p1 = scmp.ne.s32.totalorder %s6385_s29, %s6381_s28 }
  0x10   : > { %s7189_s15 = smov (%p34_p0, %s33_s15), 0  ;;  %s7191_s16 = smov (!%p34_p0, %s36_s16), %s6401_s11 }
  0x11   : > { %7168 = sst [smem:[#allocation28_spill]] %s7189_s15  ;;  %p203_p2 = scmp.eq.s32.totalorder %s4054_s13, 3 }
  0x12   : > { %p208_p3 = scmp.ne.s32.totalorder %s6381_s28, %s6377_s27  ;;  %p38_p4 = scmp.ge.s32.totalorder %s7191_s16, 2 }
  0x13   : > { %p209_p5 = scmp.eq.s32.totalorder %s4055_s14, 3  ;;  %p6515_p6 = por %p203_p2, %p202_p1 }
  0x14   : > { %p4056_p7 = scmp.ge.s32.totalorder %s6405_s12, 1  ;;  %s7193_s16 = smov (%p38_p4, %s7191_s16), 0 }
  0x15   : > { %7170 = sst [smem:[#allocation29_spill]] %s7193_s16  ;;  %p6522_p8 = por %p209_p5, %p208_p3 }
  0x16   : > { %p216_p9 = scmp.lt.s32.totalorder %s6405_s12, 5  ;;  %s188_s21 = smul.u32 %s7193_s16, %s7189_s15 }
  0x17   : > { %s7171_s20 = scalar_select %p6522_p8, 1, 0 }
  0x18   : > { %p6529_p10 = pnand %p4056_p7, %p216_p9  ;;  %p6533_p11 = scmp.eq.s32.totalorder %s4054_s13, 0 }
  0x19   : > { %7172 = sst [smem:[#allocation30_spill]] %s7171_s20  ;;  %s189_s24 = ssub.s32 %s187_s17, %s188_s21 }
  0x1a   : > { %p190_p12 = scmp.eq.s32.totalorder %s189_s24, 0  ;;  %p6051_p13 = pneg %p6529_p10 }
  0x1b   : > { %s7175_s2 = sld [smem:[#allocation32_spill]]  ;;  %s6407_s13 = smov [#allocation9]  }
  0x1c   : > { %s6543_s11 = scalar_select %p190_p12, %s6385_s29, %s192_s18  }
  0x1d   : > { %p6547_p0 = pnand %p6533_p11, %p6051_p13  ;;  %s243_s15 = sshll.u32 %s6407_s13, 4  ;;  %s244_s15 = int_to_ptr.vmem [resolvable:$true] %s243_s15 }
  0x1e   : > { %7176 = sst [smem:[#allocation31_spill]] %s6543_s11  ;;  %s6408_s17 = smov 64  }
  0x1f   : > { %s6409_s21 = smov 4   ;;  %s227_s18 = sshll.u32 %s7148_s1, 4  ;;  %s228_s18 = int_to_ptr.hbm [resolvable:$true] %s227_s18 }
  0x20   : > { %s6410_s26 = smov [#allocation6]   ;;  %s258_s29 = sshll.u32 %s7151_s4, 4  ;;  %s259_s29 = int_to_ptr.hbm [resolvable:$true] %s258_s29 }
  0x21   : > { %s241_s14 = sshll.u32 %s7175_s2, 4  ;;  %s229_s2 = sshll.u32 %s6410_s26, 4  ;;  %s242_s14 = int_to_ptr.hbm [resolvable:$true] %s241_s14  ;;  %s230_s2 = int_to_ptr.vmem [resolvable:$true] %s229_s2 }
  0x22   : > { %6057 = dma.hbm_to_vmem [thread:$0]  (!%p6547_p0), %s242_s14, 1024, %s244_s15, [#allocation10], %s6408_s17, %s6408_s17, %s6409_s21  }
  0x23   : > { %6054 = dma.hbm_to_vmem [thread:$0]  (!%p6547_p0), %s228_s18, 4096, %s230_s2, [#allocation7], %s6408_s17, %s6408_s17, %s6409_s21  }
  0x24   : > { %s6411_s13 = smov [#allocation11]   ;;  %s275_s14 = sshll.u32 %s7153_s6, 4  ;;  %s276_s14 = int_to_ptr.hbm [resolvable:$true] %s275_s14 }
  0x25   : > { %s260_s20 = sshll.u32 %s6411_s13, 4  ;;  %s6412_s24 = smov [#allocation12]   ;;  %s261_s20 = int_to_ptr.vmem [resolvable:$true] %s260_s20 }
  0x26   : > { %6060 = dma.hbm_to_vmem [thread:$0]  (!%p6547_p0), %s259_s29, 1024, %s261_s20, [#allocation10], %s6408_s17, %s6408_s17, %s6409_s21  }
  0x27   : > { %s277_s25 = sshll.u32 %s6412_s24, 4  ;;  %296 = sbr.rel (%p6529_p10) target bundleno = 1722 (0x6ba), region = 48  ;;  %s278_s25 = int_to_ptr.vmem [resolvable:$true] %s277_s25 }
  0x28   : > { %6063 = dma.hbm_to_vmem [thread:$0]  (!%p6547_p0), %s276_s14, 1024, %s278_s25, [#allocation13], %s6408_s17, %s6408_s17, %s6409_s21  }
  0x2c   : > { %6358 = dma.done.wait (%p6533_p11), [#allocation7], 4096  }
  0x2d   : > { %6360 = vsyncadd (%p6533_p11), [#allocation7], 4294963200 }
  0x2e   : > { %6362 = dma.done.wait (%p6533_p11), [#allocation10], 2048  }
  0x2f   : > { %6364 = vsyncadd (%p6533_p11), [#allocation10], 4294965248 }
  0x30   : > { %6366 = dma.done.wait (%p6533_p11), [#allocation13], 1024  }
  0x31   : > { %6368 = vsyncadd (%p6533_p11), [#allocation13], 4294966272  ;;  %s336_s2 = sand.u32 1, %s6381_s28   ;;  %p341_p1 = scmp.eq.s32.totalorder %s6393_s9, 0 }
  0x32   : > { %s4066_s27 = sshll.u32 %s336_s2, 8  ;;  %p342_p2 = scmp.eq.s32.totalorder %s6389_s30, 0 }
  0x33   : > { %s6589_s29 = scalar_lea.vmem [#allocation14], %s4066_s27 }
  0x34   : > { %p343_p3 = pnand %p342_p2, %p341_p1 }
  0x35   : > { %s354_s16 = sshll.u32 (!%p343_p3), %s7147_s0, 4  ;;  %s6413_s20 = smov (!%p343_p3), [#allocation2]   ;;  %s355_s16 = int_to_ptr.hbm [resolvable:$true] %s354_s16 }
  0x36   : > { %346 = sbr.rel (%p343_p3) target bundleno = 350 (0x15e), region = 68  ;;  %s356_s22 = sshll.u32 (!%p343_p3), %s6413_s20, 4  ;;  %s357_s22 = int_to_ptr.vmem [resolvable:$true] %s356_s22 }
  0x37   : > { %359 = dma.hbm_to_vmem [thread:$0]  (!%p343_p3), %s355_s16, 16384, %s357_s22, [#allocation5] }
  0x3b   : > { %v5240_v0 = vld [vmem:[#allocation9 + $0x38] sm:$0xff]  ;;  %v5239_v1 = vld [vmem:[#allocation9 + $0x30] sm:$0xff]  ;;  %v5238_v2 = vld [vmem:[#allocation9 + $0x28] sm:$0xff] }
  0x3c   : > { %680 = vmatpush.bf16.msra.mxu0 %v5240_v0  ;;  %5961 = vmatpush.bf16.msra.mxu1 %v5240_v0  ;;  %v5237_v3 = vld [vmem:[#allocation9 + $0x20] sm:$0xff]  ;;  %v5236_v4 = vld [vmem:[#allocation9 + $0x18] sm:$0xff]  ;;  %v5235_v5 = vld [vmem:[#allocation9 + $0x10] sm:$0xff] }
  0x3d   : > { %5962 = vmatpush.bf16.msra.mxu2 %v5240_v0  ;;  %5963 = vmatpush.bf16.msra.mxu3 %v5240_v0  ;;  %v5234_v6 = vld [vmem:[#allocation9 + $0x8] sm:$0xff]  ;;  %v5233_v7 = vld [vmem:[#allocation9] sm:$0xff]  ;;  %v5203_v16 = vld [vmem:[#allocation6 + $0x10] sm:$0xff] }
  0x3e   : > { %v5201_v8 = vld [vmem:[#allocation6] sm:$0xff]  ;;  %v5202_v12 = vld [vmem:[#allocation6 + $0x8] sm:$0xff]  ;;  %v5211_v17 = vld [vmem:[#allocation6 + $0x50] sm:$0xff] }
  0x3f   : > { %v5209_v9 = vld [vmem:[#allocation6 + $0x40] sm:$0xff]  ;;  %v5210_v13 = vld [vmem:[#allocation6 + $0x48] sm:$0xff]  ;;  %v5219_v18 = vld [vmem:[#allocation6 + $0x90] sm:$0xff] }
  0x40   : > { %681 = vmatpush.bf16.msra.mxu0 %v5239_v1  ;;  %5964 = vmatpush.bf16.msra.mxu1 %v5239_v1  ;;  %v5217_v10 = vld [vmem:[#allocation6 + $0x80] sm:$0xff]  ;;  %v5218_v14 = vld [vmem:[#allocation6 + $0x88] sm:$0xff]  ;;  %v5227_v19 = vld [vmem:[#allocation6 + $0xd0] sm:$0xff] }
  0x41   : > { %5965 = vmatpush.bf16.msra.mxu2 %v5239_v1  ;;  %5966 = vmatpush.bf16.msra.mxu3 %v5239_v1  ;;  %v5225_v11 = vld [vmem:[#allocation6 + $0xc0] sm:$0xff]  ;;  %v5226_v15 = vld [vmem:[#allocation6 + $0xc8] sm:$0xff]  ;;  %v5204_v20 = vld [vmem:[#allocation6 + $0x18] sm:$0xff] }
  0x42   : > { %v5212_v21 = vld [vmem:[#allocation6 + $0x58] sm:$0xff]  ;;  %v5205_v24 = vld [vmem:[#allocation6 + $0x20] sm:$0xff]  ;;  %v5206_v28 = vld [vmem:[#allocation6 + $0x28] sm:$0xff] }
  0x43   : > { %v5220_v22 = vld [vmem:[#allocation6 + $0x98] sm:$0xff]  ;;  %v5213_v25 = vld [vmem:[#allocation6 + $0x60] sm:$0xff]  ;;  %v5214_v29 = vld [vmem:[#allocation6 + $0x68] sm:$0xff] }
  0x44   : > { %682 = vmatpush.bf16.msra.mxu0 %v5238_v2  ;;  %5967 = vmatpush.bf16.msra.mxu1 %v5238_v2  ;;  %v5228_v23 = vld [vmem:[#allocation6 + $0xd8] sm:$0xff]  ;;  %v5221_v26 = vld [vmem:[#allocation6 + $0xa0] sm:$0xff]  ;;  %v5222_v30 = vld [vmem:[#allocation6 + $0xa8] sm:$0xff] }
  0x45   : > { %5968 = vmatpush.bf16.msra.mxu2 %v5238_v2  ;;  %5969 = vmatpush.bf16.msra.mxu3 %v5238_v2  ;;  %v5229_v27 = vld [vmem:[#allocation6 + $0xe0] sm:$0xff]  ;;  %v5230_v31 = vld [vmem:[#allocation6 + $0xe8] sm:$0xff]  ;;  %v5207_v32 = vld [vmem:[#allocation6 + $0x30] sm:$0xff] }
  0x46   : > { %v5215_v33 = vld [vmem:[#allocation6 + $0x70] sm:$0xff]  ;;  %v5208_v36 = vld [vmem:[#allocation6 + $0x38] sm:$0xff] }
  0x47   : > { %v5223_v34 = vld [vmem:[#allocation6 + $0xb0] sm:$0xff]  ;;  %v5216_v37 = vld [vmem:[#allocation6 + $0x78] sm:$0xff] }
  0x48   : > { %683 = vmatpush.bf16.msra.mxu0 %v5237_v3  ;;  %5970 = vmatpush.bf16.msra.mxu1 %v5237_v3  ;;  %v5231_v35 = vld [vmem:[#allocation6 + $0xf0] sm:$0xff]  ;;  %v5224_v38 = vld [vmem:[#allocation6 + $0xb8] sm:$0xff] }
  0x49   : > { %5971 = vmatpush.bf16.msra.mxu2 %v5237_v3  ;;  %5972 = vmatpush.bf16.msra.mxu3 %v5237_v3  ;;  %v5232_v39 = vld [vmem:[#allocation6 + $0xf8] sm:$0xff] }
  0x4c   : > { %684 = vmatpush.bf16.msra.mxu0 %v5236_v4  ;;  %5973 = vmatpush.bf16.msra.mxu1 %v5236_v4 }
  0x4d   : > { %5974 = vmatpush.bf16.msra.mxu2 %v5236_v4  ;;  %5975 = vmatpush.bf16.msra.mxu3 %v5236_v4 }
  0x50   : > { %685 = vmatpush.bf16.msra.mxu0 %v5235_v5  ;;  %5976 = vmatpush.bf16.msra.mxu1 %v5235_v5 }
  0x51   : > { %5977 = vmatpush.bf16.msra.mxu2 %v5235_v5  ;;  %5978 = vmatpush.bf16.msra.mxu3 %v5235_v5 }
  0x54   : > { %686 = vmatpush.bf16.msra.mxu0 %v5234_v6  ;;  %5979 = vmatpush.bf16.msra.mxu1 %v5234_v6 }
  0x55   : > { %5980 = vmatpush.bf16.msra.mxu2 %v5234_v6  ;;  %5981 = vmatpush.bf16.msra.mxu3 %v5234_v6 }
  0x58   : > { %687 = vmatpush.bf16.msra.mxu0 %v5233_v7  ;;  %5982 = vmatpush.bf16.msra.mxu1 %v5233_v7 }
  0x59   : > { %5983 = vmatpush.bf16.msra.mxu2 %v5233_v7  ;;  %5984 = vmatpush.bf16.msra.mxu3 %v5233_v7 }
  0x5b   : > { %688 = vmatmul.bf16.vlgmr.msra.gmra.mxu0 %v5201_v8  ;;  %728 = vmatmul.bf16.vlgmr.msra.gmra.mxu1 %v5209_v9 }
  0x5c   : > { %768 = vmatmul.bf16.vlgmr.msra.gmra.mxu2 %v5217_v10  ;;  %808 = vmatmul.bf16.vlgmr.msra.gmra.mxu3 %v5225_v11 }
  0x6b   : > { %693 = vmatmul.bf16.gmra.mxu0 %v5202_v12  ;;  %733 = vmatmul.bf16.gmra.mxu1 %v5210_v13 }
  0x6c   : > { %773 = vmatmul.bf16.gmra.mxu2 %v5218_v14  ;;  %813 = vmatmul.bf16.gmra.mxu3 %v5226_v15 }
  0x7b   : > { %698 = vmatmul.bf16.gmra.mxu0 %v5203_v16  ;;  %738 = vmatmul.bf16.gmra.mxu1 %v5211_v17 }
  0x7c   : > { %778 = vmatmul.bf16.gmra.mxu2 %v5219_v18  ;;  %818 = vmatmul.bf16.gmra.mxu3 %v5227_v19 }
  0x8b   : > { %703 = vmatmul.bf16.gmra.mxu0 %v5204_v20  ;;  %743 = vmatmul.bf16.gmra.mxu1 %v5212_v21 }
  0x8c   : > { %783 = vmatmul.bf16.gmra.mxu2 %v5220_v22  ;;  %823 = vmatmul.bf16.gmra.mxu3 %v5228_v23 }
  0x9b   : > { %708 = vmatmul.bf16.gmra.mxu0 %v5205_v24  ;;  %748 = vmatmul.bf16.gmra.mxu1 %v5213_v25 }
  0x9c   : > { %788 = vmatmul.bf16.gmra.mxu2 %v5221_v26  ;;  %828 = vmatmul.bf16.gmra.mxu3 %v5229_v27 }
  0xab   : > { %713 = vmatmul.bf16.gmra.mxu0 %v5206_v28  ;;  %753 = vmatmul.bf16.gmra.mxu1 %v5214_v29 }
  0xac   : > { %793 = vmatmul.bf16.gmra.mxu2 %v5222_v30  ;;  %833 = vmatmul.bf16.gmra.mxu3 %v5230_v31 }
  0xbb   : > { %718 = vmatmul.bf16.gmra.mxu0 %v5207_v32  ;;  %758 = vmatmul.bf16.gmra.mxu1 %v5215_v33 }
  0xbc   : > { %798 = vmatmul.bf16.gmra.mxu2 %v5223_v34  ;;  %838 = vmatmul.bf16.gmra.mxu3 %v5231_v35 }
  0xcb   : > { %723 = vmatmul.bf16.gmra.mxu0 %v5208_v36  ;;  %763 = vmatmul.bf16.gmra.mxu1 %v5216_v37 }
  0xcc   : > { %803 = vmatmul.bf16.gmra.mxu2 %v5224_v38  ;;  %843 = vmatmul.bf16.gmra.mxu3 %v5232_v39 }
  0xd8   : > { %v689_v40 = vpop.f32.mrf.mxu0  ;;  %v729_v41 = vpop.f32.mrf.mxu1 }
  0xdf   : > { %v769_v42 = vpop.f32.mrf.mxu2  ;;  %v809_v43 = vpop.f32.mrf.mxu3 }
  0xe0   : > { %v691_v44 = vpop.f32.mrf.mxu0  ;;  %v731_v45 = vpop.f32.mrf.mxu1 }
  0xe1   : > { %v5487_v46 = vpack.c.bf16 %v691_v44, %v689_v40  ;;  %v5527_v47 = vpack.c.bf16 %v731_v45, %v729_v41 }
  0xe3   : > { %5488 = vst [vmem:[#allocation3 + $0xb0] sm:$0xff] %v5487_v46  }
  0xe4   : > { %5891 = vst [vmem:[#allocation3 + $0x80] sm:$0xff] %v5527_v47  }
  0xe7   : > { %v771_v48 = vpop.f32.mrf.mxu2  ;;  %v811_v49 = vpop.f32.mrf.mxu3 }
  0xe8   : > { %v5567_v50 = vpack.c.bf16 %v771_v48, %v769_v42  ;;  %v5607_v51 = vpack.c.bf16 %v811_v49, %v809_v43  ;;  %v694_v52 = vpop.f32.mrf.mxu0  ;;  %v734_v53 = vpop.f32.mrf.mxu1 }
  0xea   : > { %5899 = vst [vmem:[#allocation3 + $0x38] sm:$0xff] %v5567_v50  }
  0xeb   : > { %5907 = vst [vmem:[#allocation3 + $0xa8] sm:$0xff] %v5607_v51  }
  0xef   : > { %v774_v54 = vpop.f32.mrf.mxu2  ;;  %v814_v55 = vpop.f32.mrf.mxu3 }
  0xf0   : > { %v696_v56 = vpop.f32.mrf.mxu0  ;;  %v736_v57 = vpop.f32.mrf.mxu1 }
  0xf1   : > { %v5492_v58 = vpack.c.bf16 %v696_v56, %v694_v52  ;;  %v5532_v59 = vpack.c.bf16 %v736_v57, %v734_v53 }
  0xf3   : > { %5884 = vst [vmem:[#allocation3] sm:$0xff] %v5492_v58  }
  0xf4   : > { %5892 = vst [vmem:[#allocation3 + $0x88] sm:$0xff] %v5532_v59  }
  0xf7   : > { %v776_v60 = vpop.f32.mrf.mxu2  ;;  %v816_v61 = vpop.f32.mrf.mxu3 }
  0xf8   : > { %v5572_v62 = vpack.c.bf16 %v776_v60, %v774_v54  ;;  %v5612_v63 = vpack.c.bf16 %v816_v61, %v814_v55  ;;  %v699_v0 = vpop.f32.mrf.mxu0  ;;  %v739_v1 = vpop.f32.mrf.mxu1 }
  0xfa   : > { %5900 = vst [vmem:[#allocation3 + $0x58] sm:$0xff] %v5572_v62  }
  0xfb   : > { %5908 = vst [vmem:[#allocation3 + $0xd0] sm:$0xff] %v5612_v63  }
  0xff   : > { %v779_v2 = vpop.f32.mrf.mxu2  ;;  %v819_v3 = vpop.f32.mrf.mxu3 }
 0x100   : > { %v701_v4 = vpop.f32.mrf.mxu0  ;;  %v741_v5 = vpop.f32.mrf.mxu1 }
 0x101   : > { %v5497_v6 = vpack.c.bf16 %v701_v4, %v699_v0  ;;  %v5537_v7 = vpack.c.bf16 %v741_v5, %v739_v1 }
 0x103   : > { %5885 = vst [vmem:[#allocation3 + $0xd8] sm:$0xff] %v5497_v6  }
 0x104   : > { %5893 = vst [vmem:[#allocation3 + $0xe8] sm:$0xff] %v5537_v7  }
 0x107   : > { %v781_v8 = vpop.f32.mrf.mxu2  ;;  %v821_v9 = vpop.f32.mrf.mxu3 }
 0x108   : > { %v5577_v10 = vpack.c.bf16 %v781_v8, %v779_v2  ;;  %v5617_v11 = vpack.c.bf16 %v821_v9, %v819_v3  ;;  %v704_v12 = vpop.f32.mrf.mxu0  ;;  %v744_v13 = vpop.f32.mrf.mxu1 }
 0x10a   : > { %5901 = vst [vmem:[#allocation3 + $0x40] sm:$0xff] %v5577_v10  }
 0x10b   : > { %5909 = vst [vmem:[#allocation3 + $0x10] sm:$0xff] %v5617_v11  }
 0x10f   : > { %v784_v14 = vpop.f32.mrf.mxu2  ;;  %v824_v15 = vpop.f32.mrf.mxu3 }
 0x110   : > { %v706_v16 = vpop.f32.mrf.mxu0  ;;  %v746_v17 = vpop.f32.mrf.mxu1 }
 0x111   : > { %v5502_v18 = vpack.c.bf16 %v706_v16, %v704_v12  ;;  %v5542_v19 = vpack.c.bf16 %v746_v17, %v744_v13 }
 0x113   : > { %5886 = vst [vmem:[#allocation3 + $0x18] sm:$0xff] %v5502_v18  }
 0x114   : > { %5894 = vst [vmem:[#allocation3 + $0xb8] sm:$0xff] %v5542_v19  }
 0x117   : > { %v786_v20 = vpop.f32.mrf.mxu2  ;;  %v826_v21 = vpop.f32.mrf.mxu3 }
 0x118   : > { %v5582_v22 = vpack.c.bf16 %v786_v20, %v784_v14  ;;  %v5622_v23 = vpack.c.bf16 %v826_v21, %v824_v15  ;;  %v709_v24 = vpop.f32.mrf.mxu0  ;;  %v749_v25 = vpop.f32.mrf.mxu1 }
 0x11a   : > { %5902 = vst [vmem:[#allocation3 + $0xc8] sm:$0xff] %v5582_v22  }
 0x11b   : > { %5910 = vst [vmem:[#allocation3 + $0x28] sm:$0xff] %v5622_v23  }
 0x11f   : > { %v789_v26 = vpop.f32.mrf.mxu2  ;;  %v829_v27 = vpop.f32.mrf.mxu3 }
 0x120   : > { %v711_v28 = vpop.f32.mrf.mxu0  ;;  %v751_v29 = vpop.f32.mrf.mxu1 }
 0x121   : > { %v5507_v30 = vpack.c.bf16 %v711_v28, %v709_v24  ;;  %v5547_v31 = vpack.c.bf16 %v751_v29, %v749_v25 }
 0x123   : > { %5887 = vst [vmem:[#allocation3 + $0x50] sm:$0xff] %v5507_v30  }
 0x124   : > { %5895 = vst [vmem:[#allocation3 + $0x60] sm:$0xff] %v5547_v31  }
 0x127   : > { %v791_v32 = vpop.f32.mrf.mxu2  ;;  %v831_v33 = vpop.f32.mrf.mxu3 }
 0x128   : > { %v5587_v34 = vpack.c.bf16 %v791_v32, %v789_v26  ;;  %v5627_v35 = vpack.c.bf16 %v831_v33, %v829_v27  ;;  %v714_v36 = vpop.f32.mrf.mxu0  ;;  %v754_v37 = vpop.f32.mrf.mxu1 }
 0x12a   : > { %5903 = vst [vmem:[#allocation3 + $0xe0] sm:$0xff] %v5587_v34  }
 0x12b   : > { %5911 = vst [vmem:[#allocation3 + $0xa0] sm:$0xff] %v5627_v35  }
 0x12f   : > { %v794_v38 = vpop.f32.mrf.mxu2  ;;  %v834_v39 = vpop.f32.mrf.mxu3 }
 0x130   : > { %v716_v40 = vpop.f32.mrf.mxu0  ;;  %v756_v41 = vpop.f32.mrf.mxu1 }
 0x131   : > { %v5512_v42 = vpack.c.bf16 %v716_v40, %v714_v36  ;;  %v5552_v43 = vpack.c.bf16 %v756_v41, %v754_v37 }
 0x133   : > { %5888 = vst [vmem:[#allocation3 + $0x68] sm:$0xff] %v5512_v42  }
 0x134   : > { %5896 = vst [vmem:[#allocation3 + $0xf0] sm:$0xff] %v5552_v43  }
 0x137   : > { %v796_v44 = vpop.f32.mrf.mxu2  ;;  %v836_v45 = vpop.f32.mrf.mxu3 }
 0x138   : > { %v5592_v46 = vpack.c.bf16 %v796_v44, %v794_v38  ;;  %v5632_v47 = vpack.c.bf16 %v836_v45, %v834_v39  ;;  %v719_v48 = vpop.f32.mrf.mxu0  ;;  %v759_v49 = vpop.f32.mrf.mxu1 }
 0x13a   : > { %5904 = vst [vmem:[#allocation3 + $0x90] sm:$0xff] %v5592_v46  }
 0x13b   : > { %5912 = vst [vmem:[#allocation3 + $0xf8] sm:$0xff] %v5632_v47  }
 0x13f   : > { %v799_v50 = vpop.f32.mrf.mxu2  ;;  %v839_v51 = vpop.f32.mrf.mxu3 }
 0x140   : > { %v721_v52 = vpop.f32.mrf.mxu0  ;;  %v761_v53 = vpop.f32.mrf.mxu1 }
 0x141   : > { %v5517_v54 = vpack.c.bf16 %v721_v52, %v719_v48  ;;  %v5557_v55 = vpack.c.bf16 %v761_v53, %v759_v49 }
 0x143   : > { %5889 = vst [vmem:[#allocation3 + $0x30] sm:$0xff] %v5517_v54  }
 0x144   : > { %5897 = vst [vmem:[#allocation3 + $0x8] sm:$0xff] %v5557_v55  }
 0x147   : > { %v801_v56 = vpop.f32.mrf.mxu2  ;;  %v841_v57 = vpop.f32.mrf.mxu3 }
 0x148   : > { %v5597_v58 = vpack.c.bf16 %v801_v56, %v799_v50  ;;  %v5637_v59 = vpack.c.bf16 %v841_v57, %v839_v51  ;;  %v724_v60 = vpop.f32.mrf.mxu0  ;;  %v764_v61 = vpop.f32.mrf.mxu1 }
 0x14a   : > { %5905 = vst [vmem:[#allocation3 + $0x70] sm:$0xff] %v5597_v58  }
 0x14b   : > { %5913 = vst [vmem:[#allocation3 + $0x20] sm:$0xff] %v5637_v59  }
 0x14f   : > { %v804_v62 = vpop.f32.mrf.mxu2  ;;  %v844_v63 = vpop.f32.mrf.mxu3 }
 0x150   : > { %v726_v0 = vpop.f32.mrf.mxu0  ;;  %v766_v1 = vpop.f32.mrf.mxu1 }
 0x151   : > { %v5522_v2 = vpack.c.bf16 %v726_v0, %v724_v60  ;;  %v5562_v3 = vpack.c.bf16 %v766_v1, %v764_v61 }
 0x153   : > { %5890 = vst [vmem:[#allocation3 + $0x48] sm:$0xff] %v5522_v2  }
 0x154   : > { %5898 = vst [vmem:[#allocation3 + $0x78] sm:$0xff] %v5562_v3  }
 0x157   : > { %v806_v4 = vpop.f32.mrf.mxu2  ;;  %v846_v5 = vpop.f32.mrf.mxu3 }
 0x158   : > { %v5602_v6 = vpack.c.bf16 %v806_v4, %v804_v62  ;;  %v5642_v7 = vpack.c.bf16 %v846_v5, %v844_v63 }
 0x15a   : > { %5906 = vst [vmem:[#allocation3 + $0xc0] sm:$0xff] %v5602_v6  }
 0x15b   : > { %5914 = vst [vmem:[#allocation3 + $0x98] sm:$0xff] %v5642_v7  }
 0x15c   : > { %6369 = dma.done.wait [#allocation5], 16384 }
 0x15d   : > { %6370 = vsyncadd [#allocation5], 4294950912 }
 0x15e PF: > { %s4227_s23 = sshll.u32 %s6389_s30, 8  ;;  %p4228_p4 = scmp.ne.s32.totalorder %s6393_s9, 0 }
 0x15f   : > { %s6598_s17 = sshra.s32 (!%p4228_p4), %s4227_s23, 3 }
 0x160   : > { %984 = sbr.rel (%p4228_p4) target bundleno = 779 (0x30b), region = 76  ;;  %s5241_s21 = sshll.u32 (!%p4228_p4), %s6598_s17, 4 }
 0x161   : > { %s6601_s18 = scalar_lea.vmem (!%p4228_p4), [#allocation2], %s5241_s21  ;;  %s4615_s15 = sshll.u32 (!%p4228_p4), %s6598_s17, 2 }
 0x162   : > { %s6692_s14 = scalar_lea.vmem (!%p4228_p4), [#allocation4], %s4615_s15 }
 0x165   : > { %v5313_v8 = vld [vmem:[#allocation3 + $0x48] sm:$0xff]  ;;  %v5321_v9 = vld [vmem:[#allocation3 + $0x78] sm:$0xff]  ;;  %v5329_v10 = vld [vmem:[#allocation3 + $0xc0] sm:$0xff] }
 0x166   : > { %v5337_v11 = vld [vmem:[#allocation3 + $0x98] sm:$0xff]  ;;  %1634 = vmatpush.bf16.msra.mxu0 %v5313_v8  ;;  %1723 = vmatpush.bf16.msra.mxu1 %v5321_v9  ;;  %v5312_v12 = vld [vmem:[#allocation3 + $0x30] sm:$0xff]  ;;  %v5320_v13 = vld [vmem:[#allocation3 + $0x8] sm:$0xff] }
 0x167   : > { %1812 = vmatpush.bf16.msra.mxu2 %v5329_v10  ;;  %1901 = vmatpush.bf16.msra.mxu3 %v5337_v11  ;;  %v5328_v14 = vld [vmem:[#allocation3 + $0x70] sm:$0xff]  ;;  %v5336_v15 = vld [vmem:[#allocation3 + $0x20] sm:$0xff]  ;;  %v5311_v16 = vld [vmem:[#allocation3 + $0x68] sm:$0xff] }
 0x168   : > { %v5319_v17 = vld [vmem:[#allocation3 + $0xf0] sm:$0xff]  ;;  %v5335_v19 = vld [vmem:[#allocation3 + $0xf8] sm:$0xff]  ;;  %v5318_v21 = vld [vmem:[#allocation3 + $0x60] sm:$0xff] }
 0x169   : > { %v5327_v18 = vld [vmem:[#allocation3 + $0x90] sm:$0xff]  ;;  %v5326_v22 = vld [vmem:[#allocation3 + $0xe0] sm:$0xff]  ;;  %v5309_v24 = vld [vmem:[#allocation3 + $0x18] sm:$0xff] }
 0x16a   : > { %1635 = vmatpush.bf16.msra.mxu0 %v5312_v12  ;;  %1724 = vmatpush.bf16.msra.mxu1 %v5320_v13  ;;  %v5310_v20 = vld [vmem:[#allocation3 + $0x50] sm:$0xff]  ;;  %v5334_v23 = vld [vmem:[#allocation3 + $0xa0] sm:$0xff]  ;;  %v5317_v25 = vld [vmem:[#allocation3 + $0xb8] sm:$0xff] }
 0x16b   : > { %1813 = vmatpush.bf16.msra.mxu2 %v5328_v14  ;;  %1902 = vmatpush.bf16.msra.mxu3 %v5336_v15  ;;  %v5325_v26 = vld [vmem:[#allocation3 + $0xc8] sm:$0xff]  ;;  %v5308_v28 = vld [vmem:[#allocation3 + $0xd8] sm:$0xff]  ;;  %v5324_v30 = vld [vmem:[#allocation3 + $0x40] sm:$0xff] }
 0x16c   : > { %v5333_v27 = vld [vmem:[#allocation3 + $0x28] sm:$0xff]  ;;  %v5332_v31 = vld [vmem:[#allocation3 + $0x10] sm:$0xff]  ;;  %v5307_v32 = vld [vmem:[#allocation3] sm:$0xff] }
 0x16d   : > { %v5316_v29 = vld [vmem:[#allocation3 + $0xe8] sm:$0xff]  ;;  %v5323_v34 = vld [vmem:[#allocation3 + $0x58] sm:$0xff]  ;;  %v5331_v35 = vld [vmem:[#allocation3 + $0xd0] sm:$0xff] }
 0x16e   : > { %1636 = vmatpush.bf16.msra.mxu0 %v5311_v16  ;;  %1725 = vmatpush.bf16.msra.mxu1 %v5319_v17  ;;  %v5315_v33 = vld [vmem:[#allocation3 + $0x88] sm:$0xff]  ;;  %v5306_v36 = vld [vmem:[#allocation3 + $0xb0] sm:$0xff]  ;;  %v5314_v37 = vld [vmem:[#allocation3 + $0x80] sm:$0xff] }
 0x16f   : > { %1814 = vmatpush.bf16.msra.mxu2 %v5327_v18  ;;  %1903 = vmatpush.bf16.msra.mxu3 %v5335_v19  ;;  %v5322_v38 = vld [vmem:[#allocation3 + $0x38] sm:$0xff]  ;;  %v5330_v39 = vld [vmem:[#allocation3 + $0xa8] sm:$0xff]  ;;  %v4233_v40 = vld [vmem:[%s6601_s18] sm:$0xf] }
 0x170   : > { %v5244_v41 = vld [vmem:[%s6601_s18 + $0xc] sm:$0xf0]  ;;  %v5242_v42 = vld [vmem:[%s6601_s18 + $0x4] sm:$0xf]  ;;  %v4235_v43 = vld [vmem:[%s6601_s18 + $0x10] sm:$0xf0] }
 0x171   : > { %v4241_v44 = vld [vmem:[%s6601_s18 + $0x8] sm:$0xf]  ;;  %v5245_v45 = vld [vmem:[%s6601_s18 + $0x14] sm:$0xf0]  ;;  %v5243_v46 = vld [vmem:[%s6601_s18 + $0xc] sm:$0xf]  ;;  %v4234_v48 = vor.u32 %v5244_v41, %v4233_v40  ;;  %v4238_v49 = vor.u32 %v5242_v42, %v4235_v43 }
 0x172   : > { %1637 = vmatpush.bf16.msra.mxu0 %v5310_v20  ;;  %1726 = vmatpush.bf16.msra.mxu1 %v5318_v21  ;;  %v4243_v47 = vld [vmem:[%s6601_s18 + $0x18] sm:$0xf0]  ;;  %v4242_v50 = vor.u32 %v5245_v45, %v4241_v44  ;;  %v4249_v52 = vld [vmem:[%s6601_s18 + $0x20] sm:$0xf]  ;;  %v5248_v53 = vld [vmem:[%s6601_s18 + $0x2c] sm:$0xf0] }
 0x173   : > { %1815 = vmatpush.bf16.msra.mxu2 %v5326_v22  ;;  %1904 = vmatpush.bf16.msra.mxu3 %v5334_v23  ;;  %v4246_v51 = vor.u32 %v5243_v46, %v4243_v47  ;;  %v5246_v54 = vld [vmem:[%s6601_s18 + $0x24] sm:$0xf]  ;;  %v4251_v55 = vld [vmem:[%s6601_s18 + $0x30] sm:$0xf0]  ;;  %v4257_v56 = vld [vmem:[%s6601_s18 + $0x28] sm:$0xf]  ;;  %v4250_v60 = vor.u32 %v5248_v53, %v4249_v52 }
 0x174   : > { %v5249_v57 = vld [vmem:[%s6601_s18 + $0x34] sm:$0xf0]  ;;  %v5247_v58 = vld [vmem:[%s6601_s18 + $0x2c] sm:$0xf]  ;;  %v4259_v59 = vld [vmem:[%s6601_s18 + $0x38] sm:$0xf0]  ;;  %v4254_v61 = vor.u32 %v5246_v54, %v4251_v55 }
 0x175   : > { %v4258_v62 = vor.u32 %v5249_v57, %v4257_v56  ;;  %v4262_v63 = vor.u32 %v5247_v58, %v4259_v59  ;;  %v4265_v0 = vld [vmem:[%s6601_s18 + $0x40] sm:$0xf]  ;;  %v5252_v1 = vld [vmem:[%s6601_s18 + $0x4c] sm:$0xf0]  ;;  %v5250_v2 = vld [vmem:[%s6601_s18 + $0x44] sm:$0xf] }
 0x176   : > { %1638 = vmatpush.bf16.msra.mxu0 %v5309_v24  ;;  %1727 = vmatpush.bf16.msra.mxu1 %v5317_v25  ;;  %v4267_v3 = vld [vmem:[%s6601_s18 + $0x50] sm:$0xf0]  ;;  %v4273_v4 = vld [vmem:[%s6601_s18 + $0x48] sm:$0xf]  ;;  %v5253_v5 = vld [vmem:[%s6601_s18 + $0x54] sm:$0xf0]  ;;  %v4266_v8 = vor.u32 %v5252_v1, %v4265_v0 }
 0x177   : > { %1816 = vmatpush.bf16.msra.mxu2 %v5325_v26  ;;  %1905 = vmatpush.bf16.msra.mxu3 %v5333_v27  ;;  %v5251_v6 = vld [vmem:[%s6601_s18 + $0x4c] sm:$0xf]  ;;  %v4275_v7 = vld [vmem:[%s6601_s18 + $0x58] sm:$0xf0]  ;;  %v4270_v9 = vor.u32 %v5250_v2, %v4267_v3  ;;  %v4274_v10 = vor.u32 %v5253_v5, %v4273_v4  ;;  %v4281_v12 = vld [vmem:[%s6601_s18 + $0x60] sm:$0xf] }
 0x178   : > { %v4278_v11 = vor.u32 %v5251_v6, %v4275_v7  ;;  %v5256_v13 = vld [vmem:[%s6601_s18 + $0x6c] sm:$0xf0]  ;;  %v5254_v14 = vld [vmem:[%s6601_s18 + $0x64] sm:$0xf]  ;;  %v4283_v15 = vld [vmem:[%s6601_s18 + $0x70] sm:$0xf0] }
 0x179   : > { %v4289_v16 = vld [vmem:[%s6601_s18 + $0x68] sm:$0xf]  ;;  %v5257_v17 = vld [vmem:[%s6601_s18 + $0x74] sm:$0xf0]  ;;  %v5255_v18 = vld [vmem:[%s6601_s18 + $0x6c] sm:$0xf]  ;;  %v4282_v20 = vor.u32 %v5256_v13, %v4281_v12  ;;  %v4286_v21 = vor.u32 %v5254_v14, %v4283_v15 }
 0x17a   : > { %1639 = vmatpush.bf16.msra.mxu0 %v5308_v28  ;;  %1728 = vmatpush.bf16.msra.mxu1 %v5316_v29  ;;  %v4291_v19 = vld [vmem:[%s6601_s18 + $0x78] sm:$0xf0]  ;;  %v4290_v22 = vor.u32 %v5257_v17, %v4289_v16  ;;  %v4297_v24 = vld [vmem:[%s6601_s18 + $0x80] sm:$0xf]  ;;  %v5260_v25 = vld [vmem:[%s6601_s18 + $0x8c] sm:$0xf0] }
 0x17b   : > { %1817 = vmatpush.bf16.msra.mxu2 %v5324_v30  ;;  %1906 = vmatpush.bf16.msra.mxu3 %v5332_v31  ;;  %v4294_v23 = vor.u32 %v5255_v18, %v4291_v19  ;;  %v5258_v26 = vld [vmem:[%s6601_s18 + $0x84] sm:$0xf]  ;;  %v4299_v27 = vld [vmem:[%s6601_s18 + $0x90] sm:$0xf0]  ;;  %v4305_v28 = vld [vmem:[%s6601_s18 + $0x88] sm:$0xf] }
 0x17c   : > { %v5261_v29 = vld [vmem:[%s6601_s18 + $0x94] sm:$0xf0]  ;;  %v5259_v30 = vld [vmem:[%s6601_s18 + $0x8c] sm:$0xf]  ;;  %v4307_v31 = vld [vmem:[%s6601_s18 + $0x98] sm:$0xf0] }
 0x17d   : > { %v4321_v40 = vld [vmem:[%s6601_s18 + $0xa8] sm:$0xf]  ;;  %v5265_v41 = vld [vmem:[%s6601_s18 + $0xb4] sm:$0xf0]  ;;  %v5263_v42 = vld [vmem:[%s6601_s18 + $0xac] sm:$0xf] }
 0x17e   : > { %1640 = vmatpush.bf16.msra.mxu0 %v5307_v32  ;;  %1729 = vmatpush.bf16.msra.mxu1 %v5315_v33  ;;  %v4298_v32 = vor.u32 %v5260_v25, %v4297_v24  ;;  %v4302_v33 = vor.u32 %v5258_v26, %v4299_v27  ;;  %v4323_v43 = vld [vmem:[%s6601_s18 + $0xb8] sm:$0xf0]  ;;  %v4322_v46 = vor.u32 %v5265_v41, %v4321_v40  ;;  %v4337_v52 = vld [vmem:[%s6601_s18 + $0xc8] sm:$0xf]  ;;  %v5269_v53 = vld [vmem:[%s6601_s18 + $0xd4] sm:$0xf0] }
 0x17f   : > { %1818 = vmatpush.bf16.msra.mxu2 %v5323_v34  ;;  %1907 = vmatpush.bf16.msra.mxu3 %v5331_v35  ;;  %v4306_v34 = vor.u32 %v5261_v29, %v4305_v28  ;;  %v4310_v35 = vor.u32 %v5259_v30, %v4307_v31  ;;  %v4326_v47 = vor.u32 %v5263_v42, %v4323_v43  ;;  %v5267_v54 = vld [vmem:[%s6601_s18 + $0xcc] sm:$0xf]  ;;  %v4339_v55 = vld [vmem:[%s6601_s18 + $0xd8] sm:$0xf0]  ;;  %v4353_v0 = vld [vmem:[%s6601_s18 + $0xe8] sm:$0xf] }
 0x180   : > { %v4338_v58 = vor.u32 %v5269_v53, %v4337_v52  ;;  %v4342_v59 = vor.u32 %v5267_v54, %v4339_v55  ;;  %v5273_v1 = vld [vmem:[%s6601_s18 + $0xf4] sm:$0xf0]  ;;  %v5271_v2 = vld [vmem:[%s6601_s18 + $0xec] sm:$0xf]  ;;  %v4355_v3 = vld [vmem:[%s6601_s18 + $0xf8] sm:$0xf0] }
 0x181   : > { %v4354_v6 = vor.u32 %v5273_v1, %v4353_v0  ;;  %v4358_v7 = vor.u32 %v5271_v2, %v4355_v3  ;;  %v4369_v12 = vld [vmem:[%s6601_s18 + $0x108] sm:$0xf]  ;;  %v5277_v13 = vld [vmem:[%s6601_s18 + $0x114] sm:$0xf0]  ;;  %v5275_v14 = vld [vmem:[%s6601_s18 + $0x10c] sm:$0xf] }
 0x182   : > { %1641 = vmatpush.bf16.msra.mxu0 %v5306_v36  ;;  %1730 = vmatpush.bf16.msra.mxu1 %v5314_v37  ;;  %v4313_v36 = vld [vmem:[%s6601_s18 + $0xa0] sm:$0xf]  ;;  %v5264_v37 = vld [vmem:[%s6601_s18 + $0xac] sm:$0xf0]  ;;  %v4371_v15 = vld [vmem:[%s6601_s18 + $0x118] sm:$0xf0] }
 0x183   : > { %1819 = vmatpush.bf16.msra.mxu2 %v5322_v38  ;;  %1908 = vmatpush.bf16.msra.mxu3 %v5330_v39  ;;  %v5262_v38 = vld [vmem:[%s6601_s18 + $0xa4] sm:$0xf]  ;;  %v4315_v39 = vld [vmem:[%s6601_s18 + $0xb0] sm:$0xf0]  ;;  %v4314_v44 = vor.u32 %v5264_v37, %v4313_v36  ;;  %v6678_v18 = vld [vmem:[%s7150_s3] ss:$0 sm:$0xff] }
 0x184   : > { %v4318_v45 = vor.u32 %v5262_v38, %v4315_v39  ;;  %v4377_v30 = vld [vmem:[%s6601_s18 + $0x120] sm:$0xf]  ;;  %v5280_v31 = vld [vmem:[%s6601_s18 + $0x12c] sm:$0xf0]  ;;  %v5281_v36 = vld [vmem:[%s6601_s18 + $0x134] sm:$0xf0] }
 0x185   : > { %1642 = vmatmul.bf16.vlgmr.msra.gmra.mxu0 %v4234_v48  ;;  %1731 = vmatmul.bf16.vlgmr.msra.gmra.mxu1 %v4238_v49  ;;  %v4329_v48 = vld [vmem:[%s6601_s18 + $0xc0] sm:$0xf]  ;;  %v5268_v49 = vld [vmem:[%s6601_s18 + $0xcc] sm:$0xf0]  ;;  %v5279_v37 = vld [vmem:[%s6601_s18 + $0x12c] sm:$0xf]  ;;  %v4378_v42 = vor.u32 %v5280_v31, %v4377_v30 }
 0x186   : > { %1820 = vmatmul.bf16.vlgmr.msra.gmra.mxu2 %v4242_v50  ;;  %1909 = vmatmul.bf16.vlgmr.msra.gmra.mxu3 %v4246_v51  ;;  %v5266_v50 = vld [vmem:[%s6601_s18 + $0xc4] sm:$0xf]  ;;  %v4331_v51 = vld [vmem:[%s6601_s18 + $0xd0] sm:$0xf0]  ;;  %v4330_v56 = vor.u32 %v5268_v49, %v4329_v48  ;;  %v4387_v38 = vld [vmem:[%s6601_s18 + $0x138] sm:$0xf0] }
 0x187   : > { %v4334_v57 = vor.u32 %v5266_v50, %v4331_v51  ;;  %v4390_v49 = vor.u32 %v5279_v37, %v4387_v38  ;;  %v5282_v0 = vld [vmem:[%s6601_s18 + $0x144] sm:$0xf]  ;;  %v4395_v1 = vld [vmem:[%s6601_s18 + $0x150] sm:$0xf0]  ;;  %v4401_v2 = vld [vmem:[%s6601_s18 + $0x148] sm:$0xf] }
 0x188   : > { %v5285_v3 = vld [vmem:[%s6601_s18 + $0x154] sm:$0xf0]  ;;  %v5288_v30 = vld [vmem:[%s6601_s18 + $0x16c] sm:$0xf0]  ;;  %v4419_v37 = vld [vmem:[%s6601_s18 + $0x178] sm:$0xf0] }
 0x195   : > { %1647 = vmatmul.bf16.gmra.mxu0 %v4250_v60  ;;  %1736 = vmatmul.bf16.gmra.mxu1 %v4254_v61  ;;  %v4345_v60 = vld [vmem:[%s6601_s18 + $0xe0] sm:$0xf]  ;;  %v5272_v61 = vld [vmem:[%s6601_s18 + $0xec] sm:$0xf0] }
 0x196   : > { %1825 = vmatmul.bf16.gmra.mxu2 %v4258_v62  ;;  %1914 = vmatmul.bf16.gmra.mxu3 %v4262_v63  ;;  %v5270_v62 = vld [vmem:[%s6601_s18 + $0xe4] sm:$0xf]  ;;  %v4347_v63 = vld [vmem:[%s6601_s18 + $0xf0] sm:$0xf0]  ;;  %v4346_v4 = vor.u32 %v5272_v61, %v4345_v60  ;;  %v4393_v61 = vld [vmem:[%s6601_s18 + $0x140] sm:$0xf] }
 0x197   : > { %v4350_v5 = vor.u32 %v5270_v62, %v4347_v63  ;;  %v5284_v62 = vld [vmem:[%s6601_s18 + $0x14c] sm:$0xf0] }
 0x1a5   : > { %1652 = vmatmul.bf16.gmra.mxu0 %v4266_v8  ;;  %1741 = vmatmul.bf16.gmra.mxu1 %v4270_v9  ;;  %v4361_v8 = vld [vmem:[%s6601_s18 + $0x100] sm:$0xf]  ;;  %v5276_v9 = vld [vmem:[%s6601_s18 + $0x10c] sm:$0xf0] }
 0x1a6   : > { %1830 = vmatmul.bf16.gmra.mxu2 %v4274_v10  ;;  %1919 = vmatmul.bf16.gmra.mxu3 %v4278_v11  ;;  %v5274_v10 = vld [vmem:[%s6601_s18 + $0x104] sm:$0xf]  ;;  %v4363_v11 = vld [vmem:[%s6601_s18 + $0x110] sm:$0xf0]  ;;  %v4362_v16 = vor.u32 %v5276_v9, %v4361_v8  ;;  %v4394_v9 = vor.u32 %v5284_v62, %v4393_v61  ;;  %v5292_v61 = vld [vmem:[%s6601_s18 + $0x18c] sm:$0xf0] }
 0x1a7   : > { %v4366_v17 = vor.u32 %v5274_v10, %v4363_v11  ;;  %v4398_v10 = vor.u32 %v5282_v0, %v4395_v1  ;;  %v4427_v0 = vld [vmem:[%s6601_s18 + $0x190] sm:$0xf0]  ;;  %v4433_v1 = vld [vmem:[%s6601_s18 + $0x188] sm:$0xf] }
 0x1b5   : > { %1657 = vmatmul.bf16.gmra.mxu0 %v4282_v20  ;;  %1746 = vmatmul.bf16.gmra.mxu1 %v4286_v21  ;;  %v4370_v21 = vor.u32 %v5277_v13, %v4369_v12 }
 0x1b6   : > { %1835 = vmatmul.bf16.gmra.mxu2 %v4290_v22  ;;  %1924 = vmatmul.bf16.gmra.mxu3 %v4294_v23  ;;  %v4374_v22 = vor.u32 %v5275_v14, %v4371_v15  ;;  %v4402_v15 = vor.u32 %v5285_v3, %v4401_v2  ;;  %v5293_v2 = vld [vmem:[%s6601_s18 + $0x194] sm:$0xf0]  ;;  %v5291_v3 = vld [vmem:[%s6601_s18 + $0x18c] sm:$0xf] }
 0x1c5   : > { %1662 = vmatmul.bf16.gmra.mxu0 %v4298_v32  ;;  %1751 = vmatmul.bf16.gmra.mxu1 %v4302_v33  ;;  %v5278_v33 = vld [vmem:[%s6601_s18 + $0x124] sm:$0xf] }
 0x1c6   : > { %1840 = vmatmul.bf16.gmra.mxu2 %v4306_v34  ;;  %1929 = vmatmul.bf16.gmra.mxu3 %v4310_v35  ;;  %v4379_v34 = vld [vmem:[%s6601_s18 + $0x130] sm:$0xf0]  ;;  %v4385_v35 = vld [vmem:[%s6601_s18 + $0x128] sm:$0xf] }
 0x1c7   : > { %v4382_v43 = vor.u32 %v5278_v33, %v4379_v34  ;;  %v4386_v48 = vor.u32 %v5281_v36, %v4385_v35  ;;  %v4411_v33 = vld [vmem:[%s6601_s18 + $0x170] sm:$0xf0]  ;;  %v4417_v34 = vld [vmem:[%s6601_s18 + $0x168] sm:$0xf]  ;;  %v5289_v35 = vld [vmem:[%s6601_s18 + $0x174] sm:$0xf0] }
 0x1c8   : > { %v5287_v36 = vld [vmem:[%s6601_s18 + $0x16c] sm:$0xf] }
 0x1d5   : > { %1667 = vmatmul.bf16.gmra.mxu0 %v4314_v44  ;;  %1756 = vmatmul.bf16.gmra.mxu1 %v4318_v45 }
 0x1d6   : > { %1845 = vmatmul.bf16.gmra.mxu2 %v4322_v46  ;;  %1934 = vmatmul.bf16.gmra.mxu3 %v4326_v47 }
 0x1e5   : > { %1672 = vmatmul.bf16.gmra.mxu0 %v4330_v56  ;;  %1761 = vmatmul.bf16.gmra.mxu1 %v4334_v57 }
 0x1e6   : > { %1850 = vmatmul.bf16.gmra.mxu2 %v4338_v58  ;;  %1939 = vmatmul.bf16.gmra.mxu3 %v4342_v59 }
 0x1f5   : > { %1677 = vmatmul.bf16.gmra.mxu0 %v4346_v4  ;;  %1766 = vmatmul.bf16.gmra.mxu1 %v4350_v5  ;;  %v5283_v4 = vld [vmem:[%s6601_s18 + $0x14c] sm:$0xf]  ;;  %v4403_v5 = vld [vmem:[%s6601_s18 + $0x158] sm:$0xf0] }
 0x1f6   : > { %1855 = vmatmul.bf16.gmra.mxu2 %v4354_v6  ;;  %1944 = vmatmul.bf16.gmra.mxu3 %v4358_v7 }
 0x202   : > { %v1643_v19 = vpop.f32.mrf.mxu0  ;;  %v1732_v20 = vpop.f32.mrf.mxu1 }
 0x203   : > { %v1644_v23 = vadd.f32 %v6678_v18, %v1643_v19 }
 0x205   : > { %1682 = vmatmul.bf16.gmra.mxu0 %v4362_v16  ;;  %1771 = vmatmul.bf16.gmra.mxu1 %v4366_v17  ;;  %v1733_v26 = vadd.f32 %v1732_v20, %v1644_v23  ;;  %v4406_v16 = vor.u32 %v5283_v4, %v4403_v5  ;;  %v4435_v4 = vld [vmem:[%s6601_s18 + $0x198] sm:$0xf0] }
 0x206   : > { %1860 = vmatmul.bf16.gmra.mxu2 %v4370_v21  ;;  %1949 = vmatmul.bf16.gmra.mxu3 %v4374_v22 }
 0x209   : > { %v1821_v24 = vpop.f32.mrf.mxu2  ;;  %v1910_v25 = vpop.f32.mrf.mxu3 }
 0x20a   : > { %v1645_v27 = vpop.f32.mrf.mxu0  ;;  %v1734_v28 = vpop.f32.mrf.mxu1  ;;  %v1822_v32 = vadd.f32 %v1821_v24, %v1733_v26 }
 0x20b   : > { %v1646_v29 = vadd.f32 %v6678_v18, %v1645_v27 }
 0x20c   : > { %v1911_v44 = vadd.f32 %v1910_v25, %v1822_v32  ;;  %v5286_v32 = vld [vmem:[%s6601_s18 + $0x164] sm:$0xf] }
 0x20d   : > { %v1735_v39 = vadd.f32 %v1734_v28, %v1646_v29  ;;  %v4409_v29 = vld [vmem:[%s6601_s18 + $0x160] sm:$0xf] }
 0x20e   : > { %v1990_v51 = vmax.f32 %v1911_v44, 0.0 }
 0x211   : > { %v1823_v40 = vpop.f32.mrf.mxu2  ;;  %v1912_v41 = vpop.f32.mrf.mxu3 }
 0x212   : > { %v1824_v45 = vadd.f32 %v1823_v40, %v1735_v39  ;;  %v1648_v46 = vpop.f32.mrf.mxu0  ;;  %v1737_v47 = vpop.f32.mrf.mxu1 }
 0x213   : > { %v1649_v53 = vadd.f32 %v6678_v18, %v1648_v46 }
 0x214   : > { %v1913_v50 = vadd.f32 %v1912_v41, %v1824_v45  ;;  %v4410_v41 = vor.u32 %v5288_v30, %v4409_v29  ;;  %v5296_v29 = vld [vmem:[%s6601_s18 + $0x1ac] sm:$0xf0] }
 0x215   : > { %1687 = vmatmul.bf16.gmra.mxu0 %v4378_v42  ;;  %1776 = vmatmul.bf16.gmra.mxu1 %v4382_v43  ;;  %v1738_v57 = vadd.f32 %v1737_v47, %v1649_v53  ;;  %v4414_v42 = vor.u32 %v5286_v32, %v4411_v33  ;;  %v4418_v47 = vor.u32 %v5289_v35, %v4417_v34  ;;  %v4443_v32 = vld [vmem:[%s6601_s18 + $0x1b0] sm:$0xf0]  ;;  %v4449_v33 = vld [vmem:[%s6601_s18 + $0x1a8] sm:$0xf]  ;;  %v5297_v34 = vld [vmem:[%s6601_s18 + $0x1b4] sm:$0xf0] }
 0x216   : > { %v1991_v52 = vmax.f32 %v1913_v50, 0.0  ;;  %1865 = vmatmul.bf16.gmra.mxu2 %v4386_v48  ;;  %1954 = vmatmul.bf16.gmra.mxu3 %v4390_v49  ;;  %v4422_v48 = vor.u32 %v5287_v36, %v4419_v37  ;;  %v5295_v35 = vld [vmem:[%s6601_s18 + $0x1ac] sm:$0xf]  ;;  %v4451_v36 = vld [vmem:[%s6601_s18 + $0x1b8] sm:$0xf0] }
 0x218   : > { %v5647_v54 = vpack.c.bf16 %v1991_v52, %v1990_v51 }
 0x219   : > { %v1826_v55 = vpop.f32.mrf.mxu2  ;;  %v1915_v56 = vpop.f32.mrf.mxu3 }
 0x21a   : > { %5648 = vst [vmem:[%s6692_s14] sm:$0xff] %v5647_v54   ;;  %v1650_v58 = vpop.f32.mrf.mxu0  ;;  %v1739_v59 = vpop.f32.mrf.mxu1  ;;  %v1827_v63 = vadd.f32 %v1826_v55, %v1738_v57 }
 0x21b   : > { %v1651_v60 = vadd.f32 %v6678_v18, %v1650_v58 }
 0x21c   : > { %v1916_v11 = vadd.f32 %v1915_v56, %v1827_v63  ;;  %v5290_v63 = vld [vmem:[%s6601_s18 + $0x184] sm:$0xf] }
 0x21d   : > { %v1740_v6 = vadd.f32 %v1739_v59, %v1651_v60  ;;  %v4425_v60 = vld [vmem:[%s6601_s18 + $0x180] sm:$0xf] }
 0x21e   : > { %v1992_v19 = vmax.f32 %v1916_v11, 0.0 }
 0x221   : > { %v1828_v7 = vpop.f32.mrf.mxu2  ;;  %v1917_v8 = vpop.f32.mrf.mxu3 }
 0x222   : > { %v1829_v12 = vadd.f32 %v1828_v7, %v1740_v6  ;;  %v1653_v13 = vpop.f32.mrf.mxu0  ;;  %v1742_v14 = vpop.f32.mrf.mxu1 }
 0x223   : > { %v1654_v21 = vadd.f32 %v6678_v18, %v1653_v13 }
 0x224   : > { %v1918_v17 = vadd.f32 %v1917_v8, %v1829_v12  ;;  %v4426_v8 = vor.u32 %v5292_v61, %v4425_v60  ;;  %v5300_v60 = vld [vmem:[%s6601_s18 + $0x1cc] sm:$0xf0] }
 0x225   : > { %1692 = vmatmul.bf16.gmra.mxu0 %v4394_v9  ;;  %1781 = vmatmul.bf16.gmra.mxu1 %v4398_v10  ;;  %v1743_v25 = vadd.f32 %v1742_v14, %v1654_v21  ;;  %v4430_v9 = vor.u32 %v5290_v63, %v4427_v0  ;;  %v4434_v14 = vor.u32 %v5293_v2, %v4433_v1  ;;  %v4459_v63 = vld [vmem:[%s6601_s18 + $0x1d0] sm:$0xf0]  ;;  %v4465_v0 = vld [vmem:[%s6601_s18 + $0x1c8] sm:$0xf]  ;;  %v5301_v1 = vld [vmem:[%s6601_s18 + $0x1d4] sm:$0xf0] }
 0x226   : > { %v1993_v20 = vmax.f32 %v1918_v17, 0.0  ;;  %1870 = vmatmul.bf16.gmra.mxu2 %v4402_v15  ;;  %1959 = vmatmul.bf16.gmra.mxu3 %v4406_v16  ;;  %v4438_v15 = vor.u32 %v5291_v3, %v4435_v4  ;;  %v5299_v2 = vld [vmem:[%s6601_s18 + $0x1cc] sm:$0xf]  ;;  %v4467_v3 = vld [vmem:[%s6601_s18 + $0x1d8] sm:$0xf0] }
 0x228   : > { %v5652_v22 = vpack.c.bf16 %v1993_v20, %v1992_v19 }
 0x229   : > { %v1831_v23 = vpop.f32.mrf.mxu2  ;;  %v1920_v24 = vpop.f32.mrf.mxu3 }
 0x22a   : > { %5915 = vst [vmem:[%s6692_s14 + $0x8] sm:$0xff] %v5652_v22   ;;  %v1655_v26 = vpop.f32.mrf.mxu0  ;;  %v1744_v27 = vpop.f32.mrf.mxu1  ;;  %v1832_v31 = vadd.f32 %v1831_v23, %v1743_v25 }
 0x22b   : > { %v1656_v28 = vadd.f32 %v6678_v18, %v1655_v26 }
 0x22c   : > { %v1921_v43 = vadd.f32 %v1920_v24, %v1832_v31  ;;  %v5294_v31 = vld [vmem:[%s6601_s18 + $0x1a4] sm:$0xf] }
 0x22d   : > { %v1745_v38 = vadd.f32 %v1744_v27, %v1656_v28  ;;  %v4441_v28 = vld [vmem:[%s6601_s18 + $0x1a0] sm:$0xf] }
 0x22e   : > { %v1994_v50 = vmax.f32 %v1921_v43, 0.0 }
 0x231   : > { %v1833_v39 = vpop.f32.mrf.mxu2  ;;  %v1922_v40 = vpop.f32.mrf.mxu3 }
 0x232   : > { %v1834_v44 = vadd.f32 %v1833_v39, %v1745_v38  ;;  %v1658_v45 = vpop.f32.mrf.mxu0  ;;  %v1747_v46 = vpop.f32.mrf.mxu1 }
 0x233   : > { %v1659_v52 = vadd.f32 %v6678_v18, %v1658_v45 }
 0x234   : > { %v1923_v49 = vadd.f32 %v1922_v40, %v1834_v44  ;;  %v4442_v40 = vor.u32 %v5296_v29, %v4441_v28  ;;  %v5304_v28 = vld [vmem:[%s6601_s18 + $0x1ec] sm:$0xf0] }
 0x235   : > { %1697 = vmatmul.bf16.gmra.mxu0 %v4410_v41  ;;  %1786 = vmatmul.bf16.gmra.mxu1 %v4414_v42  ;;  %v1748_v56 = vadd.f32 %v1747_v46, %v1659_v52  ;;  %v4446_v41 = vor.u32 %v5294_v31, %v4443_v32  ;;  %v4450_v46 = vor.u32 %v5297_v34, %v4449_v33  ;;  %v4475_v31 = vld [vmem:[%s6601_s18 + $0x1f0] sm:$0xf0]  ;;  %v4481_v32 = vld [vmem:[%s6601_s18 + $0x1e8] sm:$0xf]  ;;  %v5305_v33 = vld [vmem:[%s6601_s18 + $0x1f4] sm:$0xf0] }
 0x236   : > { %v1995_v51 = vmax.f32 %v1923_v49, 0.0  ;;  %1875 = vmatmul.bf16.gmra.mxu2 %v4418_v47  ;;  %1964 = vmatmul.bf16.gmra.mxu3 %v4422_v48  ;;  %v4454_v47 = vor.u32 %v5295_v35, %v4451_v36  ;;  %v5303_v34 = vld [vmem:[%s6601_s18 + $0x1ec] sm:$0xf]  ;;  %v4483_v35 = vld [vmem:[%s6601_s18 + $0x1f8] sm:$0xf0] }
 0x238   : > { %v5657_v53 = vpack.c.bf16 %v1995_v51, %v1994_v50 }
 0x239   : > { %v1836_v54 = vpop.f32.mrf.mxu2  ;;  %v1925_v55 = vpop.f32.mrf.mxu3 }
 0x23a   : > { %5916 = vst [vmem:[%s6692_s14 + $0x10] sm:$0xff] %v5657_v53   ;;  %v1660_v57 = vpop.f32.mrf.mxu0  ;;  %v1749_v58 = vpop.f32.mrf.mxu1  ;;  %v1837_v62 = vadd.f32 %v1836_v54, %v1748_v56 }
 0x23b   : > { %v1661_v59 = vadd.f32 %v6678_v18, %v1660_v57 }
 0x23c   : > { %v1926_v10 = vadd.f32 %v1925_v55, %v1837_v62  ;;  %v5298_v62 = vld [vmem:[%s6601_s18 + $0x1c4] sm:$0xf] }
 0x23d   : > { %v1750_v5 = vadd.f32 %v1749_v58, %v1661_v59  ;;  %v4457_v59 = vld [vmem:[%s6601_s18 + $0x1c0] sm:$0xf] }
 0x23e   : > { %v1996_v17 = vmax.f32 %v1926_v10, 0.0 }
 0x241   : > { %v1838_v6 = vpop.f32.mrf.mxu2  ;;  %v1927_v7 = vpop.f32.mrf.mxu3 }
 0x242   : > { %v1839_v11 = vadd.f32 %v1838_v6, %v1750_v5  ;;  %v1663_v12 = vpop.f32.mrf.mxu0  ;;  %v1752_v13 = vpop.f32.mrf.mxu1 }
 0x243   : > { %v1664_v20 = vadd.f32 %v6678_v18, %v1663_v12 }
 0x244   : > { %v1928_v16 = vadd.f32 %v1927_v7, %v1839_v11  ;;  %v4458_v7 = vor.u32 %v5300_v60, %v4457_v59 }
 0x245   : > { %1702 = vmatmul.bf16.gmra.mxu0 %v4426_v8  ;;  %1791 = vmatmul.bf16.gmra.mxu1 %v4430_v9  ;;  %v1753_v24 = vadd.f32 %v1752_v13, %v1664_v20  ;;  %v4462_v8 = vor.u32 %v5298_v62, %v4459_v63  ;;  %v4466_v13 = vor.u32 %v5301_v1, %v4465_v0 }
 0x246   : > { %v1997_v19 = vmax.f32 %v1928_v16, 0.0  ;;  %1880 = vmatmul.bf16.gmra.mxu2 %v4434_v14  ;;  %1969 = vmatmul.bf16.gmra.mxu3 %v4438_v15  ;;  %v4470_v14 = vor.u32 %v5299_v2, %v4467_v3 }
 0x248   : > { %v5662_v21 = vpack.c.bf16 %v1997_v19, %v1996_v17 }
 0x249   : > { %v1841_v22 = vpop.f32.mrf.mxu2  ;;  %v1930_v23 = vpop.f32.mrf.mxu3 }
 0x24a   : > { %5917 = vst [vmem:[%s6692_s14 + $0x18] sm:$0xff] %v5662_v21   ;;  %v1665_v25 = vpop.f32.mrf.mxu0  ;;  %v1754_v26 = vpop.f32.mrf.mxu1  ;;  %v1842_v30 = vadd.f32 %v1841_v22, %v1753_v24 }
 0x24b   : > { %v1666_v27 = vadd.f32 %v6678_v18, %v1665_v25 }
 0x24c   : > { %v1931_v42 = vadd.f32 %v1930_v23, %v1842_v30  ;;  %v5302_v30 = vld [vmem:[%s6601_s18 + $0x1e4] sm:$0xf] }
 0x24d   : > { %v1755_v37 = vadd.f32 %v1754_v26, %v1666_v27  ;;  %v4473_v27 = vld [vmem:[%s6601_s18 + $0x1e0] sm:$0xf] }
 0x24e   : > { %v1998_v49 = vmax.f32 %v1931_v42, 0.0 }
 0x251   : > { %v1843_v38 = vpop.f32.mrf.mxu2  ;;  %v1932_v39 = vpop.f32.mrf.mxu3 }
 0x252   : > { %v1844_v43 = vadd.f32 %v1843_v38, %v1755_v37  ;;  %v1668_v44 = vpop.f32.mrf.mxu0  ;;  %v1757_v45 = vpop.f32.mrf.mxu1 }
 0x253   : > { %v1669_v51 = vadd.f32 %v6678_v18, %v1668_v44 }
 0x254   : > { %v1933_v48 = vadd.f32 %v1932_v39, %v1844_v43  ;;  %v4474_v39 = vor.u32 %v5304_v28, %v4473_v27 }
 0x255   : > { %1707 = vmatmul.bf16.gmra.mxu0 %v4442_v40  ;;  %1796 = vmatmul.bf16.gmra.mxu1 %v4446_v41  ;;  %v1758_v55 = vadd.f32 %v1757_v45, %v1669_v51  ;;  %v4478_v40 = vor.u32 %v5302_v30, %v4475_v31  ;;  %v4482_v45 = vor.u32 %v5305_v33, %v4481_v32 }
 0x256   : > { %v1999_v50 = vmax.f32 %v1933_v48, 0.0  ;;  %1885 = vmatmul.bf16.gmra.mxu2 %v4450_v46  ;;  %1974 = vmatmul.bf16.gmra.mxu3 %v4454_v47  ;;  %v4486_v46 = vor.u32 %v5303_v34, %v4483_v35 }
 0x258   : > { %v5667_v52 = vpack.c.bf16 %v1999_v50, %v1998_v49 }
 0x259   : > { %v1846_v53 = vpop.f32.mrf.mxu2  ;;  %v1935_v54 = vpop.f32.mrf.mxu3 }
 0x25a   : > { %5918 = vst [vmem:[%s6692_s14 + $0x20] sm:$0xff] %v5667_v52   ;;  %v1670_v56 = vpop.f32.mrf.mxu0  ;;  %v1759_v57 = vpop.f32.mrf.mxu1  ;;  %v1847_v61 = vadd.f32 %v1846_v53, %v1758_v55 }
 0x25b   : > { %v1671_v58 = vadd.f32 %v6678_v18, %v1670_v56 }
 0x25c   : > { %v1936_v9 = vadd.f32 %v1935_v54, %v1847_v61 }
 0x25d   : > { %v1760_v4 = vadd.f32 %v1759_v57, %v1671_v58 }
 0x25e   : > { %v2000_v16 = vmax.f32 %v1936_v9, 0.0 }
 0x261   : > { %v1848_v5 = vpop.f32.mrf.mxu2  ;;  %v1937_v6 = vpop.f32.mrf.mxu3 }
 0x262   : > { %v1849_v10 = vadd.f32 %v1848_v5, %v1760_v4  ;;  %v1673_v11 = vpop.f32.mrf.mxu0  ;;  %v1762_v12 = vpop.f32.mrf.mxu1 }
 0x263   : > { %v1674_v19 = vadd.f32 %v6678_v18, %v1673_v11 }
 0x264   : > { %v1938_v15 = vadd.f32 %v1937_v6, %v1849_v10 }
 0x265   : > { %1712 = vmatmul.bf16.gmra.mxu0 %v4458_v7  ;;  %1801 = vmatmul.bf16.gmra.mxu1 %v4462_v8  ;;  %v1763_v23 = vadd.f32 %v1762_v12, %v1674_v19 }
 0x266   : > { %v2001_v17 = vmax.f32 %v1938_v15, 0.0  ;;  %1890 = vmatmul.bf16.gmra.mxu2 %v4466_v13  ;;  %1979 = vmatmul.bf16.gmra.mxu3 %v4470_v14 }
 0x268   : > { %v5672_v20 = vpack.c.bf16 %v2001_v17, %v2000_v16 }
 0x269   : > { %v1851_v21 = vpop.f32.mrf.mxu2  ;;  %v1940_v22 = vpop.f32.mrf.mxu3 }
 0x26a   : > { %5919 = vst [vmem:[%s6692_s14 + $0x28] sm:$0xff] %v5672_v20   ;;  %v1675_v24 = vpop.f32.mrf.mxu0  ;;  %v1764_v25 = vpop.f32.mrf.mxu1  ;;  %v1852_v29 = vadd.f32 %v1851_v21, %v1763_v23 }
 0x26b   : > { %v1676_v26 = vadd.f32 %v6678_v18, %v1675_v24 }
 0x26c   : > { %v1941_v41 = vadd.f32 %v1940_v22, %v1852_v29 }
 0x26d   : > { %v1765_v36 = vadd.f32 %v1764_v25, %v1676_v26 }
 0x26e   : > { %v2002_v48 = vmax.f32 %v1941_v41, 0.0 }
 0x271   : > { %v1853_v37 = vpop.f32.mrf.mxu2  ;;  %v1942_v38 = vpop.f32.mrf.mxu3 }
 0x272   : > { %v1854_v42 = vadd.f32 %v1853_v37, %v1765_v36  ;;  %v1678_v43 = vpop.f32.mrf.mxu0  ;;  %v1767_v44 = vpop.f32.mrf.mxu1 }
 0x273   : > { %v1679_v50 = vadd.f32 %v6678_v18, %v1678_v43 }
 0x274   : > { %v1943_v47 = vadd.f32 %v1942_v38, %v1854_v42 }
 0x275   : > { %1717 = vmatmul.bf16.gmra.mxu0 %v4474_v39  ;;  %1806 = vmatmul.bf16.gmra.mxu1 %v4478_v40  ;;  %v1768_v54 = vadd.f32 %v1767_v44, %v1679_v50 }
 0x276   : > { %v2003_v49 = vmax.f32 %v1943_v47, 0.0  ;;  %1895 = vmatmul.bf16.gmra.mxu2 %v4482_v45  ;;  %1984 = vmatmul.bf16.gmra.mxu3 %v4486_v46 }
 0x278   : > { %v5677_v51 = vpack.c.bf16 %v2003_v49, %v2002_v48 }
 0x279   : > { %v1856_v52 = vpop.f32.mrf.mxu2  ;;  %v1945_v53 = vpop.f32.mrf.mxu3 }
 0x27a   : > { %5920 = vst [vmem:[%s6692_s14 + $0x30] sm:$0xff] %v5677_v51   ;;  %v1680_v55 = vpop.f32.mrf.mxu0  ;;  %v1769_v56 = vpop.f32.mrf.mxu1  ;;  %v1857_v58 = vadd.f32 %v1856_v52, %v1768_v54 }
 0x27b   : > { %v1681_v57 = vadd.f32 %v6678_v18, %v1680_v55 }
 0x27c   : > { %v1946_v62 = vadd.f32 %v1945_v53, %v1857_v58 }
 0x27d   : > { %v1770_v59 = vadd.f32 %v1769_v56, %v1681_v57 }
 0x27e   : > { %v2004_v3 = vmax.f32 %v1946_v62, 0.0 }
 0x281   : > { %v1858_v60 = vpop.f32.mrf.mxu2  ;;  %v1947_v61 = vpop.f32.mrf.mxu3 }
 0x282   : > { %v1859_v63 = vadd.f32 %v1858_v60, %v1770_v59  ;;  %v1683_v0 = vpop.f32.mrf.mxu0  ;;  %v1772_v1 = vpop.f32.mrf.mxu1 }
 0x283   : > { %v1684_v5 = vadd.f32 %v6678_v18, %v1683_v0 }
 0x284   : > { %v1948_v2 = vadd.f32 %v1947_v61, %v1859_v63 }
 0x285   : > { %v1773_v9 = vadd.f32 %v1772_v1, %v1684_v5 }
 0x286   : > { %v2005_v4 = vmax.f32 %v1948_v2, 0.0 }
 0x288   : > { %v5682_v6 = vpack.c.bf16 %v2005_v4, %v2004_v3 }
 0x289   : > { %v1861_v7 = vpop.f32.mrf.mxu2  ;;  %v1950_v8 = vpop.f32.mrf.mxu3 }
 0x28a   : > { %5921 = vst [vmem:[%s6692_s14 + $0x38] sm:$0xff] %v5682_v6   ;;  %v1685_v10 = vpop.f32.mrf.mxu0  ;;  %v1774_v11 = vpop.f32.mrf.mxu1  ;;  %v1862_v13 = vadd.f32 %v1861_v7, %v1773_v9 }
 0x28b   : > { %v1686_v12 = vadd.f32 %v6678_v18, %v1685_v10 }
 0x28c   : > { %v1951_v17 = vadd.f32 %v1950_v8, %v1862_v13 }
 0x28d   : > { %v1775_v14 = vadd.f32 %v1774_v11, %v1686_v12 }
 0x28e   : > { %v2006_v23 = vmax.f32 %v1951_v17, 0.0 }
 0x291   : > { %v1863_v15 = vpop.f32.mrf.mxu2  ;;  %v1952_v16 = vpop.f32.mrf.mxu3 }
 0x292   : > { %v1864_v19 = vadd.f32 %v1863_v15, %v1775_v14  ;;  %v1688_v20 = vpop.f32.mrf.mxu0  ;;  %v1777_v21 = vpop.f32.mrf.mxu1 }
 0x293   : > { %v1689_v25 = vadd.f32 %v6678_v18, %v1688_v20 }
 0x294   : > { %v1953_v22 = vadd.f32 %v1952_v16, %v1864_v19 }
 0x295   : > { %v1778_v29 = vadd.f32 %v1777_v21, %v1689_v25 }
 0x296   : > { %v2007_v24 = vmax.f32 %v1953_v22, 0.0 }
 0x298   : > { %v5687_v26 = vpack.c.bf16 %v2007_v24, %v2006_v23 }
 0x299   : > { %v1866_v27 = vpop.f32.mrf.mxu2  ;;  %v1955_v28 = vpop.f32.mrf.mxu3 }
 0x29a   : > { %5922 = vst [vmem:[%s6692_s14 + $0x40] sm:$0xff] %v5687_v26   ;;  %v1690_v30 = vpop.f32.mrf.mxu0  ;;  %v1779_v31 = vpop.f32.mrf.mxu1  ;;  %v1867_v33 = vadd.f32 %v1866_v27, %v1778_v29 }
 0x29b   : > { %v1691_v32 = vadd.f32 %v6678_v18, %v1690_v30 }
 0x29c   : > { %v1956_v37 = vadd.f32 %v1955_v28, %v1867_v33 }
 0x29d   : > { %v1780_v34 = vadd.f32 %v1779_v31, %v1691_v32 }
 0x29e   : > { %v2008_v42 = vmax.f32 %v1956_v37, 0.0 }
 0x2a1   : > { %v1868_v35 = vpop.f32.mrf.mxu2  ;;  %v1957_v36 = vpop.f32.mrf.mxu3 }
 0x2a2   : > { %v1869_v38 = vadd.f32 %v1868_v35, %v1780_v34  ;;  %v1693_v39 = vpop.f32.mrf.mxu0  ;;  %v1782_v40 = vpop.f32.mrf.mxu1 }
 0x2a3   : > { %v1694_v44 = vadd.f32 %v6678_v18, %v1693_v39 }
 0x2a4   : > { %v1958_v41 = vadd.f32 %v1957_v36, %v1869_v38 }
 0x2a5   : > { %v1783_v48 = vadd.f32 %v1782_v40, %v1694_v44 }
 0x2a6   : > { %v2009_v43 = vmax.f32 %v1958_v41, 0.0 }
 0x2a8   : > { %v5692_v45 = vpack.c.bf16 %v2009_v43, %v2008_v42 }
 0x2a9   : > { %v1871_v46 = vpop.f32.mrf.mxu2  ;;  %v1960_v47 = vpop.f32.mrf.mxu3 }
 0x2aa   : > { %5923 = vst [vmem:[%s6692_s14 + $0x48] sm:$0xff] %v5692_v45   ;;  %v1695_v49 = vpop.f32.mrf.mxu0  ;;  %v1784_v50 = vpop.f32.mrf.mxu1  ;;  %v1872_v52 = vadd.f32 %v1871_v46, %v1783_v48 }
 0x2ab   : > { %v1696_v51 = vadd.f32 %v6678_v18, %v1695_v49 }
 0x2ac   : > { %v1961_v56 = vadd.f32 %v1960_v47, %v1872_v52 }
 0x2ad   : > { %v1785_v53 = vadd.f32 %v1784_v50, %v1696_v51 }
 0x2ae   : > { %v2010_v61 = vmax.f32 %v1961_v56, 0.0 }
 0x2b1   : > { %v1873_v54 = vpop.f32.mrf.mxu2  ;;  %v1962_v55 = vpop.f32.mrf.mxu3 }
 0x2b2   : > { %v1874_v57 = vadd.f32 %v1873_v54, %v1785_v53  ;;  %v1698_v58 = vpop.f32.mrf.mxu0  ;;  %v1787_v59 = vpop.f32.mrf.mxu1 }
 0x2b3   : > { %v1699_v63 = vadd.f32 %v6678_v18, %v1698_v58 }
 0x2b4   : > { %v1963_v60 = vadd.f32 %v1962_v55, %v1874_v57 }
 0x2b5   : > { %v1788_v3 = vadd.f32 %v1787_v59, %v1699_v63 }
 0x2b6   : > { %v2011_v62 = vmax.f32 %v1963_v60, 0.0 }
 0x2b8   : > { %v5697_v0 = vpack.c.bf16 %v2011_v62, %v2010_v61 }
 0x2b9   : > { %v1876_v1 = vpop.f32.mrf.mxu2  ;;  %v1965_v2 = vpop.f32.mrf.mxu3 }
 0x2ba   : > { %5924 = vst [vmem:[%s6692_s14 + $0x50] sm:$0xff] %v5697_v0   ;;  %v1700_v4 = vpop.f32.mrf.mxu0  ;;  %v1789_v5 = vpop.f32.mrf.mxu1  ;;  %v1877_v7 = vadd.f32 %v1876_v1, %v1788_v3 }
 0x2bb   : > { %v1701_v6 = vadd.f32 %v6678_v18, %v1700_v4 }
 0x2bc   : > { %v1966_v11 = vadd.f32 %v1965_v2, %v1877_v7 }
 0x2bd   : > { %v1790_v8 = vadd.f32 %v1789_v5, %v1701_v6 }
 0x2be   : > { %v2012_v16 = vmax.f32 %v1966_v11, 0.0 }
 0x2c1   : > { %v1878_v9 = vpop.f32.mrf.mxu2  ;;  %v1967_v10 = vpop.f32.mrf.mxu3 }
 0x2c2   : > { %v1879_v12 = vadd.f32 %v1878_v9, %v1790_v8  ;;  %v1703_v13 = vpop.f32.mrf.mxu0  ;;  %v1792_v14 = vpop.f32.mrf.mxu1 }
 0x2c3   : > { %v1704_v19 = vadd.f32 %v6678_v18, %v1703_v13 }
 0x2c4   : > { %v1968_v15 = vadd.f32 %v1967_v10, %v1879_v12 }
 0x2c5   : > { %v1793_v23 = vadd.f32 %v1792_v14, %v1704_v19 }
 0x2c6   : > { %v2013_v17 = vmax.f32 %v1968_v15, 0.0 }
 0x2c8   : > { %v5702_v20 = vpack.c.bf16 %v2013_v17, %v2012_v16 }
 0x2c9   : > { %v1881_v21 = vpop.f32.mrf.mxu2  ;;  %v1970_v22 = vpop.f32.mrf.mxu3 }
 0x2ca   : > { %5925 = vst [vmem:[%s6692_s14 + $0x58] sm:$0xff] %v5702_v20   ;;  %v1705_v24 = vpop.f32.mrf.mxu0  ;;  %v1794_v25 = vpop.f32.mrf.mxu1  ;;  %v1882_v27 = vadd.f32 %v1881_v21, %v1793_v23 }
 0x2cb   : > { %v1706_v26 = vadd.f32 %v6678_v18, %v1705_v24 }
 0x2cc   : > { %v1971_v31 = vadd.f32 %v1970_v22, %v1882_v27 }
 0x2cd   : > { %v1795_v28 = vadd.f32 %v1794_v25, %v1706_v26 }
 0x2ce   : > { %v2014_v36 = vmax.f32 %v1971_v31, 0.0 }
 0x2d1   : > { %v1883_v29 = vpop.f32.mrf.mxu2  ;;  %v1972_v30 = vpop.f32.mrf.mxu3 }
 0x2d2   : > { %v1884_v32 = vadd.f32 %v1883_v29, %v1795_v28  ;;  %v1708_v33 = vpop.f32.mrf.mxu0  ;;  %v1797_v34 = vpop.f32.mrf.mxu1 }
 0x2d3   : > { %v1709_v38 = vadd.f32 %v6678_v18, %v1708_v33 }
 0x2d4   : > { %v1973_v35 = vadd.f32 %v1972_v30, %v1884_v32 }
 0x2d5   : > { %v1798_v42 = vadd.f32 %v1797_v34, %v1709_v38 }
 0x2d6   : > { %v2015_v37 = vmax.f32 %v1973_v35, 0.0 }
 0x2d8   : > { %v5707_v39 = vpack.c.bf16 %v2015_v37, %v2014_v36 }
 0x2d9   : > { %v1886_v40 = vpop.f32.mrf.mxu2  ;;  %v1975_v41 = vpop.f32.mrf.mxu3 }
 0x2da   : > { %5926 = vst [vmem:[%s6692_s14 + $0x60] sm:$0xff] %v5707_v39   ;;  %v1710_v43 = vpop.f32.mrf.mxu0  ;;  %v1799_v44 = vpop.f32.mrf.mxu1  ;;  %v1887_v46 = vadd.f32 %v1886_v40, %v1798_v42 }
 0x2db   : > { %v1711_v45 = vadd.f32 %v6678_v18, %v1710_v43 }
 0x2dc   : > { %v1976_v50 = vadd.f32 %v1975_v41, %v1887_v46 }
 0x2dd   : > { %v1800_v47 = vadd.f32 %v1799_v44, %v1711_v45 }
 0x2de   : > { %v2016_v55 = vmax.f32 %v1976_v50, 0.0 }
 0x2e1   : > { %v1888_v48 = vpop.f32.mrf.mxu2  ;;  %v1977_v49 = vpop.f32.mrf.mxu3 }
 0x2e2   : > { %v1889_v51 = vadd.f32 %v1888_v48, %v1800_v47  ;;  %v1713_v52 = vpop.f32.mrf.mxu0  ;;  %v1802_v53 = vpop.f32.mrf.mxu1 }
 0x2e3   : > { %v1714_v57 = vadd.f32 %v6678_v18, %v1713_v52 }
 0x2e4   : > { %v1978_v54 = vadd.f32 %v1977_v49, %v1889_v51 }
 0x2e5   : > { %v1803_v61 = vadd.f32 %v1802_v53, %v1714_v57 }
 0x2e6   : > { %v2017_v56 = vmax.f32 %v1978_v54, 0.0 }
 0x2e8   : > { %v5712_v58 = vpack.c.bf16 %v2017_v56, %v2016_v55 }
 0x2e9   : > { %v1891_v59 = vpop.f32.mrf.mxu2  ;;  %v1980_v60 = vpop.f32.mrf.mxu3 }
 0x2ea   : > { %5927 = vst [vmem:[%s6692_s14 + $0x68] sm:$0xff] %v5712_v58   ;;  %v1715_v62 = vpop.f32.mrf.mxu0  ;;  %v1804_v63 = vpop.f32.mrf.mxu1  ;;  %v1892_v1 = vadd.f32 %v1891_v59, %v1803_v61 }
 0x2eb   : > { %v1716_v0 = vadd.f32 %v6678_v18, %v1715_v62 }
 0x2ec   : > { %v1981_v5 = vadd.f32 %v1980_v60, %v1892_v1 }
 0x2ed   : > { %v1805_v2 = vadd.f32 %v1804_v63, %v1716_v0 }
 0x2ee   : > { %v2018_v10 = vmax.f32 %v1981_v5, 0.0 }
 0x2f1   : > { %v1893_v3 = vpop.f32.mrf.mxu2  ;;  %v1982_v4 = vpop.f32.mrf.mxu3 }
 0x2f2   : > { %v1894_v6 = vadd.f32 %v1893_v3, %v1805_v2  ;;  %v1718_v7 = vpop.f32.mrf.mxu0  ;;  %v1807_v9 = vpop.f32.mrf.mxu1 }
 0x2f3   : > { %v1719_v12 = vadd.f32 %v6678_v18, %v1718_v7 }
 0x2f4   : > { %v1983_v8 = vadd.f32 %v1982_v4, %v1894_v6 }
 0x2f5   : > { %v1808_v16 = vadd.f32 %v1807_v9, %v1719_v12 }
 0x2f6   : > { %v2019_v11 = vmax.f32 %v1983_v8, 0.0 }
 0x2f8   : > { %v5717_v13 = vpack.c.bf16 %v2019_v11, %v2018_v10 }
 0x2f9   : > { %v1896_v14 = vpop.f32.mrf.mxu2  ;;  %v1985_v15 = vpop.f32.mrf.mxu3 }
 0x2fa   : > { %5928 = vst [vmem:[%s6692_s14 + $0x70] sm:$0xff] %v5717_v13   ;;  %v1720_v17 = vpop.f32.mrf.mxu0  ;;  %v1897_v20 = vadd.f32 %v1896_v14, %v1808_v16  ;;  %v1809_v21 = vpop.f32.mrf.mxu1 }
 0x2fb   : > { %v1721_v19 = vadd.f32 %v6678_v18, %v1720_v17 }
 0x2fc   : > { %v1986_v24 = vadd.f32 %v1985_v15, %v1897_v20 }
 0x2fd   : > { %v1810_v22 = vadd.f32 %v1809_v21, %v1721_v19 }
 0x2fe   : > { %v2020_v28 = vmax.f32 %v1986_v24, 0.0 }
 0x301   : > { %v1898_v23 = vpop.f32.mrf.mxu2  ;;  %v1987_v26 = vpop.f32.mrf.mxu3 }
 0x302   : > { %v1899_v25 = vadd.f32 %v1898_v23, %v1810_v22 }
 0x304   : > { %v1988_v27 = vadd.f32 %v1987_v26, %v1899_v25 }
 0x306   : > { %v2021_v29 = vmax.f32 %v1988_v27, 0.0 }
 0x308   : > { %v5722_v30 = vpack.c.bf16 %v2021_v29, %v2020_v28 }
 0x30a   : > { %5929 = vst [vmem:[%s6692_s14 + $0x78] sm:$0xff] %v5722_v30  }
 0x30b PF: > { %p2088_p5 = scmp.eq.s32.totalorder %s6393_s9, 1 }
 0x30d   : > { %p2089_p7 = pnand %p2088_p5, %p342_p2 }
 0x30f   : > { %2092 = sbr.rel (%p2089_p7) target bundleno = 1077 (0x435), region = 80 }
 0x314   : > { %v5377_v18 = vld [vmem:[#allocation11 + $0x38] sm:$0xff]  ;;  %v5376_v31 = vld [vmem:[#allocation11 + $0x30] sm:$0xff]  ;;  %v5375_v32 = vld [vmem:[#allocation11 + $0x28] sm:$0xff] }
 0x315   : > { %2413 = vmatpush.bf16.msra.mxu0 %v5377_v18  ;;  %5985 = vmatpush.bf16.msra.mxu1 %v5377_v18  ;;  %v5374_v33 = vld [vmem:[#allocation11 + $0x20] sm:$0xff]  ;;  %v5373_v34 = vld [vmem:[#allocation11 + $0x18] sm:$0xff]  ;;  %v5372_v35 = vld [vmem:[#allocation11 + $0x10] sm:$0xff] }
 0x316   : > { %5986 = vmatpush.bf16.msra.mxu2 %v5377_v18  ;;  %5987 = vmatpush.bf16.msra.mxu3 %v5377_v18  ;;  %v5371_v36 = vld [vmem:[#allocation11 + $0x8] sm:$0xff]  ;;  %v5370_v37 = vld [vmem:[#allocation11] sm:$0xff]  ;;  %v5340_v46 = vld [vmem:[#allocation4 + $0x10] sm:$0xff] }
 0x317   : > { %v5338_v38 = vld [vmem:[#allocation4] sm:$0xff]  ;;  %v5339_v42 = vld [vmem:[#allocation4 + $0x8] sm:$0xff]  ;;  %v5348_v47 = vld [vmem:[#allocation4 + $0x50] sm:$0xff] }
 0x318   : > { %v5346_v39 = vld [vmem:[#allocation4 + $0x40] sm:$0xff]  ;;  %v5347_v43 = vld [vmem:[#allocation4 + $0x48] sm:$0xff]  ;;  %v5356_v48 = vld [vmem:[#allocation4 + $0x90] sm:$0xff] }
 0x319   : > { %2414 = vmatpush.bf16.msra.mxu0 %v5376_v31  ;;  %5988 = vmatpush.bf16.msra.mxu1 %v5376_v31  ;;  %v5354_v40 = vld [vmem:[#allocation4 + $0x80] sm:$0xff]  ;;  %v5355_v44 = vld [vmem:[#allocation4 + $0x88] sm:$0xff]  ;;  %v5364_v49 = vld [vmem:[#allocation4 + $0xd0] sm:$0xff] }
 0x31a   : > { %5989 = vmatpush.bf16.msra.mxu2 %v5376_v31  ;;  %5990 = vmatpush.bf16.msra.mxu3 %v5376_v31  ;;  %v5362_v41 = vld [vmem:[#allocation4 + $0xc0] sm:$0xff]  ;;  %v5363_v45 = vld [vmem:[#allocation4 + $0xc8] sm:$0xff]  ;;  %v5341_v50 = vld [vmem:[#allocation4 + $0x18] sm:$0xff] }
 0x31b   : > { %v5349_v51 = vld [vmem:[#allocation4 + $0x58] sm:$0xff]  ;;  %v5342_v54 = vld [vmem:[#allocation4 + $0x20] sm:$0xff]  ;;  %v5343_v58 = vld [vmem:[#allocation4 + $0x28] sm:$0xff] }
 0x31c   : > { %v5357_v52 = vld [vmem:[#allocation4 + $0x98] sm:$0xff]  ;;  %v5350_v55 = vld [vmem:[#allocation4 + $0x60] sm:$0xff]  ;;  %v5351_v59 = vld [vmem:[#allocation4 + $0x68] sm:$0xff] }
 0x31d   : > { %2415 = vmatpush.bf16.msra.mxu0 %v5375_v32  ;;  %5991 = vmatpush.bf16.msra.mxu1 %v5375_v32  ;;  %v5365_v53 = vld [vmem:[#allocation4 + $0xd8] sm:$0xff]  ;;  %v5358_v56 = vld [vmem:[#allocation4 + $0xa0] sm:$0xff]  ;;  %v5359_v60 = vld [vmem:[#allocation4 + $0xa8] sm:$0xff] }
 0x31e   : > { %5992 = vmatpush.bf16.msra.mxu2 %v5375_v32  ;;  %5993 = vmatpush.bf16.msra.mxu3 %v5375_v32  ;;  %v5366_v57 = vld [vmem:[#allocation4 + $0xe0] sm:$0xff]  ;;  %v5367_v61 = vld [vmem:[#allocation4 + $0xe8] sm:$0xff]  ;;  %v5344_v62 = vld [vmem:[#allocation4 + $0x30] sm:$0xff] }
 0x31f   : > { %v5352_v63 = vld [vmem:[#allocation4 + $0x70] sm:$0xff]  ;;  %v5345_v2 = vld [vmem:[#allocation4 + $0x38] sm:$0xff] }
 0x320   : > { %v5360_v0 = vld [vmem:[#allocation4 + $0xb0] sm:$0xff]  ;;  %v5353_v3 = vld [vmem:[#allocation4 + $0x78] sm:$0xff] }
 0x321   : > { %2416 = vmatpush.bf16.msra.mxu0 %v5374_v33  ;;  %5994 = vmatpush.bf16.msra.mxu1 %v5374_v33  ;;  %v5368_v1 = vld [vmem:[#allocation4 + $0xf0] sm:$0xff]  ;;  %v5361_v4 = vld [vmem:[#allocation4 + $0xb8] sm:$0xff] }
 0x322   : > { %5995 = vmatpush.bf16.msra.mxu2 %v5374_v33  ;;  %5996 = vmatpush.bf16.msra.mxu3 %v5374_v33  ;;  %v5369_v5 = vld [vmem:[#allocation4 + $0xf8] sm:$0xff] }
 0x325   : > { %2417 = vmatpush.bf16.msra.mxu0 %v5373_v34  ;;  %5997 = vmatpush.bf16.msra.mxu1 %v5373_v34 }
 0x326   : > { %5998 = vmatpush.bf16.msra.mxu2 %v5373_v34  ;;  %5999 = vmatpush.bf16.msra.mxu3 %v5373_v34 }
 0x329   : > { %2418 = vmatpush.bf16.msra.mxu0 %v5372_v35  ;;  %6000 = vmatpush.bf16.msra.mxu1 %v5372_v35 }
 0x32a   : > { %6001 = vmatpush.bf16.msra.mxu2 %v5372_v35  ;;  %6002 = vmatpush.bf16.msra.mxu3 %v5372_v35 }
 0x32d   : > { %2419 = vmatpush.bf16.msra.mxu0 %v5371_v36  ;;  %6003 = vmatpush.bf16.msra.mxu1 %v5371_v36 }
 0x32e   : > { %6004 = vmatpush.bf16.msra.mxu2 %v5371_v36  ;;  %6005 = vmatpush.bf16.msra.mxu3 %v5371_v36 }
 0x331   : > { %2420 = vmatpush.bf16.msra.mxu0 %v5370_v37  ;;  %6006 = vmatpush.bf16.msra.mxu1 %v5370_v37 }
 0x332   : > { %6007 = vmatpush.bf16.msra.mxu2 %v5370_v37  ;;  %6008 = vmatpush.bf16.msra.mxu3 %v5370_v37 }
 0x334   : > { %2421 = vmatmul.bf16.vlgmr.msra.gmra.mxu0 %v5338_v38  ;;  %2461 = vmatmul.bf16.vlgmr.msra.gmra.mxu1 %v5346_v39 }
 0x335   : > { %2501 = vmatmul.bf16.vlgmr.msra.gmra.mxu2 %v5354_v40  ;;  %2541 = vmatmul.bf16.vlgmr.msra.gmra.mxu3 %v5362_v41 }
 0x344   : > { %2426 = vmatmul.bf16.gmra.mxu0 %v5339_v42  ;;  %2466 = vmatmul.bf16.gmra.mxu1 %v5347_v43 }
 0x345   : > { %2506 = vmatmul.bf16.gmra.mxu2 %v5355_v44  ;;  %2546 = vmatmul.bf16.gmra.mxu3 %v5363_v45 }
 0x354   : > { %2431 = vmatmul.bf16.gmra.mxu0 %v5340_v46  ;;  %2471 = vmatmul.bf16.gmra.mxu1 %v5348_v47 }
 0x355   : > { %2511 = vmatmul.bf16.gmra.mxu2 %v5356_v48  ;;  %2551 = vmatmul.bf16.gmra.mxu3 %v5364_v49 }
 0x364   : > { %2436 = vmatmul.bf16.gmra.mxu0 %v5341_v50  ;;  %2476 = vmatmul.bf16.gmra.mxu1 %v5349_v51 }
 0x365   : > { %2516 = vmatmul.bf16.gmra.mxu2 %v5357_v52  ;;  %2556 = vmatmul.bf16.gmra.mxu3 %v5365_v53 }
 0x374   : > { %2441 = vmatmul.bf16.gmra.mxu0 %v5342_v54  ;;  %2481 = vmatmul.bf16.gmra.mxu1 %v5350_v55 }
 0x375   : > { %2521 = vmatmul.bf16.gmra.mxu2 %v5358_v56  ;;  %2561 = vmatmul.bf16.gmra.mxu3 %v5366_v57 }
 0x384   : > { %2446 = vmatmul.bf16.gmra.mxu0 %v5343_v58  ;;  %2486 = vmatmul.bf16.gmra.mxu1 %v5351_v59 }
 0x385   : > { %2526 = vmatmul.bf16.gmra.mxu2 %v5359_v60  ;;  %2566 = vmatmul.bf16.gmra.mxu3 %v5367_v61 }
 0x394   : > { %2451 = vmatmul.bf16.gmra.mxu0 %v5344_v62  ;;  %2491 = vmatmul.bf16.gmra.mxu1 %v5352_v63 }
 0x395   : > { %2531 = vmatmul.bf16.gmra.mxu2 %v5360_v0  ;;  %2571 = vmatmul.bf16.gmra.mxu3 %v5368_v1 }
 0x3a4   : > { %2456 = vmatmul.bf16.gmra.mxu0 %v5345_v2  ;;  %2496 = vmatmul.bf16.gmra.mxu1 %v5353_v3 }
 0x3a5   : > { %2536 = vmatmul.bf16.gmra.mxu2 %v5361_v4  ;;  %2576 = vmatmul.bf16.gmra.mxu3 %v5369_v5 }
 0x3b1   : > { %v2422_v6 = vpop.f32.mrf.mxu0  ;;  %v2462_v7 = vpop.f32.mrf.mxu1 }
 0x3b8   : > { %v2502_v8 = vpop.f32.mrf.mxu2  ;;  %v2542_v9 = vpop.f32.mrf.mxu3 }
 0x3b9   : > { %v2424_v10 = vpop.f32.mrf.mxu0  ;;  %v2464_v11 = vpop.f32.mrf.mxu1 }
 0x3ba   : > { %v5727_v12 = vpack.c.bf16 %v2424_v10, %v2422_v6  ;;  %v5767_v13 = vpack.c.bf16 %v2464_v11, %v2462_v7 }
 0x3bc   : > { %5728 = vst [vmem:[#allocation3 + $0xb0] sm:$0xff] %v5727_v12  }
 0x3bd   : > { %5937 = vst [vmem:[#allocation3 + $0x80] sm:$0xff] %v5767_v13  }
 0x3c0   : > { %v2504_v14 = vpop.f32.mrf.mxu2  ;;  %v2544_v15 = vpop.f32.mrf.mxu3 }
 0x3c1   : > { %v5807_v16 = vpack.c.bf16 %v2504_v14, %v2502_v8  ;;  %v5847_v17 = vpack.c.bf16 %v2544_v15, %v2542_v9  ;;  %v2427_v19 = vpop.f32.mrf.mxu0  ;;  %v2467_v20 = vpop.f32.mrf.mxu1 }
 0x3c3   : > { %5945 = vst [vmem:[#allocation3 + $0x38] sm:$0xff] %v5807_v16  }
 0x3c4   : > { %5953 = vst [vmem:[#allocation3 + $0xa8] sm:$0xff] %v5847_v17  }
 0x3c8   : > { %v2507_v21 = vpop.f32.mrf.mxu2  ;;  %v2547_v22 = vpop.f32.mrf.mxu3 }
 0x3c9   : > { %v2429_v23 = vpop.f32.mrf.mxu0  ;;  %v2469_v24 = vpop.f32.mrf.mxu1 }
 0x3ca   : > { %v5732_v25 = vpack.c.bf16 %v2429_v23, %v2427_v19  ;;  %v5772_v26 = vpack.c.bf16 %v2469_v24, %v2467_v20 }
 0x3cc   : > { %5930 = vst [vmem:[#allocation3] sm:$0xff] %v5732_v25  }
 0x3cd   : > { %5938 = vst [vmem:[#allocation3 + $0x88] sm:$0xff] %v5772_v26  }
 0x3d0   : > { %v2509_v27 = vpop.f32.mrf.mxu2  ;;  %v2549_v28 = vpop.f32.mrf.mxu3 }
 0x3d1   : > { %v5812_v29 = vpack.c.bf16 %v2509_v27, %v2507_v21  ;;  %v5852_v30 = vpack.c.bf16 %v2549_v28, %v2547_v22  ;;  %v2432_v18 = vpop.f32.mrf.mxu0  ;;  %v2472_v31 = vpop.f32.mrf.mxu1 }
 0x3d3   : > { %5946 = vst [vmem:[#allocation3 + $0x58] sm:$0xff] %v5812_v29  }
 0x3d4   : > { %5954 = vst [vmem:[#allocation3 + $0xd0] sm:$0xff] %v5852_v30  }
 0x3d8   : > { %v2512_v32 = vpop.f32.mrf.mxu2  ;;  %v2552_v33 = vpop.f32.mrf.mxu3 }
 0x3d9   : > { %v2434_v34 = vpop.f32.mrf.mxu0  ;;  %v2474_v35 = vpop.f32.mrf.mxu1 }
 0x3da   : > { %v5737_v36 = vpack.c.bf16 %v2434_v34, %v2432_v18  ;;  %v5777_v37 = vpack.c.bf16 %v2474_v35, %v2472_v31 }
 0x3dc   : > { %5931 = vst [vmem:[#allocation3 + $0xd8] sm:$0xff] %v5737_v36  }
 0x3dd   : > { %5939 = vst [vmem:[#allocation3 + $0xe8] sm:$0xff] %v5777_v37  }
 0x3e0   : > { %v2514_v38 = vpop.f32.mrf.mxu2  ;;  %v2554_v39 = vpop.f32.mrf.mxu3 }
 0x3e1   : > { %v5817_v40 = vpack.c.bf16 %v2514_v38, %v2512_v32  ;;  %v5857_v41 = vpack.c.bf16 %v2554_v39, %v2552_v33  ;;  %v2437_v42 = vpop.f32.mrf.mxu0  ;;  %v2477_v43 = vpop.f32.mrf.mxu1 }
 0x3e3   : > { %5947 = vst [vmem:[#allocation3 + $0x40] sm:$0xff] %v5817_v40  }
 0x3e4   : > { %5955 = vst [vmem:[#allocation3 + $0x10] sm:$0xff] %v5857_v41  }
 0x3e8   : > { %v2517_v44 = vpop.f32.mrf.mxu2  ;;  %v2557_v45 = vpop.f32.mrf.mxu3 }
 0x3e9   : > { %v2439_v46 = vpop.f32.mrf.mxu0  ;;  %v2479_v47 = vpop.f32.mrf.mxu1 }
 0x3ea   : > { %v5742_v48 = vpack.c.bf16 %v2439_v46, %v2437_v42  ;;  %v5782_v49 = vpack.c.bf16 %v2479_v47, %v2477_v43 }
 0x3ec   : > { %5932 = vst [vmem:[#allocation3 + $0x18] sm:$0xff] %v5742_v48  }
 0x3ed   : > { %5940 = vst [vmem:[#allocation3 + $0xb8] sm:$0xff] %v5782_v49  }
 0x3f0   : > { %v2519_v50 = vpop.f32.mrf.mxu2  ;;  %v2559_v51 = vpop.f32.mrf.mxu3 }
 0x3f1   : > { %v5822_v52 = vpack.c.bf16 %v2519_v50, %v2517_v44  ;;  %v5862_v53 = vpack.c.bf16 %v2559_v51, %v2557_v45  ;;  %v2442_v54 = vpop.f32.mrf.mxu0  ;;  %v2482_v55 = vpop.f32.mrf.mxu1 }
 0x3f3   : > { %5948 = vst [vmem:[#allocation3 + $0xc8] sm:$0xff] %v5822_v52  }
 0x3f4   : > { %5956 = vst [vmem:[#allocation3 + $0x28] sm:$0xff] %v5862_v53  }
 0x3f8   : > { %v2522_v56 = vpop.f32.mrf.mxu2  ;;  %v2562_v57 = vpop.f32.mrf.mxu3 }
 0x3f9   : > { %v2444_v58 = vpop.f32.mrf.mxu0  ;;  %v2484_v59 = vpop.f32.mrf.mxu1 }
 0x3fa   : > { %v5747_v60 = vpack.c.bf16 %v2444_v58, %v2442_v54  ;;  %v5787_v61 = vpack.c.bf16 %v2484_v59, %v2482_v55 }
 0x3fc   : > { %5933 = vst [vmem:[#allocation3 + $0x50] sm:$0xff] %v5747_v60  }
 0x3fd   : > { %5941 = vst [vmem:[#allocation3 + $0x60] sm:$0xff] %v5787_v61  }
 0x400   : > { %v2524_v62 = vpop.f32.mrf.mxu2  ;;  %v2564_v63 = vpop.f32.mrf.mxu3 }
 0x401   : > { %v5827_v0 = vpack.c.bf16 %v2524_v62, %v2522_v56  ;;  %v5867_v1 = vpack.c.bf16 %v2564_v63, %v2562_v57  ;;  %v2447_v2 = vpop.f32.mrf.mxu0  ;;  %v2487_v3 = vpop.f32.mrf.mxu1 }
 0x403   : > { %5949 = vst [vmem:[#allocation3 + $0xe0] sm:$0xff] %v5827_v0  }
 0x404   : > { %5957 = vst [vmem:[#allocation3 + $0xa0] sm:$0xff] %v5867_v1  }
 0x408   : > { %v2527_v4 = vpop.f32.mrf.mxu2  ;;  %v2567_v5 = vpop.f32.mrf.mxu3 }
 0x409   : > { %v2449_v6 = vpop.f32.mrf.mxu0  ;;  %v2489_v7 = vpop.f32.mrf.mxu1 }
 0x40a   : > { %v5752_v8 = vpack.c.bf16 %v2449_v6, %v2447_v2  ;;  %v5792_v9 = vpack.c.bf16 %v2489_v7, %v2487_v3 }
 0x40c   : > { %5934 = vst [vmem:[#allocation3 + $0x68] sm:$0xff] %v5752_v8  }
 0x40d   : > { %5942 = vst [vmem:[#allocation3 + $0xf0] sm:$0xff] %v5792_v9  }
 0x410   : > { %v2529_v10 = vpop.f32.mrf.mxu2  ;;  %v2569_v11 = vpop.f32.mrf.mxu3 }
 0x411   : > { %v5832_v12 = vpack.c.bf16 %v2529_v10, %v2527_v4  ;;  %v5872_v13 = vpack.c.bf16 %v2569_v11, %v2567_v5  ;;  %v2452_v14 = vpop.f32.mrf.mxu0  ;;  %v2492_v15 = vpop.f32.mrf.mxu1 }
 0x413   : > { %5950 = vst [vmem:[#allocation3 + $0x90] sm:$0xff] %v5832_v12  }
 0x414   : > { %5958 = vst [vmem:[#allocation3 + $0xf8] sm:$0xff] %v5872_v13  }
 0x418   : > { %v2532_v16 = vpop.f32.mrf.mxu2  ;;  %v2572_v17 = vpop.f32.mrf.mxu3 }
 0x419   : > { %v2454_v19 = vpop.f32.mrf.mxu0  ;;  %v2494_v20 = vpop.f32.mrf.mxu1 }
 0x41a   : > { %v5757_v21 = vpack.c.bf16 %v2454_v19, %v2452_v14  ;;  %v5797_v22 = vpack.c.bf16 %v2494_v20, %v2492_v15 }
 0x41c   : > { %5935 = vst [vmem:[#allocation3 + $0x30] sm:$0xff] %v5757_v21  }
 0x41d   : > { %5943 = vst [vmem:[#allocation3 + $0x8] sm:$0xff] %v5797_v22  }
 0x420   : > { %v2534_v23 = vpop.f32.mrf.mxu2  ;;  %v2574_v24 = vpop.f32.mrf.mxu3 }
 0x421   : > { %v5837_v25 = vpack.c.bf16 %v2534_v23, %v2532_v16  ;;  %v5877_v26 = vpack.c.bf16 %v2574_v24, %v2572_v17  ;;  %v2457_v27 = vpop.f32.mrf.mxu0  ;;  %v2497_v28 = vpop.f32.mrf.mxu1 }
 0x423   : > { %5951 = vst [vmem:[#allocation3 + $0x70] sm:$0xff] %v5837_v25  }
 0x424   : > { %5959 = vst [vmem:[#allocation3 + $0x20] sm:$0xff] %v5877_v26  }
 0x428   : > { %v2537_v29 = vpop.f32.mrf.mxu2  ;;  %v2577_v30 = vpop.f32.mrf.mxu3 }
 0x429   : > { %v2459_v18 = vpop.f32.mrf.mxu0  ;;  %v2499_v31 = vpop.f32.mrf.mxu1 }
 0x42a   : > { %v5762_v32 = vpack.c.bf16 %v2459_v18, %v2457_v27  ;;  %v5802_v33 = vpack.c.bf16 %v2499_v31, %v2497_v28 }
 0x42c   : > { %5936 = vst [vmem:[#allocation3 + $0x48] sm:$0xff] %v5762_v32  }
 0x42d   : > { %5944 = vst [vmem:[#allocation3 + $0x78] sm:$0xff] %v5802_v33  }
 0x430   : > { %v2539_v34 = vpop.f32.mrf.mxu2  ;;  %v2579_v35 = vpop.f32.mrf.mxu3 }
 0x431   : > { %v5842_v36 = vpack.c.bf16 %v2539_v34, %v2537_v29  ;;  %v5882_v37 = vpack.c.bf16 %v2579_v35, %v2577_v30 }
 0x433   : > { %5952 = vst [vmem:[#allocation3 + $0xc0] sm:$0xff] %v5842_v36  }
 0x434   : > { %5960 = vst [vmem:[#allocation3 + $0x98] sm:$0xff] %v5882_v37  }
 0x435 PF: > { %p4776_p9 = scmp.ne.s32.totalorder %s6393_s9, 1 }
 0x436   : > { %s2713_s24 = sshra.s32 (!%p4776_p9), %s4227_s23, 3 }
 0x437   : > { %2712 = sbr.rel (%p4776_p9) target bundleno = 1704 (0x6a8), region = 84  ;;  %s5378_s25 = sshll.u32 (!%p4776_p9), %s2713_s24, 4 }
 0x438   : > { %s6793_s27 = scalar_lea.vmem (!%p4776_p9), [#allocation2], %s5378_s25 }
 0x43c   : > { %v5450_v38 = vld [vmem:[#allocation3 + $0x48] sm:$0xff]  ;;  %v5449_v39 = vld [vmem:[#allocation3 + $0x30] sm:$0xff]  ;;  %v5446_v42 = vld [vmem:[#allocation3 + $0x18] sm:$0xff] }
 0x43d   : > { %6009 = vmatpush.bf16.msra.mxu1 %v5450_v38  ;;  %6010 = vmatpush.bf16.msra.mxu2 %v5450_v38  ;;  %v5448_v40 = vld [vmem:[#allocation3 + $0x68] sm:$0xff]  ;;  %v5447_v41 = vld [vmem:[#allocation3 + $0x50] sm:$0xff]  ;;  %v5445_v43 = vld [vmem:[#allocation3 + $0xd8] sm:$0xff] }
 0x43e   : > { %6011 = vmatpush.bf16.msra.mxu3 %v5450_v38  ;;  %3362 = vmatpush.bf16.msra.mxu0 %v5450_v38  ;;  %v5444_v44 = vld [vmem:[#allocation3] sm:$0xff]  ;;  %v5443_v45 = vld [vmem:[#allocation3 + $0xb0] sm:$0xff]  ;;  %v5474_v53 = vld [vmem:[#allocation3 + $0x98] sm:$0xff] }
 0x43f   : > { %v4845_v46 = vld [vmem:[%s6793_s27 + $0x80] sm:$0xf]  ;;  %v5397_v47 = vld [vmem:[%s6793_s27 + $0x8c] sm:$0xf0]  ;;  %v5458_v54 = vld [vmem:[#allocation3 + $0x78] sm:$0xff] }
 0x440   : > { %v4909_v48 = vld [vmem:[%s6793_s27 + $0x100] sm:$0xf]  ;;  %v5413_v49 = vld [vmem:[%s6793_s27 + $0x10c] sm:$0xf0]  ;;  %v4846_v55 = vor.u32 %v5397_v47, %v4845_v46  ;;  %v5457_v60 = vld [vmem:[#allocation3 + $0x8] sm:$0xff] }
 0x441   : > { %6012 = vmatpush.bf16.msra.mxu1 %v5449_v39  ;;  %6013 = vmatpush.bf16.msra.mxu2 %v5449_v39  ;;  %v4973_v50 = vld [vmem:[%s6793_s27 + $0x180] sm:$0xf]  ;;  %v5429_v51 = vld [vmem:[%s6793_s27 + $0x18c] sm:$0xf0]  ;;  %v4910_v56 = vor.u32 %v5413_v49, %v4909_v48  ;;  %v5472_v62 = vld [vmem:[#allocation3 + $0xf8] sm:$0xff] }
 0x442   : > { %6014 = vmatpush.bf16.msra.mxu3 %v5449_v39  ;;  %3363 = vmatpush.bf16.msra.mxu0 %v5449_v39  ;;  %v5466_v52 = vld [vmem:[#allocation3 + $0xc0] sm:$0xff]  ;;  %v4974_v57 = vor.u32 %v5429_v51, %v4973_v50  ;;  %v5465_v58 = vld [vmem:[#allocation3 + $0x70] sm:$0xff]  ;;  %v5462_v9 = vld [vmem:[#allocation3 + $0xc8] sm:$0xff] }
 0x443   : > { %v5473_v59 = vld [vmem:[#allocation3 + $0x20] sm:$0xff]  ;;  %v5464_v61 = vld [vmem:[#allocation3 + $0x90] sm:$0xff]  ;;  %v5470_v10 = vld [vmem:[#allocation3 + $0x28] sm:$0xff] }
 0x444   : > { %v5456_v63 = vld [vmem:[#allocation3 + $0xf0] sm:$0xff]  ;;  %v5463_v0 = vld [vmem:[#allocation3 + $0xe0] sm:$0xff]  ;;  %v5454_v11 = vld [vmem:[#allocation3 + $0xb8] sm:$0xff] }
 0x445   : > { %6015 = vmatpush.bf16.msra.mxu1 %v5448_v40  ;;  %6016 = vmatpush.bf16.msra.mxu2 %v5448_v40  ;;  %v5471_v1 = vld [vmem:[#allocation3 + $0xa0] sm:$0xff]  ;;  %v5401_v4 = vld [vmem:[%s6793_s27 + $0xac] sm:$0xf0]  ;;  %v5453_v17 = vld [vmem:[#allocation3 + $0xe8] sm:$0xff] }
 0x446   : > { %6017 = vmatpush.bf16.msra.mxu3 %v5448_v40  ;;  %3364 = vmatpush.bf16.msra.mxu0 %v5448_v40  ;;  %v5455_v2 = vld [vmem:[#allocation3 + $0x60] sm:$0xff]  ;;  %v5417_v6 = vld [vmem:[%s6793_s27 + $0x12c] sm:$0xf0]  ;;  %v5460_v19 = vld [vmem:[#allocation3 + $0x58] sm:$0xff] }
 0x447   : > { %v4861_v3 = vld [vmem:[%s6793_s27 + $0xa0] sm:$0xf]  ;;  %v5433_v8 = vld [vmem:[%s6793_s27 + $0x1ac] sm:$0xf0]  ;;  %v5452_v23 = vld [vmem:[#allocation3 + $0x88] sm:$0xff] }
 0x448   : > { %v4925_v5 = vld [vmem:[%s6793_s27 + $0x120] sm:$0xf]  ;;  %v4862_v12 = vor.u32 %v5401_v4, %v4861_v3  ;;  %v5469_v16 = vld [vmem:[#allocation3 + $0x10] sm:$0xff]  ;;  %v5459_v25 = vld [vmem:[#allocation3 + $0x38] sm:$0xff] }
 0x449   : > { %6018 = vmatpush.bf16.msra.mxu1 %v5447_v41  ;;  %6019 = vmatpush.bf16.msra.mxu2 %v5447_v41  ;;  %v4989_v7 = vld [vmem:[%s6793_s27 + $0x1a0] sm:$0xf]  ;;  %v4926_v13 = vor.u32 %v5417_v6, %v4925_v5  ;;  %v5381_v21 = vld [vmem:[%s6793_s27 + $0xc] sm:$0xf0]  ;;  %v5467_v26 = vld [vmem:[#allocation3 + $0xa8] sm:$0xff] }
 0x44a   : > { %6020 = vmatpush.bf16.msra.mxu3 %v5447_v41  ;;  %3365 = vmatpush.bf16.msra.mxu0 %v5447_v41  ;;  %v4990_v14 = vor.u32 %v5433_v8, %v4989_v7  ;;  %v5461_v15 = vld [vmem:[#allocation3 + $0x40] sm:$0xff]  ;;  %v5468_v22 = vld [vmem:[#allocation3 + $0xd0] sm:$0xff]  ;;  %v5384_v3 = vld [vmem:[%s6793_s27 + $0x2c] sm:$0xf] }
 0x44b   : > { %v4781_v20 = vld [vmem:[%s6793_s27] sm:$0xf]  ;;  %v5405_v29 = vld [vmem:[%s6793_s27 + $0xcc] sm:$0xf0]  ;;  %v5379_v51 = vld [vmem:[%s6793_s27 + $0x4] sm:$0xf] }
 0x44c   : > { %v4782_v24 = vor.u32 %v5381_v21, %v4781_v20  ;;  %v5451_v27 = vld [vmem:[#allocation3 + $0x80] sm:$0xff]  ;;  %v5421_v18 = vld [vmem:[%s6793_s27 + $0x14c] sm:$0xf0]  ;;  %v4807_v4 = vld [vmem:[%s6793_s27 + $0x38] sm:$0xf0] }
 0x44d   : > { %6021 = vmatpush.bf16.msra.mxu1 %v5446_v42  ;;  %6022 = vmatpush.bf16.msra.mxu2 %v5446_v42  ;;  %v4877_v28 = vld [vmem:[%s6793_s27 + $0xc0] sm:$0xf]  ;;  %v5437_v32 = vld [vmem:[%s6793_s27 + $0x1cc] sm:$0xf0]  ;;  %v4810_v7 = vor.u32 %v5384_v3, %v4807_v4  ;;  %v5387_v8 = vld [vmem:[%s6793_s27 + $0x44] sm:$0xf] }
 0x44e   : > { %6023 = vmatpush.bf16.msra.mxu3 %v5446_v42  ;;  %3366 = vmatpush.bf16.msra.mxu0 %v5446_v42  ;;  %v4941_v30 = vld [vmem:[%s6793_s27 + $0x140] sm:$0xf]  ;;  %v4878_v33 = vor.u32 %v5405_v29, %v4877_v28  ;;  %v5385_v37 = vld [vmem:[%s6793_s27 + $0x2c] sm:$0xf0]  ;;  %v4837_v20 = vld [vmem:[%s6793_s27 + $0x68] sm:$0xf] }
 0x44f   : > { %v5005_v31 = vld [vmem:[%s6793_s27 + $0x1c0] sm:$0xf]  ;;  %v4942_v34 = vor.u32 %v5421_v18, %v4941_v30  ;;  %v5409_v40 = vld [vmem:[%s6793_s27 + $0xec] sm:$0xf0]  ;;  %v5394_v21 = vld [vmem:[%s6793_s27 + $0x74] sm:$0xf0] }
 0x450   : > { %v5006_v35 = vor.u32 %v5437_v32, %v5005_v31  ;;  %v4797_v36 = vld [vmem:[%s6793_s27 + $0x20] sm:$0xf]  ;;  %v5425_v42 = vld [vmem:[%s6793_s27 + $0x16c] sm:$0xf0]  ;;  %v5395_v29 = vld [vmem:[%s6793_s27 + $0x84] sm:$0xf] }
 0x451   : > { %6024 = vmatpush.bf16.msra.mxu1 %v5445_v43  ;;  %6025 = vmatpush.bf16.msra.mxu2 %v5445_v43  ;;  %v4798_v38 = vor.u32 %v5385_v37, %v4797_v36  ;;  %v4893_v39 = vld [vmem:[%s6793_s27 + $0xe0] sm:$0xf]  ;;  %v5389_v49 = vld [vmem:[%s6793_s27 + $0x4c] sm:$0xf0]  ;;  %v4847_v30 = vld [vmem:[%s6793_s27 + $0x90] sm:$0xf0] }
 0x452   : > { %6026 = vmatpush.bf16.msra.mxu3 %v5445_v43  ;;  %3367 = vmatpush.bf16.msra.mxu0 %v5445_v43  ;;  %v4957_v41 = vld [vmem:[%s6793_s27 + $0x160] sm:$0xf]  ;;  %v5481_v28 = vld [vmem:[#allocation12 + $0x30] sm:$0xff]  ;;  %v4853_v18 = vld [vmem:[%s6793_s27 + $0x88] sm:$0xf] }
 0x453   : > { %v5021_v43 = vld [vmem:[%s6793_s27 + $0x1e0] sm:$0xf]  ;;  %v4958_v46 = vor.u32 %v5425_v42, %v4957_v41  ;;  %v5398_v31 = vld [vmem:[%s6793_s27 + $0x94] sm:$0xf0]  ;;  %v5396_v32 = vld [vmem:[%s6793_s27 + $0x8c] sm:$0xf] }
 0x454   : > { %v4813_v48 = vld [vmem:[%s6793_s27 + $0x40] sm:$0xf] }
 0x455   : > { %6027 = vmatpush.bf16.msra.mxu1 %v5444_v44  ;;  %6028 = vmatpush.bf16.msra.mxu2 %v5444_v44  ;;  %v4814_v50 = vor.u32 %v5389_v49, %v4813_v48  ;;  %v5479_v42 = vld [vmem:[#allocation12 + $0x20] sm:$0xff]  ;;  %v4871_v48 = vld [vmem:[%s6793_s27 + $0xb8] sm:$0xf0] }
 0x456   : > { %6029 = vmatpush.bf16.msra.mxu3 %v5444_v44  ;;  %3368 = vmatpush.bf16.msra.mxu0 %v5444_v44  ;;  %v5441_v44 = vld [vmem:[%s6793_s27 + $0x1ec] sm:$0xf0] }
 0x457   : > { %v5022_v47 = vor.u32 %v5441_v44, %v5021_v43  ;;  %v5399_v43 = vld [vmem:[%s6793_s27 + $0xa4] sm:$0xf]  ;;  %v4863_v44 = vld [vmem:[%s6793_s27 + $0xb0] sm:$0xf0] }
 0x459   : > { %6030 = vmatpush.bf16.msra.mxu1 %v5443_v45  ;;  %6031 = vmatpush.bf16.msra.mxu2 %v5443_v45 }
 0x45a   : > { %6032 = vmatpush.bf16.msra.mxu3 %v5443_v45  ;;  %3369 = vmatpush.bf16.msra.mxu0 %v5443_v45  ;;  %v4894_v45 = vor.u32 %v5409_v40, %v4893_v39 }
 0x45c   : > { %3390 = vmatmul.bf16.vlgmr.msra.gmra.mxu1 %v4846_v55  ;;  %3410 = vmatmul.bf16.vlgmr.msra.gmra.mxu2 %v4910_v56  ;;  %v5380_v55 = vld [vmem:[%s6793_s27 + $0xc] sm:$0xf]  ;;  %v4791_v56 = vld [vmem:[%s6793_s27 + $0x18] sm:$0xf0] }
 0x45d   : > { %3540 = vmatpush.bf16.msrb.mxu2 %v5466_v52  ;;  %3451 = vmatpush.bf16.msrb.mxu1 %v5458_v54  ;;  %v4783_v52 = vld [vmem:[%s6793_s27 + $0x10] sm:$0xf0]  ;;  %v5382_v54 = vld [vmem:[%s6793_s27 + $0x14] sm:$0xf0] }
 0x45e   : > { %3629 = vmatpush.bf16.msrb.mxu3 %v5474_v53  ;;  %3370 = vmatmul.bf16.vlgmr.msra.gmra.mxu0 %v4782_v24  ;;  %v4789_v53 = vld [vmem:[%s6793_s27 + $0x8] sm:$0xf] }
 0x45f   : > { %3430 = vmatmul.bf16.vlgmr.msra.gmra.mxu3 %v4974_v57  ;;  %v4786_v57 = vor.u32 %v5379_v51, %v4783_v52  ;;  %v4866_v51 = vor.u32 %v5399_v43, %v4863_v44 }
 0x461   : > { %3541 = vmatpush.bf16.msrb.mxu2 %v5465_v58  ;;  %3452 = vmatpush.bf16.msrb.mxu1 %v5457_v60  ;;  %v4790_v58 = vor.u32 %v5382_v54, %v4789_v53  ;;  %v4829_v60 = vld [vmem:[%s6793_s27 + $0x60] sm:$0xf] }
 0x462   : > { %3630 = vmatpush.bf16.msrb.mxu3 %v5473_v59  ;;  %v4794_v59 = vor.u32 %v5380_v55, %v4791_v56  ;;  %v5478_v55 = vld [vmem:[#allocation12 + $0x18] sm:$0xff] }
 0x465   : > { %3542 = vmatpush.bf16.msrb.mxu2 %v5464_v61  ;;  %3453 = vmatpush.bf16.msrb.mxu1 %v5456_v63  ;;  %v5393_v61 = vld [vmem:[%s6793_s27 + $0x6c] sm:$0xf0]  ;;  %v5383_v63 = vld [vmem:[%s6793_s27 + $0x24] sm:$0xf] }
 0x466   : > { %3631 = vmatpush.bf16.msrb.mxu3 %v5472_v62  ;;  %v4830_v62 = vor.u32 %v5393_v61, %v4829_v60  ;;  %v5403_v60 = vld [vmem:[%s6793_s27 + $0xc4] sm:$0xf]  ;;  %v4879_v61 = vld [vmem:[%s6793_s27 + $0xd0] sm:$0xf0] }
 0x467   : > { %v4882_v4 = vor.u32 %v5403_v60, %v4879_v61  ;;  %v5415_v60 = vld [vmem:[%s6793_s27 + $0x124] sm:$0xf]  ;;  %v4927_v61 = vld [vmem:[%s6793_s27 + $0x130] sm:$0xf0] }
 0x469   : > { %3543 = vmatpush.bf16.msrb.mxu2 %v5463_v0  ;;  %3454 = vmatpush.bf16.msrb.mxu1 %v5455_v2  ;;  %v4799_v0 = vld [vmem:[%s6793_s27 + $0x30] sm:$0xf0]  ;;  %v5386_v2 = vld [vmem:[%s6793_s27 + $0x34] sm:$0xf0] }
 0x46a   : > { %3632 = vmatpush.bf16.msrb.mxu3 %v5471_v1  ;;  %v4805_v1 = vld [vmem:[%s6793_s27 + $0x28] sm:$0xf]  ;;  %v4802_v5 = vor.u32 %v5383_v63, %v4799_v0  ;;  %v5406_v63 = vld [vmem:[%s6793_s27 + $0xd4] sm:$0xf0]  ;;  %v5404_v0 = vld [vmem:[%s6793_s27 + $0xcc] sm:$0xf] }
 0x46b   : > { %v4806_v6 = vor.u32 %v5386_v2, %v4805_v1  ;;  %v4887_v1 = vld [vmem:[%s6793_s27 + $0xd8] sm:$0xf0] }
 0x46c   : > { %3395 = vmatmul.bf16.gmra.mxu1 %v4862_v12  ;;  %3415 = vmatmul.bf16.gmra.mxu2 %v4926_v13  ;;  %v5388_v12 = vld [vmem:[%s6793_s27 + $0x4c] sm:$0xf]  ;;  %v4823_v13 = vld [vmem:[%s6793_s27 + $0x58] sm:$0xf0] }
 0x46d   : > { %3544 = vmatpush.bf16.msrb.mxu2 %v5462_v9  ;;  %3455 = vmatpush.bf16.msrb.mxu1 %v5454_v11  ;;  %v4815_v9 = vld [vmem:[%s6793_s27 + $0x50] sm:$0xf0]  ;;  %v5390_v11 = vld [vmem:[%s6793_s27 + $0x54] sm:$0xf0] }
 0x46e   : > { %3633 = vmatpush.bf16.msrb.mxu3 %v5470_v10  ;;  %3375 = vmatmul.bf16.gmra.mxu0 %v4798_v38  ;;  %v4821_v10 = vld [vmem:[%s6793_s27 + $0x48] sm:$0xf] }
 0x46f   : > { %3435 = vmatmul.bf16.gmra.mxu3 %v4990_v14  ;;  %v4818_v14 = vor.u32 %v5387_v8, %v4815_v9  ;;  %v5480_v38 = vld [vmem:[#allocation12 + $0x28] sm:$0xff] }
 0x470   : > { %v5476_v8 = vld [vmem:[#allocation12 + $0x8] sm:$0xff] }
 0x471   : > { %3545 = vmatpush.bf16.msrb.mxu2 %v5461_v15  ;;  %3456 = vmatpush.bf16.msrb.mxu1 %v5453_v17  ;;  %v4822_v15 = vor.u32 %v5390_v11, %v4821_v10  ;;  %v5391_v17 = vld [vmem:[%s6793_s27 + $0x64] sm:$0xf] }
 0x472   : > { %3634 = vmatpush.bf16.msrb.mxu3 %v5469_v16  ;;  %v4826_v16 = vor.u32 %v5388_v12, %v4823_v13  ;;  %v5475_v12 = vld [vmem:[#allocation12] sm:$0xff] }
 0x473   : > { %v5407_v13 = vld [vmem:[%s6793_s27 + $0xe4] sm:$0xf] }
 0x475   : > { %3546 = vmatpush.bf16.msrb.mxu2 %v5460_v19  ;;  %3457 = vmatpush.bf16.msrb.mxu1 %v5452_v23  ;;  %v4831_v19 = vld [vmem:[%s6793_s27 + $0x70] sm:$0xf0]  ;;  %v4839_v23 = vld [vmem:[%s6793_s27 + $0x78] sm:$0xf0] }
 0x476   : > { %3635 = vmatpush.bf16.msrb.mxu3 %v5468_v22  ;;  %v5392_v22 = vld [vmem:[%s6793_s27 + $0x6c] sm:$0xf]  ;;  %v4834_v24 = vor.u32 %v5391_v17, %v4831_v19  ;;  %v4903_v19 = vld [vmem:[%s6793_s27 + $0xf8] sm:$0xf0] }
 0x477   : > { %v5408_v17 = vld [vmem:[%s6793_s27 + $0xec] sm:$0xf] }
 0x479   : > { %3547 = vmatpush.bf16.msrb.mxu2 %v5459_v25  ;;  %3458 = vmatpush.bf16.msrb.mxu1 %v5451_v27  ;;  %v4838_v25 = vor.u32 %v5394_v21, %v4837_v20  ;;  %v5482_v27 = vld [vmem:[#allocation12 + $0x38] sm:$0xff] }
 0x47a   : > { %3636 = vmatpush.bf16.msrb.mxu3 %v5467_v26  ;;  %v4842_v26 = vor.u32 %v5392_v22, %v4839_v23  ;;  %3802 = vmatpush.bf16.msrb.mxu0 %v5482_v27 }
 0x47c   : > { %3400 = vmatmul.bf16.gmra.mxu1 %v4878_v33  ;;  %3420 = vmatmul.bf16.gmra.mxu2 %v4942_v34  ;;  %v4855_v33 = vld [vmem:[%s6793_s27 + $0x98] sm:$0xf0]  ;;  %v4850_v34 = vor.u32 %v5395_v29, %v4847_v30  ;;  %v5411_v30 = vld [vmem:[%s6793_s27 + $0x104] sm:$0xf] }
 0x47d   : > { %v4858_v37 = vor.u32 %v5396_v32, %v4855_v33  ;;  %v4917_v32 = vld [vmem:[%s6793_s27 + $0x108] sm:$0xf]  ;;  %v5414_v33 = vld [vmem:[%s6793_s27 + $0x114] sm:$0xf0] }
 0x47e   : > { %3380 = vmatmul.bf16.gmra.mxu0 %v4814_v50  ;;  %v4918_v43 = vor.u32 %v5414_v33, %v4917_v32 }
 0x47f   : > { %3440 = vmatmul.bf16.gmra.mxu3 %v5006_v35  ;;  %3803 = vmatpush.bf16.msrb.mxu0 %v5481_v28  ;;  %v4854_v35 = vor.u32 %v5398_v31, %v4853_v18  ;;  %v4911_v31 = vld [vmem:[%s6793_s27 + $0x110] sm:$0xf0] }
 0x483   : > { %3804 = vmatpush.bf16.msrb.mxu0 %v5480_v38 }
 0x487   : > { %3805 = vmatpush.bf16.msrb.mxu0 %v5479_v42  ;;  %v4914_v42 = vor.u32 %v5411_v30, %v4911_v31 }
 0x48b   : > { %3806 = vmatpush.bf16.msrb.mxu0 %v5478_v55 }
 0x48c   : > { %3405 = vmatmul.bf16.gmra.mxu1 %v4894_v45  ;;  %3425 = vmatmul.bf16.gmra.mxu2 %v4958_v46  ;;  %v4869_v45 = vld [vmem:[%s6793_s27 + $0xa8] sm:$0xf]  ;;  %v5402_v46 = vld [vmem:[%s6793_s27 + $0xb4] sm:$0xf0] }
 0x48d   : > { %v4870_v52 = vor.u32 %v5402_v46, %v4869_v45  ;;  %v6932_v46 = vld [vmem:[%s7152_s5] ss:$0 sm:$0xff] }
 0x48e   : > { %3385 = vmatmul.bf16.gmra.mxu0 %v4830_v62  ;;  %v4885_v62 = vld [vmem:[%s6793_s27 + $0xc8] sm:$0xf] }
 0x48f   : > { %3445 = vmatmul.bf16.gmra.mxu3 %v5022_v47  ;;  %v5400_v47 = vld [vmem:[%s6793_s27 + $0xac] sm:$0xf] }
 0x490   : > { %v4874_v54 = vor.u32 %v5400_v47, %v4871_v48 }
 0x49c   : > { %3459 = vmatmul.bf16.vlgmr.msrb.gmra.mxu1 %v4786_v57  ;;  %3548 = vmatmul.bf16.vlgmr.msrb.gmra.mxu2 %v4790_v58 }
 0x49f   : > { %3637 = vmatmul.bf16.vlgmr.msrb.gmra.mxu3 %v4794_v59  ;;  %v5477_v59 = vld [vmem:[#allocation12 + $0x10] sm:$0xff] }
 0x4a0   : > { %3807 = vmatpush.bf16.msrb.mxu0 %v5477_v59 }
 0x4a4   : > { %3808 = vmatpush.bf16.msrb.mxu0 %v5476_v8 }
 0x4a8   : > { %3809 = vmatpush.bf16.msrb.mxu0 %v5475_v12 }
 0x4ac   : > { %3464 = vmatmul.bf16.gmra.mxu1 %v4802_v5  ;;  %3553 = vmatmul.bf16.gmra.mxu2 %v4806_v6  ;;  %v4886_v5 = vor.u32 %v5406_v63, %v4885_v62  ;;  %v4933_v62 = vld [vmem:[%s6793_s27 + $0x128] sm:$0xf]  ;;  %v5418_v63 = vld [vmem:[%s6793_s27 + $0x134] sm:$0xf0] }
 0x4af   : > { %3642 = vmatmul.bf16.gmra.mxu3 %v4810_v7  ;;  %v4890_v7 = vor.u32 %v5404_v0, %v4887_v1 }
 0x4bc   : > { %3469 = vmatmul.bf16.gmra.mxu1 %v4818_v14  ;;  %3558 = vmatmul.bf16.gmra.mxu2 %v4822_v15  ;;  %v4895_v14 = vld [vmem:[%s6793_s27 + $0xf0] sm:$0xf0]  ;;  %v4901_v15 = vld [vmem:[%s6793_s27 + $0xe8] sm:$0xf] }
 0x4bd   : > { %v4898_v22 = vor.u32 %v5407_v13, %v4895_v14  ;;  %v4930_v13 = vor.u32 %v5415_v60, %v4927_v61  ;;  %v4934_v14 = vor.u32 %v5418_v63, %v4933_v62 }
 0x4bf   : > { %3647 = vmatmul.bf16.gmra.mxu3 %v4826_v16  ;;  %v5410_v16 = vld [vmem:[%s6793_s27 + $0xf4] sm:$0xf0] }
 0x4c0   : > { %v4902_v23 = vor.u32 %v5410_v16, %v4901_v15 }
 0x4cc   : > { %3474 = vmatmul.bf16.gmra.mxu1 %v4834_v24  ;;  %3563 = vmatmul.bf16.gmra.mxu2 %v4838_v25  ;;  %v4906_v25 = vor.u32 %v5408_v17, %v4903_v19 }
 0x4cf   : > { %3652 = vmatmul.bf16.gmra.mxu3 %v4842_v26 }
 0x4d9   : > { %v6857_v36 = vpop.f32.mrf.mxu1 }
 0x4db   : > { %v3371_v26 = vpop.f32.mrf.mxu0 }
 0x4dc   : > { %3479 = vmatmul.bf16.gmra.mxu1 %v4850_v34  ;;  %3568 = vmatmul.bf16.gmra.mxu2 %v4854_v35  ;;  %v5412_v34 = vld [vmem:[%s6793_s27 + $0x10c] sm:$0xf]  ;;  %v4919_v35 = vld [vmem:[%s6793_s27 + $0x118] sm:$0xf0]  ;;  %v3372_v47 = vadd.f32 %v6932_v46, %v3371_v26 }
 0x4dd   : > { %v4922_v45 = vor.u32 %v5412_v34, %v4919_v35  ;;  %v5419_v34 = vld [vmem:[%s6793_s27 + $0x144] sm:$0xf]  ;;  %v4943_v35 = vld [vmem:[%s6793_s27 + $0x150] sm:$0xf0] }
 0x4df   : > { %3657 = vmatmul.bf16.gmra.mxu3 %v4858_v37  ;;  %v6859_v39 = vpop.f32.mrf.mxu2 }
 0x4e1   : > { %v6863_v41 = vpop.f32.mrf.mxu1 }
 0x4e2   : > { %v6861_v40 = vpop.f32.mrf.mxu3 }
 0x4e3   : > { %v3373_v18 = vpop.f32.mrf.mxu0 }
 0x4e4   : > { %v3374_v59 = vadd.f32 %v6932_v46, %v3373_v18 }
 0x4e7   : > { %v6871_v49 = vpop.f32.mrf.mxu2 }
 0x4e9   : > { %v6875_v53 = vpop.f32.mrf.mxu1 }
 0x4ea   : > { %v6873_v50 = vpop.f32.mrf.mxu3 }
 0x4ec   : > { %3484 = vmatmul.bf16.gmra.mxu1 %v4866_v51  ;;  %3573 = vmatmul.bf16.gmra.mxu2 %v4870_v52  ;;  %v3376_v51 = vpop.f32.mrf.mxu0 }
 0x4ef   : > { %3662 = vmatmul.bf16.gmra.mxu3 %v4874_v54  ;;  %v6877_v56 = vpop.f32.mrf.mxu2 }
 0x4f1   : > { %v6881_v58 = vpop.f32.mrf.mxu1 }
 0x4f2   : > { %v6879_v57 = vpop.f32.mrf.mxu3 }
 0x4f4   : > { %v3378_v16 = vpop.f32.mrf.mxu0 }
 0x4f5   : > { %v3379_v33 = vadd.f32 %v6932_v46, %v3378_v16  ;;  %v4965_v16 = vld [vmem:[%s6793_s27 + $0x168] sm:$0xf] }
 0x4f7   : > { %v6889_v2 = vpop.f32.mrf.mxu2 }
 0x4f9   : > { %v6893_v6 = vpop.f32.mrf.mxu1 }
 0x4fa   : > { %v6891_v3 = vpop.f32.mrf.mxu3 }
 0x4fc   : > { %3489 = vmatmul.bf16.gmra.mxu1 %v4882_v4  ;;  %3578 = vmatmul.bf16.gmra.mxu2 %v4886_v5  ;;  %v5416_v4 = vld [vmem:[%s6793_s27 + $0x12c] sm:$0xf]  ;;  %v4935_v5 = vld [vmem:[%s6793_s27 + $0x138] sm:$0xf0]  ;;  %v3381_v32 = vpop.f32.mrf.mxu0 }
 0x4fd   : > { %v4938_v17 = vor.u32 %v5416_v4, %v4935_v5  ;;  %v3382_v4 = vadd.f32 %v6932_v46, %v3381_v32 }
 0x4ff   : > { %3667 = vmatmul.bf16.gmra.mxu3 %v4890_v7  ;;  %v6895_v9 = vpop.f32.mrf.mxu2 }
 0x501   : > { %v6899_v11 = vpop.f32.mrf.mxu1 }
 0x502   : > { %v6897_v10 = vpop.f32.mrf.mxu3 }
 0x507   : > { %v6907_v20 = vpop.f32.mrf.mxu2 }
 0x509   : > { %v6911_v24 = vpop.f32.mrf.mxu1 }
 0x50a   : > { %v6909_v21 = vpop.f32.mrf.mxu3 }
 0x50c   : > { %3494 = vmatmul.bf16.gmra.mxu1 %v4898_v22  ;;  %3583 = vmatmul.bf16.gmra.mxu2 %v4902_v23 }
 0x50f   : > { %3672 = vmatmul.bf16.gmra.mxu3 %v4906_v25  ;;  %v6913_v27 = vpop.f32.mrf.mxu2  ;;  %v3377_v25 = vadd.f32 %v6932_v46, %v3376_v51  ;;  %v4946_v51 = vor.u32 %v5419_v34, %v4943_v35 }
 0x511   : > { %v6917_v29 = vpop.f32.mrf.mxu1 }
 0x512   : > { %v6915_v28 = vpop.f32.mrf.mxu3 }
 0x517   : > { %v6925_v37 = vpop.f32.mrf.mxu2 }
 0x519   : > { %v3460_v44 = vpop.f32.mrf.mxu1 }
 0x51a   : > { %v6927_v38 = vpop.f32.mrf.mxu3  ;;  %v3461_v55 = vadd.f32 %v3460_v44, %v3372_v47  ;;  %v5420_v47 = vld [vmem:[%s6793_s27 + $0x14c] sm:$0xf] }
 0x51c   : > { %3499 = vmatmul.bf16.gmra.mxu1 %v4914_v42  ;;  %3588 = vmatmul.bf16.gmra.mxu2 %v4918_v43  ;;  %v4949_v42 = vld [vmem:[%s6793_s27 + $0x148] sm:$0xf]  ;;  %v5422_v43 = vld [vmem:[%s6793_s27 + $0x154] sm:$0xf0] }
 0x51f   : > { %3677 = vmatmul.bf16.gmra.mxu3 %v4922_v45  ;;  %v3549_v48 = vpop.f32.mrf.mxu2 }
 0x520   : > { %v3550_v0 = vadd.f32 %v3549_v48, %v3461_v55  ;;  %v4951_v48 = vld [vmem:[%s6793_s27 + $0x158] sm:$0xf0] }
 0x521   : > { %v3462_v54 = vpop.f32.mrf.mxu1  ;;  %v4954_v61 = vor.u32 %v5420_v47, %v4951_v48 }
 0x522   : > { %v3638_v52 = vpop.f32.mrf.mxu3  ;;  %v3463_v1 = vadd.f32 %v3462_v54, %v3374_v59  ;;  %v4950_v59 = vor.u32 %v5422_v43, %v4949_v42 }
 0x523   : > { %v3639_v19 = vadd.f32 %v3638_v52, %v3550_v0 }
 0x527   : > { %v3551_v7 = vpop.f32.mrf.mxu2 }
 0x528   : > { %v3552_v8 = vadd.f32 %v3551_v7, %v3463_v1  ;;  %v3383_v1 = vpop.f32.mrf.mxu0 }
 0x529   : > { %v3465_v15 = vpop.f32.mrf.mxu1 }
 0x52a   : > { %v3640_v12 = vpop.f32.mrf.mxu3  ;;  %v3466_v31 = vadd.f32 %v3465_v15, %v3377_v25  ;;  %v4959_v15 = vld [vmem:[%s6793_s27 + $0x170] sm:$0xf0]  ;;  %v4967_v25 = vld [vmem:[%s6793_s27 + $0x178] sm:$0xf0] }
 0x52b   : > { %v3641_v22 = vadd.f32 %v3640_v12, %v3552_v8 }
 0x52c   : > { %3504 = vmatmul.bf16.gmra.mxu1 %v4930_v13  ;;  %3593 = vmatmul.bf16.gmra.mxu2 %v4934_v14  ;;  %v3384_v13 = vadd.f32 %v6932_v46, %v3383_v1  ;;  %v5423_v14 = vld [vmem:[%s6793_s27 + $0x164] sm:$0xf]  ;;  %v5428_v1 = vld [vmem:[%s6793_s27 + $0x18c] sm:$0xf] }
 0x52d   : > { %v3718_v23 = vpack.c.bf16 %v3641_v22, %v3639_v19  ;;  %v4962_v32 = vor.u32 %v5423_v14, %v4959_v15 }
 0x52f   : > { %3682 = vmatmul.bf16.gmra.mxu3 %v4938_v17  ;;  %3810 = vmatmul.bf16.vlgmr.msrb.gmra.mxu0 %v3718_v23  ;;  %v3554_v26 = vpop.f32.mrf.mxu2  ;;  %v5426_v17 = vld [vmem:[%s6793_s27 + $0x174] sm:$0xf0]  ;;  %v5424_v23 = vld [vmem:[%s6793_s27 + $0x16c] sm:$0xf] }
 0x530   : > { %v3555_v44 = vadd.f32 %v3554_v26, %v3466_v31  ;;  %v3386_v26 = vpop.f32.mrf.mxu0  ;;  %v4970_v35 = vor.u32 %v5424_v23, %v4967_v25 }
 0x531   : > { %v3467_v18 = vpop.f32.mrf.mxu1 }
 0x532   : > { %v3643_v30 = vpop.f32.mrf.mxu3  ;;  %v3468_v45 = vadd.f32 %v3467_v18, %v3379_v33  ;;  %v4966_v33 = vor.u32 %v5426_v17, %v4965_v16 }
 0x533   : > { %v3644_v62 = vadd.f32 %v3643_v30, %v3555_v44 }
 0x537   : > { %v3556_v52 = vpop.f32.mrf.mxu2 }
 0x538   : > { %v3557_v54 = vadd.f32 %v3556_v52, %v3468_v45  ;;  %v3387_v45 = vadd.f32 %v6932_v46, %v3386_v26  ;;  %v3388_v52 = vpop.f32.mrf.mxu0  ;;  %v3392_v26 = vadd.f32 %v6932_v46, %v6857_v36 }
 0x539   : > { %v3470_v60 = vpop.f32.mrf.mxu1 }
 0x53a   : > { %v3645_v55 = vpop.f32.mrf.mxu3  ;;  %v3471_v12 = vadd.f32 %v3470_v60, %v3382_v4  ;;  %v4975_v60 = vld [vmem:[%s6793_s27 + $0x190] sm:$0xf0]  ;;  %v4983_v4 = vld [vmem:[%s6793_s27 + $0x198] sm:$0xf0] }
 0x53b   : > { %v3646_v63 = vadd.f32 %v3645_v55, %v3557_v54  ;;  %v4986_v15 = vor.u32 %v5428_v1, %v4983_v4  ;;  %v5435_v4 = vld [vmem:[%s6793_s27 + $0x1c4] sm:$0xf] }
 0x53c   : > { %3509 = vmatmul.bf16.gmra.mxu1 %v4946_v51  ;;  %3598 = vmatmul.bf16.gmra.mxu2 %v4950_v59  ;;  %v3389_v51 = vadd.f32 %v6932_v46, %v3388_v52  ;;  %v5427_v59 = vld [vmem:[%s6793_s27 + $0x184] sm:$0xf] }
 0x53d   : > { %v3719_v0 = vpack.c.bf16 %v3646_v63, %v3644_v62  ;;  %v5430_v62 = vld [vmem:[%s6793_s27 + $0x194] sm:$0xf0] }
 0x53f   : > { %3687 = vmatmul.bf16.gmra.mxu3 %v4954_v61  ;;  %3815 = vmatmul.bf16.gmra.mxu0 %v3719_v0  ;;  %v3559_v5 = vpop.f32.mrf.mxu2  ;;  %v4981_v61 = vld [vmem:[%s6793_s27 + $0x188] sm:$0xf] }
 0x540   : > { %v3560_v19 = vadd.f32 %v3559_v5, %v3471_v12  ;;  %v4978_v12 = vor.u32 %v5427_v59, %v4975_v60 }
 0x541   : > { %v3472_v8 = vpop.f32.mrf.mxu1 }
 0x542   : > { %v3648_v7 = vpop.f32.mrf.mxu3  ;;  %v3473_v22 = vadd.f32 %v3472_v8, %v3384_v13  ;;  %v4982_v13 = vor.u32 %v5430_v62, %v4981_v61 }
 0x543   : > { %v3649_v42 = vadd.f32 %v3648_v7, %v3560_v19 }
 0x547   : > { %v3561_v30 = vpop.f32.mrf.mxu2 }
 0x548   : > { %v3562_v18 = vadd.f32 %v3561_v30, %v3473_v22  ;;  %v3394_v30 = vadd.f32 %v6932_v46, %v6863_v41 }
 0x549   : > { %v3475_v34 = vpop.f32.mrf.mxu1 }
 0x54a   : > { %v3650_v31 = vpop.f32.mrf.mxu3  ;;  %v3476_v55 = vadd.f32 %v3475_v34, %v3387_v45  ;;  %v5434_v34 = vld [vmem:[%s6793_s27 + $0x1b4] sm:$0xf0] }
 0x54b   : > { %v3651_v43 = vadd.f32 %v3650_v31, %v3562_v18  ;;  %v5431_v31 = vld [vmem:[%s6793_s27 + $0x1a4] sm:$0xf] }
 0x54c   : > { %3514 = vmatmul.bf16.gmra.mxu1 %v4962_v32  ;;  %3603 = vmatmul.bf16.gmra.mxu2 %v4966_v33  ;;  %v4991_v32 = vld [vmem:[%s6793_s27 + $0x1b0] sm:$0xf0]  ;;  %v4997_v33 = vld [vmem:[%s6793_s27 + $0x1a8] sm:$0xf] }
 0x54d   : > { %v3720_v44 = vpack.c.bf16 %v3651_v43, %v3649_v42  ;;  %v5432_v43 = vld [vmem:[%s6793_s27 + $0x1ac] sm:$0xf]  ;;  %v4994_v52 = vor.u32 %v5431_v31, %v4991_v32 }
 0x54f   : > { %3692 = vmatmul.bf16.gmra.mxu3 %v4970_v35  ;;  %3820 = vmatmul.bf16.gmra.mxu0 %v3720_v44  ;;  %v3564_v47 = vpop.f32.mrf.mxu2  ;;  %v4999_v44 = vld [vmem:[%s6793_s27 + $0x1b8] sm:$0xf0] }
 0x550   : > { %v3565_v63 = vadd.f32 %v3564_v47, %v3476_v55  ;;  %v5002_v36 = vor.u32 %v5432_v43, %v4999_v44  ;;  %v5023_v43 = vld [vmem:[%s6793_s27 + $0x1f0] sm:$0xf0]  ;;  %v5029_v44 = vld [vmem:[%s6793_s27 + $0x1e8] sm:$0xf] }
 0x551   : > { %v3477_v54 = vpop.f32.mrf.mxu1 }
 0x552   : > { %v3653_v48 = vpop.f32.mrf.mxu3  ;;  %v3478_v0 = vadd.f32 %v3477_v54, %v3389_v51  ;;  %v4998_v54 = vor.u32 %v5434_v34, %v4997_v33  ;;  %v3402_v33 = vadd.f32 %v6932_v46, %v6893_v6  ;;  %v3404_v34 = vadd.f32 %v6932_v46, %v6899_v11 }
 0x553   : > { %v3654_v16 = vadd.f32 %v3653_v48, %v3565_v63  ;;  %v3397_v63 = vadd.f32 %v6932_v46, %v6875_v53 }
 0x557   : > { %v3566_v5 = vpop.f32.mrf.mxu2 }
 0x558   : > { %v3567_v7 = vadd.f32 %v3566_v5, %v3478_v0  ;;  %v3399_v0 = vadd.f32 %v6932_v46, %v6881_v58  ;;  %v5007_v5 = vld [vmem:[%s6793_s27 + $0x1d0] sm:$0xf0] }
 0x559   : > { %v3480_v14 = vpop.f32.mrf.mxu1 }
 0x55a   : > { %v3655_v8 = vpop.f32.mrf.mxu3  ;;  %v3481_v18 = vadd.f32 %v3480_v14, %v3392_v26  ;;  %v5436_v14 = vld [vmem:[%s6793_s27 + $0x1cc] sm:$0xf] }
 0x55b   : > { %v3656_v17 = vadd.f32 %v3655_v8, %v3567_v7  ;;  %v5013_v7 = vld [vmem:[%s6793_s27 + $0x1c8] sm:$0xf]  ;;  %v5438_v8 = vld [vmem:[%s6793_s27 + $0x1d4] sm:$0xf0] }
 0x55c   : > { %3519 = vmatmul.bf16.gmra.mxu1 %v4978_v12  ;;  %3608 = vmatmul.bf16.gmra.mxu2 %v4982_v13 }
 0x55d   : > { %v3721_v19 = vpack.c.bf16 %v3656_v17, %v3654_v16 }
 0x55f   : > { %3697 = vmatmul.bf16.gmra.mxu3 %v4986_v15  ;;  %3825 = vmatmul.bf16.gmra.mxu0 %v3721_v19  ;;  %v3569_v22 = vpop.f32.mrf.mxu2  ;;  %v5015_v15 = vld [vmem:[%s6793_s27 + $0x1d8] sm:$0xf0] }
 0x560   : > { %v3570_v35 = vadd.f32 %v3569_v22, %v3481_v18  ;;  %v5010_v22 = vor.u32 %v5435_v4, %v5007_v5  ;;  %v5018_v53 = vor.u32 %v5436_v14, %v5015_v15  ;;  %v3407_v4 = vadd.f32 %v6932_v46, %v6911_v24 }
 0x561   : > { %v3482_v25 = vpop.f32.mrf.mxu1  ;;  %v3409_v5 = vadd.f32 %v6932_v46, %v6917_v29  ;;  %v3412_v24 = vadd.f32 %v6932_v46, %v6859_v39  ;;  %v3414_v29 = vadd.f32 %v6932_v46, %v6871_v49 }
 0x562   : > { %v3658_v23 = vpop.f32.mrf.mxu3  ;;  %v3483_v42 = vadd.f32 %v3482_v25, %v3394_v30 }
 0x563   : > { %v3659_v41 = vadd.f32 %v3658_v23, %v3570_v35  ;;  %v5014_v23 = vor.u32 %v5438_v8, %v5013_v7 }
 0x567   : > { %v3571_v45 = vpop.f32.mrf.mxu2 }
 0x568   : > { %v3572_v47 = vadd.f32 %v3571_v45, %v3483_v42  ;;  %v5439_v42 = vld [vmem:[%s6793_s27 + $0x1e4] sm:$0xf]  ;;  %v5442_v45 = vld [vmem:[%s6793_s27 + $0x1f4] sm:$0xf0] }
 0x569   : > { %v3485_v55 = vpop.f32.mrf.mxu1 }
 0x56a   : > { %v3660_v48 = vpop.f32.mrf.mxu3  ;;  %v3486_v1 = vadd.f32 %v3485_v55, %v3397_v63 }
 0x56b   : > { %v3661_v51 = vadd.f32 %v3660_v48, %v3572_v47 }
 0x56c   : > { %3524 = vmatmul.bf16.gmra.mxu1 %v4994_v52  ;;  %3613 = vmatmul.bf16.gmra.mxu2 %v4998_v54  ;;  %v5440_v52 = vld [vmem:[%s6793_s27 + $0x1ec] sm:$0xf]  ;;  %v5031_v54 = vld [vmem:[%s6793_s27 + $0x1f8] sm:$0xf0] }
 0x56d   : > { %v3722_v59 = vpack.c.bf16 %v3661_v51, %v3659_v41  ;;  %v5026_v51 = vor.u32 %v5439_v42, %v5023_v43 }
 0x56f   : > { %3702 = vmatmul.bf16.gmra.mxu3 %v5002_v36  ;;  %3830 = vmatmul.bf16.gmra.mxu0 %v3722_v59  ;;  %v3574_v60 = vpop.f32.mrf.mxu2  ;;  %v5030_v59 = vor.u32 %v5442_v45, %v5029_v44 }
 0x570   : > { %v3575_v12 = vadd.f32 %v3574_v60, %v3486_v1 }
 0x571   : > { %v3487_v62 = vpop.f32.mrf.mxu1 }
 0x572   : > { %v3663_v61 = vpop.f32.mrf.mxu3  ;;  %v3488_v13 = vadd.f32 %v3487_v62, %v3399_v0 }
 0x573   : > { %v3664_v58 = vadd.f32 %v3663_v61, %v3575_v12  ;;  %v5034_v61 = vor.u32 %v5440_v52, %v5031_v54  ;;  %v3419_v54 = vadd.f32 %v6932_v46, %v6889_v2 }
 0x577   : > { %v3576_v16 = vpop.f32.mrf.mxu2 }
 0x578   : > { %v3577_v17 = vadd.f32 %v3576_v16, %v3488_v13 }
 0x579   : > { %v3490_v25 = vpop.f32.mrf.mxu1 }
 0x57a   : > { %v3665_v19 = vpop.f32.mrf.mxu3  ;;  %v3491_v35 = vadd.f32 %v3490_v25, %v3402_v33  ;;  %v7007_v33 = vld [vmem:[%s7154_s7] ss:$0 sm:$0xff] }
 0x57b   : > { %v3666_v26 = vadd.f32 %v3665_v19, %v3577_v17 }
 0x57c   : > { %3529 = vmatmul.bf16.gmra.mxu1 %v5010_v22  ;;  %3618 = vmatmul.bf16.gmra.mxu2 %v5014_v23 }
 0x57d   : > { %v3723_v30 = vpack.c.bf16 %v3666_v26, %v3664_v58 }
 0x57f   : > { %3707 = vmatmul.bf16.gmra.mxu3 %v5018_v53  ;;  %3835 = vmatmul.bf16.gmra.mxu0 %v3723_v30  ;;  %v3579_v18 = vpop.f32.mrf.mxu2 }
 0x580   : > { %v3580_v47 = vadd.f32 %v3579_v18, %v3491_v35 }
 0x581   : > { %v3492_v32 = vpop.f32.mrf.mxu1 }
 0x582   : > { %v3668_v31 = vpop.f32.mrf.mxu3  ;;  %v3493_v48 = vadd.f32 %v3492_v32, %v3404_v34 }
 0x583   : > { %v3669_v6 = vadd.f32 %v3668_v31, %v3580_v47 }
 0x587   : > { %v3581_v55 = vpop.f32.mrf.mxu2 }
 0x588   : > { %v3582_v36 = vadd.f32 %v3581_v55, %v3493_v48  ;;  %v3417_v48 = vadd.f32 %v6932_v46, %v6877_v56 }
 0x589   : > { %v3495_v60 = vpop.f32.mrf.mxu1 }
 0x58a   : > { %v3670_v41 = vpop.f32.mrf.mxu3  ;;  %v3496_v7 = vadd.f32 %v3495_v60, %v3407_v4 }
 0x58b   : > { %v3671_v62 = vadd.f32 %v3670_v41, %v3582_v36 }
 0x58c   : > { %3534 = vmatmul.bf16.gmra.mxu1 %v5026_v51  ;;  %3623 = vmatmul.bf16.gmra.mxu2 %v5030_v59 }
 0x58d   : > { %v3724_v11 = vpack.c.bf16 %v3671_v62, %v3669_v6 }
 0x58f   : > { %3712 = vmatmul.bf16.gmra.mxu3 %v5034_v61  ;;  %3840 = vmatmul.bf16.gmra.mxu0 %v3724_v11  ;;  %v3584_v63 = vpop.f32.mrf.mxu2 }
 0x590   : > { %v3585_v8 = vadd.f32 %v3584_v63, %v3496_v7 }
 0x591   : > { %v3497_v1 = vpop.f32.mrf.mxu1 }
 0x592   : > { %v3673_v0 = vpop.f32.mrf.mxu3  ;;  %v3498_v12 = vadd.f32 %v3497_v1, %v3409_v5  ;;  %v3422_v5 = vadd.f32 %v6932_v46, %v6895_v9 }
 0x593   : > { %v3674_v17 = vadd.f32 %v3673_v0, %v3585_v8  ;;  %v3424_v8 = vadd.f32 %v6932_v46, %v6907_v20 }
 0x597   : > { %v3586_v13 = vpop.f32.mrf.mxu2 }
 0x598   : > { %v3587_v14 = vadd.f32 %v3586_v13, %v3498_v12 }
 0x599   : > { %v3500_v16 = vpop.f32.mrf.mxu1 }
 0x59a   : > { %v3675_v15 = vpop.f32.mrf.mxu3  ;;  %v3501_v58 = vadd.f32 %v3500_v16, %v3412_v24 }
 0x59b   : > { %v3676_v19 = vadd.f32 %v3675_v15, %v3587_v14 }
 0x59d   : > { %v3725_v22 = vpack.c.bf16 %v3676_v19, %v3674_v17 }
 0x59f   : > { %3845 = vmatmul.bf16.gmra.mxu0 %v3725_v22  ;;  %v3589_v23 = vpop.f32.mrf.mxu2 }
 0x5a0   : > { %v3590_v26 = vadd.f32 %v3589_v23, %v3501_v58 }
 0x5a1   : > { %v3502_v53 = vpop.f32.mrf.mxu1 }
 0x5a2   : > { %v3678_v25 = vpop.f32.mrf.mxu3  ;;  %v3503_v30 = vadd.f32 %v3502_v53, %v3414_v29 }
 0x5a3   : > { %v3679_v35 = vadd.f32 %v3678_v25, %v3590_v26  ;;  %v3427_v26 = vadd.f32 %v6932_v46, %v6913_v27 }
 0x5a7   : > { %v3591_v18 = vpop.f32.mrf.mxu2 }
 0x5a8   : > { %v3592_v31 = vadd.f32 %v3591_v18, %v3503_v30  ;;  %v3429_v18 = vadd.f32 %v6932_v46, %v6925_v37 }
 0x5a9   : > { %v3505_v34 = vpop.f32.mrf.mxu1 }
 0x5aa   : > { %v3680_v32 = vpop.f32.mrf.mxu3  ;;  %v3506_v55 = vadd.f32 %v3505_v34, %v3417_v48 }
 0x5ab   : > { %v3681_v42 = vadd.f32 %v3680_v32, %v3592_v31 }
 0x5ac   : > { %v3811_v43 = vpop.f32.mrf.mxu0 }
 0x5ad   : > { %v3726_v39 = vpack.c.bf16 %v3681_v42, %v3679_v35  ;;  %v3812_v44 = vadd.f32 %v7007_v33, %v3811_v43 }
 0x5af   : > { %3891 = vst [vmem:[%s6589_s29] sm:$0xff] %v3812_v44  ;;  %3850 = vmatmul.bf16.gmra.mxu0 %v3726_v39  ;;  %v3594_v49 = vpop.f32.mrf.mxu2 }
 0x5b0   : > { %v3595_v41 = vadd.f32 %v3594_v49, %v3506_v55  ;;  %v3432_v55 = vadd.f32 %v6932_v46, %v6861_v40 }
 0x5b1   : > { %v3507_v47 = vpop.f32.mrf.mxu1 }
 0x5b2   : > { %v3683_v45 = vpop.f32.mrf.mxu3  ;;  %v3508_v51 = vadd.f32 %v3507_v47, %v3419_v54 }
 0x5b3   : > { %v3684_v62 = vadd.f32 %v3683_v45, %v3595_v41  ;;  %v3434_v41 = vadd.f32 %v6932_v46, %v6873_v50 }
 0x5b4   : > { %v3813_v52 = vpop.f32.mrf.mxu0 }
 0x5b5   : > { %v3814_v36 = vadd.f32 %v7007_v33, %v3813_v52 }
 0x5b7   : > { %3892 = vst [vmem:[%s6589_s29 + $0x8] sm:$0xff] %v3814_v36  ;;  %v3596_v59 = vpop.f32.mrf.mxu2 }
 0x5b8   : > { %v3597_v60 = vadd.f32 %v3596_v59, %v3508_v51 }
 0x5b9   : > { %v3510_v6 = vpop.f32.mrf.mxu1 }
 0x5ba   : > { %v3685_v61 = vpop.f32.mrf.mxu3  ;;  %v3511_v12 = vadd.f32 %v3510_v6, %v3422_v5 }
 0x5bb   : > { %v3686_v11 = vadd.f32 %v3685_v61, %v3597_v60 }
 0x5bc   : > { %v3816_v63 = vpop.f32.mrf.mxu0 }
 0x5bd   : > { %v3727_v56 = vpack.c.bf16 %v3686_v11, %v3684_v62  ;;  %v3817_v0 = vadd.f32 %v7007_v33, %v3816_v63 }
 0x5bf   : > { %3893 = vst [vmem:[%s6589_s29 + $0x10] sm:$0xff] %v3817_v0  ;;  %3855 = vmatmul.bf16.gmra.mxu0 %v3727_v56  ;;  %v3599_v2 = vpop.f32.mrf.mxu2 }
 0x5c0   : > { %v3600_v14 = vadd.f32 %v3599_v2, %v3511_v12  ;;  %v3439_v12 = vadd.f32 %v6932_v46, %v6891_v3 }
 0x5c1   : > { %v3512_v4 = vpop.f32.mrf.mxu1 }
 0x5c2   : > { %v3688_v1 = vpop.f32.mrf.mxu3  ;;  %v3513_v15 = vadd.f32 %v3512_v4, %v3424_v8 }
 0x5c3   : > { %v3689_v23 = vadd.f32 %v3688_v1, %v3600_v14 }
 0x5c4   : > { %v3818_v7 = vpop.f32.mrf.mxu0 }
 0x5c5   : > { %v3819_v13 = vadd.f32 %v7007_v33, %v3818_v7  ;;  %v3437_v7 = vadd.f32 %v6932_v46, %v6879_v57 }
 0x5c7   : > { %3894 = vst [vmem:[%s6589_s29 + $0x18] sm:$0xff] %v3819_v13  ;;  %v3601_v16 = vpop.f32.mrf.mxu2 }
 0x5c8   : > { %v3602_v17 = vadd.f32 %v3601_v16, %v3513_v15 }
 0x5c9   : > { %v3515_v22 = vpop.f32.mrf.mxu1 }
 0x5ca   : > { %v3690_v19 = vpop.f32.mrf.mxu3  ;;  %v3516_v31 = vadd.f32 %v3515_v22, %v3427_v26 }
 0x5cb   : > { %v3691_v25 = vadd.f32 %v3690_v19, %v3602_v17 }
 0x5cc   : > { %v3821_v53 = vpop.f32.mrf.mxu0 }
 0x5cd   : > { %v3728_v9 = vpack.c.bf16 %v3691_v25, %v3689_v23  ;;  %v3822_v24 = vadd.f32 %v7007_v33, %v3821_v53 }
 0x5cf   : > { %3895 = vst [vmem:[%s6589_s29 + $0x20] sm:$0xff] %v3822_v24  ;;  %3860 = vmatmul.bf16.gmra.mxu0 %v3728_v9  ;;  %v3604_v20 = vpop.f32.mrf.mxu2 }
 0x5d0   : > { %v3605_v34 = vadd.f32 %v3604_v20, %v3516_v31 }
 0x5d1   : > { %v3517_v58 = vpop.f32.mrf.mxu1 }
 0x5d2   : > { %v3693_v29 = vpop.f32.mrf.mxu3  ;;  %v3518_v35 = vadd.f32 %v3517_v58, %v3429_v18  ;;  %v3442_v58 = vadd.f32 %v6932_v46, %v6897_v10 }
 0x5d3   : > { %v3694_v49 = vadd.f32 %v3693_v29, %v3605_v34 }
 0x5d4   : > { %v3823_v30 = vpop.f32.mrf.mxu0 }
 0x5d5   : > { %v3824_v32 = vadd.f32 %v7007_v33, %v3823_v30  ;;  %v3444_v30 = vadd.f32 %v6932_v46, %v6909_v21 }
 0x5d7   : > { %3896 = vst [vmem:[%s6589_s29 + $0x28] sm:$0xff] %v3824_v32  ;;  %v3606_v42 = vpop.f32.mrf.mxu2 }
 0x5d8   : > { %v3607_v43 = vadd.f32 %v3606_v42, %v3518_v35 }
 0x5d9   : > { %v3520_v44 = vpop.f32.mrf.mxu1 }
 0x5da   : > { %v3695_v39 = vpop.f32.mrf.mxu3  ;;  %v3521_v51 = vadd.f32 %v3520_v44, %v3432_v55 }
 0x5db   : > { %v3696_v45 = vadd.f32 %v3695_v39, %v3607_v43 }
 0x5dc   : > { %v3826_v47 = vpop.f32.mrf.mxu0 }
 0x5dd   : > { %v3729_v27 = vpack.c.bf16 %v3696_v45, %v3694_v49  ;;  %v3827_v48 = vadd.f32 %v7007_v33, %v3826_v47 }
 0x5df   : > { %3897 = vst [vmem:[%s6589_s29 + $0x30] sm:$0xff] %v3827_v48  ;;  %3865 = vmatmul.bf16.gmra.mxu0 %v3729_v27  ;;  %v3609_v37 = vpop.f32.mrf.mxu2  ;;  %v3447_v48 = vadd.f32 %v6932_v46, %v6915_v28 }
 0x5e0   : > { %v3610_v60 = vadd.f32 %v3609_v37, %v3521_v51 }
 0x5e1   : > { %v3522_v54 = vpop.f32.mrf.mxu1 }
 0x5e2   : > { %v3698_v52 = vpop.f32.mrf.mxu3  ;;  %v3523_v61 = vadd.f32 %v3522_v54, %v3434_v41  ;;  %v3449_v54 = vadd.f32 %v6932_v46, %v6927_v38 }
 0x5e3   : > { %v3699_v56 = vadd.f32 %v3698_v52, %v3610_v60 }
 0x5e4   : > { %v3828_v36 = vpop.f32.mrf.mxu0 }
 0x5e5   : > { %v3829_v59 = vadd.f32 %v7007_v33, %v3828_v36 }
 0x5e7   : > { %3898 = vst [vmem:[%s6589_s29 + $0x38] sm:$0xff] %v3829_v59  ;;  %v3611_v6 = vpop.f32.mrf.mxu2 }
 0x5e8   : > { %v3612_v62 = vadd.f32 %v3611_v6, %v3523_v61 }
 0x5e9   : > { %v3525_v63 = vpop.f32.mrf.mxu1 }
 0x5ea   : > { %v3700_v11 = vpop.f32.mrf.mxu3  ;;  %v3526_v13 = vadd.f32 %v3525_v63, %v3437_v7 }
 0x5eb   : > { %v3701_v0 = vadd.f32 %v3700_v11, %v3612_v62 }
 0x5ec   : > { %v3831_v2 = vpop.f32.mrf.mxu0 }
 0x5ed   : > { %v3730_v40 = vpack.c.bf16 %v3701_v0, %v3699_v56  ;;  %v3832_v1 = vadd.f32 %v7007_v33, %v3831_v2 }
 0x5ef   : > { %3899 = vst [vmem:[%s6589_s29 + $0x40] sm:$0xff] %v3832_v1  ;;  %3870 = vmatmul.bf16.gmra.mxu0 %v3730_v40  ;;  %v3614_v50 = vpop.f32.mrf.mxu2 }
 0x5f0   : > { %v3615_v15 = vadd.f32 %v3614_v50, %v3526_v13 }
 0x5f1   : > { %v3527_v5 = vpop.f32.mrf.mxu1 }
 0x5f2   : > { %v3703_v4 = vpop.f32.mrf.mxu3  ;;  %v3528_v16 = vadd.f32 %v3527_v5, %v3439_v12 }
 0x5f3   : > { %v3704_v25 = vadd.f32 %v3703_v4, %v3615_v15 }
 0x5f4   : > { %v3833_v8 = vpop.f32.mrf.mxu0 }
 0x5f5   : > { %v3834_v14 = vadd.f32 %v7007_v33, %v3833_v8 }
 0x5f7   : > { %3900 = vst [vmem:[%s6589_s29 + $0x48] sm:$0xff] %v3834_v14  ;;  %v3616_v17 = vpop.f32.mrf.mxu2 }
 0x5f8   : > { %v3617_v19 = vadd.f32 %v3616_v17, %v3528_v16 }
 0x5f9   : > { %v3530_v23 = vpop.f32.mrf.mxu1 }
 0x5fa   : > { %v3705_v22 = vpop.f32.mrf.mxu3  ;;  %v3531_v18 = vadd.f32 %v3530_v23, %v3442_v58 }
 0x5fb   : > { %v3706_v53 = vadd.f32 %v3705_v22, %v3617_v19 }
 0x5fc   : > { %v3836_v9 = vpop.f32.mrf.mxu0 }
 0x5fd   : > { %v3731_v57 = vpack.c.bf16 %v3706_v53, %v3704_v25  ;;  %v3837_v24 = vadd.f32 %v7007_v33, %v3836_v9 }
 0x5ff   : > { %3901 = vst [vmem:[%s6589_s29 + $0x50] sm:$0xff] %v3837_v24  ;;  %3875 = vmatmul.bf16.gmra.mxu0 %v3731_v57  ;;  %v3619_v3 = vpop.f32.mrf.mxu2 }
 0x600   : > { %v3620_v32 = vadd.f32 %v3619_v3, %v3531_v18 }
 0x601   : > { %v3532_v29 = vpop.f32.mrf.mxu1 }
 0x602   : > { %v3708_v20 = vpop.f32.mrf.mxu3  ;;  %v3533_v34 = vadd.f32 %v3532_v29, %v3444_v30 }
 0x603   : > { %v3709_v44 = vadd.f32 %v3708_v20, %v3620_v32 }
 0x604   : > { %v3838_v26 = vpop.f32.mrf.mxu0 }
 0x605   : > { %v3839_v31 = vadd.f32 %v7007_v33, %v3838_v26 }
 0x607   : > { %3902 = vst [vmem:[%s6589_s29 + $0x58] sm:$0xff] %v3839_v31  ;;  %v3621_v35 = vpop.f32.mrf.mxu2 }
 0x608   : > { %v3622_v42 = vadd.f32 %v3621_v35, %v3533_v34 }
 0x609   : > { %v3535_v39 = vpop.f32.mrf.mxu1 }
 0x60a   : > { %v3710_v43 = vpop.f32.mrf.mxu3  ;;  %v3536_v55 = vadd.f32 %v3535_v39, %v3447_v48 }
 0x60b   : > { %v3711_v49 = vadd.f32 %v3710_v43, %v3622_v42 }
 0x60c   : > { %v3841_v45 = vpop.f32.mrf.mxu0 }
 0x60d   : > { %v3732_v10 = vpack.c.bf16 %v3711_v49, %v3709_v44  ;;  %v3842_v47 = vadd.f32 %v7007_v33, %v3841_v45 }
 0x60f   : > { %3903 = vst [vmem:[%s6589_s29 + $0x60] sm:$0xff] %v3842_v47  ;;  %3880 = vmatmul.bf16.gmra.mxu0 %v3732_v10  ;;  %v3624_v21 = vpop.f32.mrf.mxu2 }
 0x610   : > { %v3625_v41 = vadd.f32 %v3624_v21, %v3536_v55 }
 0x611   : > { %v3537_v37 = vpop.f32.mrf.mxu1 }
 0x612   : > { %v3713_v27 = vpop.f32.mrf.mxu3  ;;  %v3538_v51 = vadd.f32 %v3537_v37, %v3449_v54 }
 0x613   : > { %v3714_v6 = vadd.f32 %v3713_v27, %v3625_v41 }
 0x614   : > { %v3843_v52 = vpop.f32.mrf.mxu0 }
 0x615   : > { %v3844_v36 = vadd.f32 %v7007_v33, %v3843_v52 }
 0x617   : > { %3904 = vst [vmem:[%s6589_s29 + $0x68] sm:$0xff] %v3844_v36  ;;  %v3626_v59 = vpop.f32.mrf.mxu2 }
 0x618   : > { %v3627_v60 = vadd.f32 %v3626_v59, %v3538_v51 }
 0x61a   : > { %v3715_v61 = vpop.f32.mrf.mxu3 }
 0x61b   : > { %v3716_v28 = vadd.f32 %v3715_v61, %v3627_v60 }
 0x61c   : > { %v3846_v62 = vpop.f32.mrf.mxu0 }
 0x61d   : > { %v3733_v11 = vpack.c.bf16 %v3716_v28, %v3714_v6  ;;  %v3847_v63 = vadd.f32 %v7007_v33, %v3846_v62 }
 0x61f   : > { %3905 = vst [vmem:[%s6589_s29 + $0x70] sm:$0xff] %v3847_v63  ;;  %3885 = vmatmul.bf16.gmra.mxu0 %v3733_v11 }
 0x624   : > { %v3848_v38 = vpop.f32.mrf.mxu0 }
 0x625   : > { %v3849_v46 = vadd.f32 %v7007_v33, %v3848_v38 }
 0x627   : > { %3906 = vst [vmem:[%s6589_s29 + $0x78] sm:$0xff] %v3849_v46 }
 0x62c   : > { %v3851_v56 = vpop.f32.mrf.mxu0 }
 0x62d   : > { %v3852_v0 = vadd.f32 %v7007_v33, %v3851_v56 }
 0x62f   : > { %3907 = vst [vmem:[%s6589_s29 + $0x80] sm:$0xff] %v3852_v0 }
 0x634   : > { %v3853_v2 = vpop.f32.mrf.mxu0 }
 0x635   : > { %v3854_v40 = vadd.f32 %v7007_v33, %v3853_v2 }
 0x637   : > { %3908 = vst [vmem:[%s6589_s29 + $0x88] sm:$0xff] %v3854_v40 }
 0x63c   : > { %v3856_v1 = vpop.f32.mrf.mxu0 }
 0x63d   : > { %v3857_v50 = vadd.f32 %v7007_v33, %v3856_v1 }
 0x63f   : > { %3909 = vst [vmem:[%s6589_s29 + $0x90] sm:$0xff] %v3857_v50 }
 0x644   : > { %v3858_v4 = vpop.f32.mrf.mxu0 }
 0x645   : > { %v3859_v5 = vadd.f32 %v7007_v33, %v3858_v4 }
 0x647   : > { %3910 = vst [vmem:[%s6589_s29 + $0x98] sm:$0xff] %v3859_v5 }
 0x64c   : > { %v3861_v7 = vpop.f32.mrf.mxu0 }
 0x64d   : > { %v3862_v8 = vadd.f32 %v7007_v33, %v3861_v7 }
 0x64f   : > { %3911 = vst [vmem:[%s6589_s29 + $0xa0] sm:$0xff] %v3862_v8 }
 0x654   : > { %v3863_v12 = vpop.f32.mrf.mxu0 }
 0x655   : > { %v3864_v13 = vadd.f32 %v7007_v33, %v3863_v12 }
 0x657   : > { %3912 = vst [vmem:[%s6589_s29 + $0xa8] sm:$0xff] %v3864_v13 }
 0x65c   : > { %v3866_v14 = vpop.f32.mrf.mxu0 }
 0x65d   : > { %v3867_v15 = vadd.f32 %v7007_v33, %v3866_v14 }
 0x65f   : > { %3913 = vst [vmem:[%s6589_s29 + $0xb0] sm:$0xff] %v3867_v15 }
 0x664   : > { %v3868_v16 = vpop.f32.mrf.mxu0 }
 0x665   : > { %v3869_v17 = vadd.f32 %v7007_v33, %v3868_v16 }
 0x667   : > { %3914 = vst [vmem:[%s6589_s29 + $0xb8] sm:$0xff] %v3869_v17 }
 0x66c   : > { %v3871_v19 = vpop.f32.mrf.mxu0 }
 0x66d   : > { %v3872_v22 = vadd.f32 %v7007_v33, %v3871_v19 }
 0x66f   : > { %3915 = vst [vmem:[%s6589_s29 + $0xc0] sm:$0xff] %v3872_v22 }
 0x674   : > { %v3873_v23 = vpop.f32.mrf.mxu0 }
 0x675   : > { %v3874_v25 = vadd.f32 %v7007_v33, %v3873_v23 }
 0x677   : > { %3916 = vst [vmem:[%s6589_s29 + $0xc8] sm:$0xff] %v3874_v25 }
 0x67c   : > { %v3876_v53 = vpop.f32.mrf.mxu0 }
 0x67d   : > { %v3877_v9 = vadd.f32 %v7007_v33, %v3876_v53 }
 0x67f   : > { %3917 = vst [vmem:[%s6589_s29 + $0xd0] sm:$0xff] %v3877_v9 }
 0x684   : > { %v3878_v57 = vpop.f32.mrf.mxu0 }
 0x685   : > { %v3879_v24 = vadd.f32 %v7007_v33, %v3878_v57 }
 0x687   : > { %3918 = vst [vmem:[%s6589_s29 + $0xd8] sm:$0xff] %v3879_v24 }
 0x68c   : > { %v3881_v3 = vpop.f32.mrf.mxu0 }
 0x68d   : > { %v3882_v20 = vadd.f32 %v7007_v33, %v3881_v3 }
 0x68f   : > { %3919 = vst [vmem:[%s6589_s29 + $0xe0] sm:$0xff] %v3882_v20 }
 0x694   : > { %v3883_v29 = vpop.f32.mrf.mxu0 }
 0x695   : > { %v3884_v58 = vadd.f32 %v7007_v33, %v3883_v29 }
 0x697   : > { %3920 = vst [vmem:[%s6589_s29 + $0xe8] sm:$0xff] %v3884_v58 }
 0x69c   : > { %v3886_v26 = vpop.f32.mrf.mxu0 }
 0x69d   : > { %v3887_v30 = vadd.f32 %v7007_v33, %v3886_v26 }
 0x69f   : > { %3921 = vst [vmem:[%s6589_s29 + $0xf0] sm:$0xff] %v3887_v30 }
 0x6a4   : > { %v3888_v18 = vpop.f32.mrf.mxu0 }
 0x6a5   : > { %v3889_v31 = vadd.f32 %v7007_v33, %v3888_v18 }
 0x6a7   : > { %3922 = vst [vmem:[%s6589_s29 + $0xf8] sm:$0xff] %v3889_v31 }
 0x6a8 PF: > { %s3931_s22 = smul.u32 %s6389_s30, %s6393_s9  ;;  %s3937_s23 = sshll.u32 %s6589_s29, 4  ;;  %s3938_s23 = int_to_ptr.vmem [resolvable:$true] %s3937_s23 }
 0x6a9   : > { %s3924_s15 = scalar_lea.sflag [#allocation8], %s336_s2  ;;  %s6317_s9 = scalar_lea.hbm %s7155_s8, 512 }
 0x6aa   : > { %s5483_s17 = sshll.u32 %s3931_s22, 8 }
 0x6ab   : > { %s3936_s26 = scalar_lea.hbm %s7155_s8, %s5483_s17 }
 0x6ac   : > { %s3939_s13 = sshll.u32 %s3936_s26, 4  ;;  %s3940_s13 = int_to_ptr.hbm [resolvable:$true] %s3939_s13 }
 0x6ad   : > { %s6311_s14 = sshra.s32 %s3940_s13, 4  ;;  %s6312_s14 = int_to_ptr.hbm [resolvable:$true] %s6311_s14 }
 0x6ae   : > { %s6313_s24 = scalar_lea.hbm %s6312_s14, 256  ;;  %p6318_p13 = scmp.lt.s32.totalorder %s6312_s14, %s7155_s8 }
 0x6af   : > { %p6314_p10 = scmp.ne.s32.totalorder %s6312_s14, %s6313_s24  ;;  %p6319_p0 = scmp.lt.s32.totalorder %s6317_s9, %s6313_s24 }
 0x6b1   : > { %p6315_p11 = pnand %p6314_p10, %p6515_p6  ;;  %p6320_p1 = por %p6319_p0, %p6318_p13 }
 0x6b3   : > { %p6316_p12 = pneg %p6315_p11 }
 0x6b5   : > { %p6321_p2 = pnand %p6320_p1, %p6316_p12 }
 0x6b7   : > { %6324 = shalt.err (!%p6321_p2)
}
 0x6b8   : > { %s6414_s2 = smov 128   ;;  %s6415_s10 = smov 8  }
 0x6b9   : > { %6049 = dma.vmem_to_hbm [thread:$0]  (%p6515_p6), %s3938_s23, 4096, %s3940_s13, %s3924_s15, %s6414_s2, %s6414_s2, %s6415_s10  }
 0x6ba PF: > { %s7178_s11 = sld [smem:[#allocation24_spill]]  ;;  %p6076_p3 = scmp.ge.s32.totalorder %s6405_s12, 2 }
 0x6bc   : > { %p6065_p4 = pnand %p6076_p3, %p6522_p8 }
 0x6be   : > { %p6066_p5 = pneg %p6065_p4 }
 0x6c0   : > { %s3954_s20 = sand.u32 1, %s7178_s11  }
 0x6c1   : > { %s3955_s22 = scalar_lea.sflag [#allocation8], %s3954_s20 }
 0x6c2   : > { %6372 = dma.done.wait (%p6066_p5), %s3955_s22, 4096  }
 0x6c3   : > { %6374 = vsyncadd (%p6066_p5), %s3955_s22, 4294963200  ;;  %s24_s12 = sadd.s32 1, %s6405_s12   ;;  %s7180_s17 = sld [smem:[#allocation25_spill]] }
 0x6c4   : > { %p21_p7 = scmp.ge.s32.totalorder %s24_s12, 6   ;;  %s7181_s29 = sld [smem:[#allocation31_spill]] }
 0x6c5   : > { %s7182_s30 = sld [smem:[#allocation26_spill]]  ;;  %s7186_s27 = smov %s6381_s28 }
 0x6c6   : > { %s7183_s9 = sld [smem:[#allocation27_spill]]  ;;  %23 = sbr.rel (!%p21_p7) target bundleno = 10 (0xa), region = 120 }
 0x6c7   : > { %s7184_s10 = sld [smem:[#allocation28_spill]] }
 0x6c8   : > { %s7185_s11 = sld [smem:[#allocation29_spill]] }
 0x6c9   : > { %s7187_s28 = smov %s7180_s17 }
 0x6cb   :  { %3961 = vsyncpa [#allocation7], 1 }
 0x6cc   :  { %3963 = vsyncpa [#allocation7 + $0x1], 1 }
 0x6cd   :  { %3964 = vsyncpa [#allocation10], 1 }
 0x6ce   :  { %3965 = vsyncpa [#allocation13], 1 }
 0x6cf   :  { %3966 = vsyncpa [#allocation8], 1 }
 0x6d0   :  { %3968 = vsyncpa [#allocation8 + $0x1], 1 }
 0x6d1   :  { %3969 = vsyncmov [#allocation5] }
 0x6d4   :  { %s3970_s19 = vpop.sfrf %3969 }
 0x6d5   :  { %p5200_p6 = scmp.ne.s32.totalorder %s3970_s19, 0 }
 0x6d7   :  { %3974 = shalt.err (%p5200_p6)  }

</bundles_post_ra>
